<compile_context>
chip_gen: v7x
topology: tpu7x:2x2x1
jax: 0.10.0
libtpu: 0.0.40
codegen_flags: <defaults>
</compile_context>

<pallas_src>
import functools

import jax
import jax.numpy as jnp
from jax.experimental import pallas as pl
from jax.experimental.pallas import tpu as pltpu


def _silu(x):
    return x * jax.nn.sigmoid(x)


_WEIGHT_ORDER = ("w1", "b1", "w2", "b2", "w3", "b3",
                 "w4", "b4", "w5", "b5", "w6", "b6")


def ae_kernel(x_ref,
              w1_ref, b1_ref, w2_ref, b2_ref, w3_ref, b3_ref,   # encoder
              w4_ref, b4_ref, w5_ref, b5_ref, w6_ref, b6_ref,   # decoder
              o_ref):
    """One batch tile of the full encoder->decoder chain (all f32)."""

    def dense(h, w_ref, b_ref):
        return jnp.dot(h, w_ref[...],
                       preferred_element_type=jnp.float32) + b_ref[...]

    x = x_ref[...]

    # ---- Encoder ----
    h = _silu(dense(x, w1_ref, b1_ref))
    h = _silu(dense(h, w2_ref, b2_ref))
    emb = _silu(dense(h, w3_ref, b3_ref))
    # (noise would be added to `emb` here if add_noise=True)

    # ---- Decoder ----
    d = _silu(dense(emb, w4_ref, b4_ref))
    d = _silu(dense(d, w5_ref, b5_ref))
    o_ref[...] = dense(d, w6_ref, b6_ref).astype(o_ref.dtype)


def ae_reference(x, params):
    """Pure-JAX f32 reference (also the ragged-batch fallback path)."""
    h = _silu(x @ params["w1"] + params["b1"])
    h = _silu(h @ params["w2"] + params["b2"])
    emb = _silu(h @ params["w3"] + params["b3"])
    d = _silu(emb @ params["w4"] + params["b4"])
    d = _silu(d @ params["w5"] + params["b5"])
    return d @ params["w6"] + params["b6"]


_ae_reference_jit = jax.jit(ae_reference)


@functools.partial(jax.jit, static_argnames=("block_b",))
def _ae_forward_pallas(x, params, block_b):
    B, D_in = x.shape
    D_out = params["w6"].shape[1]
    grid = (B // block_b,)

    weight_args = [params[k] for k in _WEIGHT_ORDER]

    # Weights/biases: full arrays with a constant index_map -> resident in
    # VMEM across all grid steps (total ~80 KB), no per-step re-DMA.
    def full_spec(arr):
        return pl.BlockSpec(arr.shape, lambda i: (0, 0))

    in_specs = [pl.BlockSpec((block_b, D_in), lambda i: (i, 0))]
    in_specs += [full_spec(w) for w in weight_args]
    out_spec = pl.BlockSpec((block_b, D_out), lambda i: (i, 0))

    return pl.pallas_call(
        ae_kernel,
        out_shape=jax.ShapeDtypeStruct((B, D_out), x.dtype),
        grid_spec=pltpu.PrefetchScalarGridSpec(
            num_scalar_prefetch=0,
            grid=grid,
            in_specs=in_specs,
            out_specs=out_spec,
        ),
        compiler_params=pltpu.CompilerParams(
            dimension_semantics=("parallel",)),
    )(x, *weight_args)


def _num_tensorcores():
    """Best-effort detection of TensorCores per chip (v7x has 2, v5e/v6e 1)."""
    try:
        kind = jax.devices()[0].device_kind.lower()
    except Exception:
        return 1
    if "v7" in kind or "7x" in kind:
        return 2
    return 1


def _pick_block_b(B):
    """Grid=(1,) on single-TC chips; >=2 steps per core on dual-TC chips."""
    n_tc = _num_tensorcores()
    target_steps = 2 * n_tc if n_tc > 1 else 1
    blk = max(8, B // target_steps)
    blk -= blk % 8
    while blk > 8 and B % blk != 0:
        blk -= 8
    if blk < 8 or B % blk != 0 or blk % 8 != 0:
        return 0  # signal: use the XLA fallback
    return blk


def ae_forward(x, params, *, block_b=None):
    """AE forward as one Pallas kernel, tiled over batch."""
    B, D_in = x.shape
    D_out = params["w6"].shape[1]
    assert D_out == D_in

    if block_b is None:
        block_b = _pick_block_b(B)

    # Tiny / ragged batches: the kernel would be pure launch + DMA latency;
    # let XLA's fused HLO handle it (same f32 numerics as the kernel path).
    if block_b <= 0 or B % block_b != 0 or block_b % 8 != 0:
        return _ae_reference_jit(x, params)

    return _ae_forward_pallas(x, params, block_b)


def init_params(key, input_size, encode_size=32, dtype=jnp.float32):
    """Deterministic parameter init matching the PyTorch module's shapes.

    Weights are stored as (in_features, out_features) = transpose of
    torch.nn.Linear's weight layout.
    """
    dims = [
        ("w1", (input_size, 128)), ("b1", (1, 128)),
        ("w2", (128, 32)),         ("b2", (1, 32)),
        ("w3", (32, encode_size)), ("b3", (1, encode_size)),
        ("w4", (encode_size, 32)), ("b4", (1, 32)),
        ("w5", (32, 64)),          ("b5", (1, 64)),
        ("w6", (64, input_size)),  ("b6", (1, input_size)),
    ]
    params = {}
    for name, shape in dims:
        key, sub = jax.random.split(key)
        fan_in = shape[0] if name.startswith("w") else shape[1]
        bound = 1.0 / jnp.sqrt(jnp.asarray(fan_in, dtype))
        params[name] = jax.random.uniform(
            sub, shape, dtype=dtype, minval=-bound, maxval=bound)
    return params


if __name__ == "__main__":
    key = jax.random.PRNGKey(0)
    k_x, k_p = jax.random.split(key)

    # Batch large enough to fill MXU rows while staying tiny (~128 KB of x).
    B = 512
    INPUT_SIZE = 64
    ENCODE_SIZE = 32

    x = jax.random.normal(k_x, (B, INPUT_SIZE), dtype=jnp.float32)
    params = init_params(k_p, INPUT_SIZE, ENCODE_SIZE)

    out = ae_forward(x, params)
    out = jax.block_until_ready(out)

    ref = jax.block_until_ready(_ae_reference_jit(x, params))
    assert out.shape == (B, INPUT_SIZE)
    # Both paths are f32 with MXU default precision; modest tolerance for
    # accumulation-order / MXU-pass differences.
    assert jnp.allclose(out, ref, atol=2e-2, rtol=2e-2), (
        float(jnp.max(jnp.abs(out - ref))))

    print("KERNEL_OK")
</pallas_src>

<mosaic_0001>
module attributes {stable_mosaic.version = 11 : i64} {
  func.func @ae_kernel(%arg0: i32, %arg1: memref<512x64xf32, #tpu.memory_space<vmem>>, %arg2: memref<64x128xf32, #tpu.memory_space<vmem>>, %arg3: memref<1x128xf32, #tpu.memory_space<vmem>>, %arg4: memref<128x32xf32, #tpu.memory_space<vmem>>, %arg5: memref<1x32xf32, #tpu.memory_space<vmem>>, %arg6: memref<32x32xf32, #tpu.memory_space<vmem>>, %arg7: memref<1x32xf32, #tpu.memory_space<vmem>>, %arg8: memref<32x32xf32, #tpu.memory_space<vmem>>, %arg9: memref<1x32xf32, #tpu.memory_space<vmem>>, %arg10: memref<32x64xf32, #tpu.memory_space<vmem>>, %arg11: memref<1x64xf32, #tpu.memory_space<vmem>>, %arg12: memref<64x64xf32, #tpu.memory_space<vmem>>, %arg13: memref<1x64xf32, #tpu.memory_space<vmem>>, %arg14: memref<512x64xf32, #tpu.memory_space<vmem>>) attributes {dimension_semantics = [#tpu.dimension_semantics<parallel>], iteration_bounds = array<i64: 1>, scalar_prefetch = 0 : i64, scratch_operands = 0 : i64, tpu.core_type = #tpu.core_type<tc>, window_params = [{transform_indices = @transform_0, window_bounds = array<i64: 512, 64>}, {pipeline_mode = #tpu.pipeline_mode<synchronous>, transform_indices = @transform_1, window_bounds = array<i64: 64, 128>}, {pipeline_mode = #tpu.pipeline_mode<synchronous>, transform_indices = @transform_2, window_bounds = array<i64: 1, 128>}, {pipeline_mode = #tpu.pipeline_mode<synchronous>, transform_indices = @transform_3, window_bounds = array<i64: 128, 32>}, {pipeline_mode = #tpu.pipeline_mode<synchronous>, transform_indices = @transform_4, window_bounds = array<i64: 1, 32>}, {pipeline_mode = #tpu.pipeline_mode<synchronous>, transform_indices = @transform_5, window_bounds = array<i64: 32, 32>}, {pipeline_mode = #tpu.pipeline_mode<synchronous>, transform_indices = @transform_6, window_bounds = array<i64: 1, 32>}, {pipeline_mode = #tpu.pipeline_mode<synchronous>, transform_indices = @transform_7, window_bounds = array<i64: 32, 32>}, {pipeline_mode = #tpu.pipeline_mode<synchronous>, transform_indices = @transform_8, window_bounds = array<i64: 1, 32>}, {pipeline_mode = #tpu.pipeline_mode<synchronous>, transform_indices = @transform_9, window_bounds = array<i64: 32, 64>}, {pipeline_mode = #tpu.pipeline_mode<synchronous>, transform_indices = @transform_10, window_bounds = array<i64: 1, 64>}, {pipeline_mode = #tpu.pipeline_mode<synchronous>, transform_indices = @transform_11, window_bounds = array<i64: 64, 64>}, {pipeline_mode = #tpu.pipeline_mode<synchronous>, transform_indices = @transform_12, window_bounds = array<i64: 1, 64>}, {transform_indices = @transform_13, window_bounds = array<i64: 512, 64>}]} {
    %c0 = arith.constant 0 : index
    %c0_0 = arith.constant 0 : index
    %0 = vector.load %arg1[%c0, %c0_0] : memref<512x64xf32, #tpu.memory_space<vmem>>, vector<512x64xf32>
    %c0_1 = arith.constant 0 : index
    %c0_2 = arith.constant 0 : index
    %1 = vector.load %arg2[%c0_1, %c0_2] : memref<64x128xf32, #tpu.memory_space<vmem>>, vector<64x128xf32>
    %cst = arith.constant dense<0.000000e+00> : vector<512x128xf32>
    %2 = tpu.matmul %0, %1, %cst {dimension_numbers = #tpu.dot_dimension_numbers<[1], [0], [0], [1], [0, 0, 1, 1], [], []>} : vector<512x64xf32>, vector<64x128xf32>, vector<512x128xf32> -> vector<512x128xf32>
    %c0_3 = arith.constant 0 : index
    %c0_4 = arith.constant 0 : index
    %3 = vector.load %arg3[%c0_3, %c0_4] : memref<1x128xf32, #tpu.memory_space<vmem>>, vector<1x128xf32>
    %4 = vector.broadcast %3 : vector<1x128xf32> to vector<512x128xf32>
    %5 = arith.addf %2, %4 : vector<512x128xf32>
    %6 = arith.negf %5 : vector<512x128xf32>
    %7 = math.exp %6 : vector<512x128xf32>
    %cst_5 = arith.constant 1.000000e+00 : f32
    %8 = vector.broadcast %cst_5 : f32 to vector<512x128xf32>
    %9 = arith.addf %8, %7 : vector<512x128xf32>
    %10 = arith.divf %8, %9 : vector<512x128xf32>
    %11 = arith.mulf %5, %10 : vector<512x128xf32>
    %c0_6 = arith.constant 0 : index
    %c0_7 = arith.constant 0 : index
    %12 = vector.load %arg4[%c0_6, %c0_7] : memref<128x32xf32, #tpu.memory_space<vmem>>, vector<128x32xf32>
    %cst_8 = arith.constant dense<0.000000e+00> : vector<512x32xf32>
    %13 = tpu.matmul %11, %12, %cst_8 {dimension_numbers = #tpu.dot_dimension_numbers<[1], [0], [0], [1], [0, 0, 1, 1], [], []>} : vector<512x128xf32>, vector<128x32xf32>, vector<512x32xf32> -> vector<512x32xf32>
    %c0_9 = arith.constant 0 : index
    %c0_10 = arith.constant 0 : index
    %14 = vector.load %arg5[%c0_9, %c0_10] : memref<1x32xf32, #tpu.memory_space<vmem>>, vector<1x32xf32>
    %15 = vector.broadcast %14 : vector<1x32xf32> to vector<512x32xf32>
    %16 = arith.addf %13, %15 : vector<512x32xf32>
    %17 = arith.negf %16 : vector<512x32xf32>
    %18 = math.exp %17 : vector<512x32xf32>
    %cst_11 = arith.constant 1.000000e+00 : f32
    %19 = vector.broadcast %cst_11 : f32 to vector<512x32xf32>
    %20 = arith.addf %19, %18 : vector<512x32xf32>
    %21 = arith.divf %19, %20 : vector<512x32xf32>
    %22 = arith.mulf %16, %21 : vector<512x32xf32>
    %c0_12 = arith.constant 0 : index
    %c0_13 = arith.constant 0 : index
    %23 = vector.load %arg6[%c0_12, %c0_13] : memref<32x32xf32, #tpu.memory_space<vmem>>, vector<32x32xf32>
    %cst_14 = arith.constant dense<0.000000e+00> : vector<512x32xf32>
    %24 = tpu.matmul %22, %23, %cst_14 {dimension_numbers = #tpu.dot_dimension_numbers<[1], [0], [0], [1], [0, 0, 1, 1], [], []>} : vector<512x32xf32>, vector<32x32xf32>, vector<512x32xf32> -> vector<512x32xf32>
    %c0_15 = arith.constant 0 : index
    %c0_16 = arith.constant 0 : index
    %25 = vector.load %arg7[%c0_15, %c0_16] : memref<1x32xf32, #tpu.memory_space<vmem>>, vector<1x32xf32>
    %26 = vector.broadcast %25 : vector<1x32xf32> to vector<512x32xf32>
    %27 = arith.addf %24, %26 : vector<512x32xf32>
    %28 = arith.negf %27 : vector<512x32xf32>
    %29 = math.exp %28 : vector<512x32xf32>
    %cst_17 = arith.constant 1.000000e+00 : f32
    %30 = vector.broadcast %cst_17 : f32 to vector<512x32xf32>
    %31 = arith.addf %30, %29 : vector<512x32xf32>
    %32 = arith.divf %30, %31 : vector<512x32xf32>
    %33 = arith.mulf %27, %32 : vector<512x32xf32>
    %c0_18 = arith.constant 0 : index
    %c0_19 = arith.constant 0 : index
    %34 = vector.load %arg8[%c0_18, %c0_19] : memref<32x32xf32, #tpu.memory_space<vmem>>, vector<32x32xf32>
    %cst_20 = arith.constant dense<0.000000e+00> : vector<512x32xf32>
    %35 = tpu.matmul %33, %34, %cst_20 {dimension_numbers = #tpu.dot_dimension_numbers<[1], [0], [0], [1], [0, 0, 1, 1], [], []>} : vector<512x32xf32>, vector<32x32xf32>, vector<512x32xf32> -> vector<512x32xf32>
    %c0_21 = arith.constant 0 : index
    %c0_22 = arith.constant 0 : index
    %36 = vector.load %arg9[%c0_21, %c0_22] : memref<1x32xf32, #tpu.memory_space<vmem>>, vector<1x32xf32>
    %37 = vector.broadcast %36 : vector<1x32xf32> to vector<512x32xf32>
    %38 = arith.addf %35, %37 : vector<512x32xf32>
    %39 = arith.negf %38 : vector<512x32xf32>
    %40 = math.exp %39 : vector<512x32xf32>
    %cst_23 = arith.constant 1.000000e+00 : f32
    %41 = vector.broadcast %cst_23 : f32 to vector<512x32xf32>
    %42 = arith.addf %41, %40 : vector<512x32xf32>
    %43 = arith.divf %41, %42 : vector<512x32xf32>
    %44 = arith.mulf %38, %43 : vector<512x32xf32>
    %c0_24 = arith.constant 0 : index
    %c0_25 = arith.constant 0 : index
    %45 = vector.load %arg10[%c0_24, %c0_25] : memref<32x64xf32, #tpu.memory_space<vmem>>, vector<32x64xf32>
    %cst_26 = arith.constant dense<0.000000e+00> : vector<512x64xf32>
    %46 = tpu.matmul %44, %45, %cst_26 {dimension_numbers = #tpu.dot_dimension_numbers<[1], [0], [0], [1], [0, 0, 1, 1], [], []>} : vector<512x32xf32>, vector<32x64xf32>, vector<512x64xf32> -> vector<512x64xf32>
    %c0_27 = arith.constant 0 : index
    %c0_28 = arith.constant 0 : index
    %47 = vector.load %arg11[%c0_27, %c0_28] : memref<1x64xf32, #tpu.memory_space<vmem>>, vector<1x64xf32>
    %48 = vector.broadcast %47 : vector<1x64xf32> to vector<512x64xf32>
    %49 = arith.addf %46, %48 : vector<512x64xf32>
    %50 = arith.negf %49 : vector<512x64xf32>
    %51 = math.exp %50 : vector<512x64xf32>
    %cst_29 = arith.constant 1.000000e+00 : f32
    %52 = vector.broadcast %cst_29 : f32 to vector<512x64xf32>
    %53 = arith.addf %52, %51 : vector<512x64xf32>
    %54 = arith.divf %52, %53 : vector<512x64xf32>
    %55 = arith.mulf %49, %54 : vector<512x64xf32>
    %c0_30 = arith.constant 0 : index
    %c0_31 = arith.constant 0 : index
    %56 = vector.load %arg12[%c0_30, %c0_31] : memref<64x64xf32, #tpu.memory_space<vmem>>, vector<64x64xf32>
    %cst_32 = arith.constant dense<0.000000e+00> : vector<512x64xf32>
    %57 = tpu.matmul %55, %56, %cst_32 {dimension_numbers = #tpu.dot_dimension_numbers<[1], [0], [0], [1], [0, 0, 1, 1], [], []>} : vector<512x64xf32>, vector<64x64xf32>, vector<512x64xf32> -> vector<512x64xf32>
    %c0_33 = arith.constant 0 : index
    %c0_34 = arith.constant 0 : index
    %58 = vector.load %arg13[%c0_33, %c0_34] : memref<1x64xf32, #tpu.memory_space<vmem>>, vector<1x64xf32>
    %59 = vector.broadcast %58 : vector<1x64xf32> to vector<512x64xf32>
    %60 = arith.addf %57, %59 : vector<512x64xf32>
    %c0_35 = arith.constant 0 : index
    %c0_36 = arith.constant 0 : index
    %61 = vector.load %arg14[%c0_35, %c0_36] : memref<512x64xf32, #tpu.memory_space<vmem>>, vector<512x64xf32>
    tpu.vector_store %arg14[%c0_35, %c0_36], %60 {strides = array<i32>} : memref<512x64xf32, #tpu.memory_space<vmem>>, vector<512x64xf32>,
    return
  }
  func.func @transform_0(%arg0: i32) -> (i32, i32) {
    %c0_i32 = arith.constant 0 : i32
    %c0_i32_0 = arith.constant 0 : i32
    return %arg0, %c0_i32 : i32, i32
  }
  func.func @transform_1(%arg0: i32) -> (i32, i32) {
    %c0_i32 = arith.constant 0 : i32
    %c0_i32_0 = arith.constant 0 : i32
    %c0_i32_1 = arith.constant 0 : i32
    return %c0_i32, %c0_i32_0 : i32, i32
  }
  func.func @transform_2(%arg0: i32) -> (i32, i32) {
    %c0_i32 = arith.constant 0 : i32
    %c0_i32_0 = arith.constant 0 : i32
    %c0_i32_1 = arith.constant 0 : i32
    return %c0_i32, %c0_i32_0 : i32, i32
  }
  func.func @transform_3(%arg0: i32) -> (i32, i32) {
    %c0_i32 = arith.constant 0 : i32
    %c0_i32_0 = arith.constant 0 : i32
    %c0_i32_1 = arith.constant 0 : i32
    return %c0_i32, %c0_i32_0 : i32, i32
  }
  func.func @transform_4(%arg0: i32) -> (i32, i32) {
    %c0_i32 = arith.constant 0 : i32
    %c0_i32_0 = arith.constant 0 : i32
    %c0_i32_1 = arith.constant 0 : i32
    return %c0_i32, %c0_i32_0 : i32, i32
  }
  func.func @transform_5(%arg0: i32) -> (i32, i32) {
    %c0_i32 = arith.constant 0 : i32
    %c0_i32_0 = arith.constant 0 : i32
    %c0_i32_1 = arith.constant 0 : i32
    return %c0_i32, %c0_i32_0 : i32, i32
  }
  func.func @transform_6(%arg0: i32) -> (i32, i32) {
    %c0_i32 = arith.constant 0 : i32
    %c0_i32_0 = arith.constant 0 : i32
    %c0_i32_1 = arith.constant 0 : i32
    return %c0_i32, %c0_i32_0 : i32, i32
  }
  func.func @transform_7(%arg0: i32) -> (i32, i32) {
    %c0_i32 = arith.constant 0 : i32
    %c0_i32_0 = arith.constant 0 : i32
    %c0_i32_1 = arith.constant 0 : i32
    return %c0_i32, %c0_i32_0 : i32, i32
  }
  func.func @transform_8(%arg0: i32) -> (i32, i32) {
    %c0_i32 = arith.constant 0 : i32
    %c0_i32_0 = arith.constant 0 : i32
    %c0_i32_1 = arith.constant 0 : i32
    return %c0_i32, %c0_i32_0 : i32, i32
  }
  func.func @transform_9(%arg0: i32) -> (i32, i32) {
    %c0_i32 = arith.constant 0 : i32
    %c0_i32_0 = arith.constant 0 : i32
    %c0_i32_1 = arith.constant 0 : i32
    return %c0_i32, %c0_i32_0 : i32, i32
  }
  func.func @transform_10(%arg0: i32) -> (i32, i32) {
    %c0_i32 = arith.constant 0 : i32
    %c0_i32_0 = arith.constant 0 : i32
    %c0_i32_1 = arith.constant 0 : i32
    return %c0_i32, %c0_i32_0 : i32, i32
  }
  func.func @transform_11(%arg0: i32) -> (i32, i32) {
    %c0_i32 = arith.constant 0 : i32
    %c0_i32_0 = arith.constant 0 : i32
    %c0_i32_1 = arith.constant 0 : i32
    return %c0_i32, %c0_i32_0 : i32, i32
  }
  func.func @transform_12(%arg0: i32) -> (i32, i32) {
    %c0_i32 = arith.constant 0 : i32
    %c0_i32_0 = arith.constant 0 : i32
    %c0_i32_1 = arith.constant 0 : i32
    return %c0_i32, %c0_i32_0 : i32, i32
  }
  func.func @transform_13(%arg0: i32) -> (i32, i32) {
    %c0_i32 = arith.constant 0 : i32
    %c0_i32_0 = arith.constant 0 : i32
    return %arg0, %c0_i32 : i32, i32
  }
}

</mosaic_0001>

<bundles_post_ra>
// kernel: _ae_forward_pallas.1
= control target key start
LH: loop header
LB: loop body
LE: loop exit
PB: predicated region body
PF: predicated region fallthrough
CT: control target
= control target key end

     0   :  { %vm123_vm0 = vcmask 523264   ;;  %vm2016_vm1 = vcmask 261120   ;;  %s11557_s1 = inlined_call_operand.vmem [shape: f32[64,128], index: 1, kind: input, shape index: {}]   ;;  %s11558_s0 = inlined_call_operand.vmem [shape: f32[512,64], index: 0, kind: input, shape index: {}]   ;;  %s11559_s3 = inlined_call_operand.vmem [shape: f32[128,32], index: 3, kind: input, shape index: {}]   ;;  %s11560_s2 = inlined_call_operand.vmem [shape: f32[1,128], index: 2, kind: input, shape index: {}]   ;;  %s11561_s5 = inlined_call_operand.vmem [shape: f32[32,32], index: 5, kind: input, shape index: {}]   ;;  %s11562_s4 = inlined_call_operand.vmem [shape: f32[1,32], index: 4, kind: input, shape index: {}]   ;;  %s11563_s7 = inlined_call_operand.vmem [shape: f32[32,32], index: 7, kind: input, shape index: {}]   ;;  %s11564_s6 = inlined_call_operand.vmem [shape: f32[1,32], index: 6, kind: input, shape index: {}]   ;;  %s11565_s9 = inlined_call_operand.vmem [shape: f32[32,64], index: 9, kind: input, shape index: {}]   ;;  %s11566_s8 = inlined_call_operand.vmem [shape: f32[1,32], index: 8, kind: input, shape index: {}]   ;;  %s11567_s11 = inlined_call_operand.vmem [shape: f32[64,64], index: 11, kind: input, shape index: {}]   ;;  %s11568_s10 = inlined_call_operand.vmem [shape: f32[1,64], index: 10, kind: input, shape index: {}]   ;;  %s11569_s12 = inlined_call_operand.vmem [shape: f32[1,64], index: 12, kind: input, shape index: {}]   ;;  %s11570_s13 = inlined_call_operand.vmem [shape: f32[512,64], index: 13, kind: output, shape index: {}]  }
   0x1   :  { %v108_v0 = vld [vmem:[%s11557_s1] sm:$0xff]  ;;  %v109_v1 = vld [vmem:[%s11557_s1 + $0x8] sm:$0xff]  ;;  %v110_v2 = vld [vmem:[%s11557_s1 + $0x10] sm:$0xff] }
   0x2   :  { %v7512_v3 = vpack.c.bf16 %v109_v1, %v108_v0  ;;  %v111_v4 = vld [vmem:[%s11557_s1 + $0x18] sm:$0xff]  ;;  %v112_v6 = vld [vmem:[%s11557_s1 + $0x20] sm:$0xff]  ;;  %v113_v7 = vld [vmem:[%s11557_s1 + $0x28] sm:$0xff] }
   0x3   :  { %v7516_v5 = vpack.c.bf16 %v111_v4, %v110_v2  ;;  %v44_v8 = vld [vmem:[%s11558_s0] sm:$0xff]  ;;  %v7520_v9 = vpack.c.bf16 %v113_v7, %v112_v6  ;;  %v114_v10 = vld [vmem:[%s11557_s1 + $0x30] sm:$0xff]  ;;  %v115_v11 = vld [vmem:[%s11557_s1 + $0x38] sm:$0xff] }
   0x4   :  { %7513 = vmatprep.subr.bf16.mxu0 %v7512_v3  ;;  %6864 = vmatprep.mubr.msk.f32.mxu0 %vm123_vm0, %v44_v8  ;;  %v7524_v12 = vpack.c.bf16 %v115_v11, %v114_v10  ;;  %v45_v13 = vld [vmem:[%s11558_s0 + $0x8] sm:$0xff]  ;;  %v46_v14 = vld [vmem:[%s11558_s0 + $0x10] sm:$0xff]  ;;  %v47_v15 = vld [vmem:[%s11558_s0 + $0x18] sm:$0xff] }
   0x5   :  { %7515 = vmatpush3.bf16.msra.mxu0 %v7512_v3  ;;  %v48_v16 = vld [vmem:[%s11558_s0 + $0x20] sm:$0xff]  ;;  %v1150_v18 = vld [vmem:[%s11559_s3 + $0x8] sm:$0xff]  ;;  %v50_v21 = vld [vmem:[%s11558_s0 + $0x30] sm:$0xff] }
   0x6   :  { %7517 = vmatprep.subr.bf16.mxu0 %v7516_v5  ;;  %v1149_v17 = vld [vmem:[%s11559_s3] sm:$0xff]  ;;  %v49_v20 = vld [vmem:[%s11558_s0 + $0x28] sm:$0xff]  ;;  %v1151_v22 = vld [vmem:[%s11559_s3 + $0x10] sm:$0xff] }
   0x7   :  { %v7528_v19 = vpack.c.bf16 %v1150_v18, %v1149_v17  ;;  %v1152_v23 = vld [vmem:[%s11559_s3 + $0x18] sm:$0xff]  ;;  %v1153_v24 = vld [vmem:[%s11559_s3 + $0x20] sm:$0xff]  ;;  %v1154_v25 = vld [vmem:[%s11559_s3 + $0x28] sm:$0xff] }
   0x8   :  { %v7532_v26 = vpack.c.bf16 %v1152_v23, %v1151_v22  ;;  %v7536_v27 = vpack.c.bf16 %v1154_v25, %v1153_v24  ;;  %v51_v28 = vld [vmem:[%s11558_s0 + $0x38] sm:$0xff]  ;;  %v1155_v29 = vld [vmem:[%s11559_s3 + $0x30] sm:$0xff]  ;;  %v52_v31 = vld [vmem:[%s11558_s0 + $0x40] sm:$0xff] }
   0x9   :  { %7519 = vmatpush3.bf16.msra.mxu0 %v7516_v5  ;;  %7600 = vmatprep.subr.bf16.mxu1 %v7528_v19  ;;  %v1156_v30 = vld [vmem:[%s11559_s3 + $0x38] sm:$0xff]  ;;  %v53_v33 = vld [vmem:[%s11558_s0 + $0x48] sm:$0xff]  ;;  %v1157_v34 = vld [vmem:[%s11559_s3 + $0x40] sm:$0xff] }
   0xa   :  { %7521 = vmatprep.subr.bf16.mxu0 %v7520_v9  ;;  %7608 = vmatpush3.bf16.msra.mxu1 %v7528_v19  ;;  %v7540_v32 = vpack.c.bf16 %v1156_v30, %v1155_v29  ;;  %v1158_v35 = vld [vmem:[%s11559_s3 + $0x48] sm:$0xff]  ;;  %v54_v36 = vld [vmem:[%s11558_s0 + $0x50] sm:$0xff]  ;;  %v55_v38 = vld [vmem:[%s11558_s0 + $0x58] sm:$0xff] }
   0xb   :  { %7601 = vmatprep.subr.bf16.mxu1 %v7532_v26  ;;  %v7544_v37 = vpack.c.bf16 %v1158_v35, %v1157_v34  ;;  %v1159_v39 = vld [vmem:[%s11559_s3 + $0x50] sm:$0xff]  ;;  %v1160_v40 = vld [vmem:[%s11559_s3 + $0x58] sm:$0xff]  ;;  %v56_v41 = vld [vmem:[%s11558_s0 + $0x60] sm:$0xff] }
   0xc   :  { %v7548_v42 = vpack.c.bf16 %v1160_v40, %v1159_v39  ;;  %v57_v43 = vld [vmem:[%s11558_s0 + $0x68] sm:$0xff]  ;;  %v58_v44 = vld [vmem:[%s11558_s0 + $0x70] sm:$0xff]  ;;  %v59_v45 = vld [vmem:[%s11558_s0 + $0x78] sm:$0xff] }
   0xd   :  { %7523 = vmatpush3.bf16.msra.mxu0 %v7520_v9  ;;  %v60_v46 = vld [vmem:[%s11558_s0 + $0x80] sm:$0xff]  ;;  %v61_v47 = vld [vmem:[%s11558_s0 + $0x88] sm:$0xff]  ;;  %v62_v48 = vld [vmem:[%s11558_s0 + $0x90] sm:$0xff] }
   0xe   :  { %7525 = vmatprep.subr.bf16.mxu0 %v7524_v12  ;;  %7609 = vmatpush3.bf16.msra.mxu1 %v7532_v26  ;;  %v63_v49 = vld [vmem:[%s11558_s0 + $0x98] sm:$0xff]  ;;  %v64_v50 = vld [vmem:[%s11558_s0 + $0xa0] sm:$0xff]  ;;  %v65_v51 = vld [vmem:[%s11558_s0 + $0xa8] sm:$0xff] }
   0xf   :  { %7602 = vmatprep.subr.bf16.mxu1 %v7536_v27  ;;  %v66_v52 = vld [vmem:[%s11558_s0 + $0xb0] sm:$0xff]  ;;  %v67_v53 = vld [vmem:[%s11558_s0 + $0xb8] sm:$0xff]  ;;  %v68_v54 = vld [vmem:[%s11558_s0 + $0xc0] sm:$0xff] }
  0x10   :  { %v69_v55 = vld [vmem:[%s11558_s0 + $0xc8] sm:$0xff]  ;;  %v70_v56 = vld [vmem:[%s11558_s0 + $0xd0] sm:$0xff]  ;;  %v71_v57 = vld [vmem:[%s11558_s0 + $0xd8] sm:$0xff] }
  0x11   :  { %7527 = vmatpush3.bf16.msra.mxu0 %v7524_v12  ;;  %v72_v58 = vld [vmem:[%s11558_s0 + $0xe0] sm:$0xff]  ;;  %v73_v59 = vld [vmem:[%s11558_s0 + $0xe8] sm:$0xff]  ;;  %v74_v60 = vld [vmem:[%s11558_s0 + $0xf0] sm:$0xff] }
  0x12   :  { %7529 = vmatprep.subr.bf16.mxu0 %v7528_v19  ;;  %7610 = vmatpush3.bf16.msra.mxu1 %v7536_v27  ;;  %v75_v61 = vld [vmem:[%s11558_s0 + $0xf8] sm:$0xff]  ;;  %v76_v62 = vld [vmem:[%s11558_s0 + $0x100] sm:$0xff]  ;;  %v77_v63 = vld [vmem:[%s11558_s0 + $0x108] sm:$0xff] }
  0x13   :  { %7603 = vmatprep.subr.bf16.mxu1 %v7540_v32  ;;  %v78_v0 = vld [vmem:[%s11558_s0 + $0x110] sm:$0xff]  ;;  %v79_v1 = vld [vmem:[%s11558_s0 + $0x118] sm:$0xff]  ;;  %v80_v2 = vld [vmem:[%s11558_s0 + $0x120] sm:$0xff] }
  0x14   :  { %6865 = vmatmul.mubr.msk.f32.vlgmr.msra.gmra.mrb[0].mxu0 %vm123_vm0, %v45_v13  ;;  %v81_v3 = vld [vmem:[%s11558_s0 + $0x128] sm:$0xff]  ;;  %v82_v4 = vld [vmem:[%s11558_s0 + $0x130] sm:$0xff]  ;;  %v83_v5 = vld [vmem:[%s11558_s0 + $0x138] sm:$0xff] }
  0x15   :  { %6867 = vmatprep.mubr.msk.f32.mxu0 %vm123_vm0, %v46_v14  ;;  %7531 = vmatpush3.bf16.msra.mxu0 %v7528_v19  ;;  %v84_v6 = vld [vmem:[%s11558_s0 + $0x140] sm:$0xff]  ;;  %v85_v7 = vld [vmem:[%s11558_s0 + $0x148] sm:$0xff]  ;;  %v86_v8 = vld [vmem:[%s11558_s0 + $0x150] sm:$0xff] }
  0x16   :  { %7533 = vmatprep.subr.bf16.mxu0 %v7532_v26  ;;  %7611 = vmatpush3.bf16.msra.mxu1 %v7540_v32  ;;  %v87_v9 = vld [vmem:[%s11558_s0 + $0x158] sm:$0xff]  ;;  %v88_v10 = vld [vmem:[%s11558_s0 + $0x160] sm:$0xff]  ;;  %v89_v11 = vld [vmem:[%s11558_s0 + $0x168] sm:$0xff] }
  0x17   :  { %7604 = vmatprep.subr.bf16.mxu1 %v7544_v37  ;;  %v90_v12 = vld [vmem:[%s11558_s0 + $0x170] sm:$0xff]  ;;  %v91_v13 = vld [vmem:[%s11558_s0 + $0x178] sm:$0xff]  ;;  %v92_v14 = vld [vmem:[%s11558_s0 + $0x180] sm:$0xff] }
  0x18   :  { %6868 = vmatmul.mubr.msk.f32.gmra.mrb[2].mxu0 %vm123_vm0, %v47_v15  ;;  %v93_v15 = vld [vmem:[%s11558_s0 + $0x188] sm:$0xff]  ;;  %v95_v17 = vld [vmem:[%s11558_s0 + $0x198] sm:$0xff]  ;;  %v96_v18 = vld [vmem:[%s11558_s0 + $0x1a0] sm:$0xff] }
  0x19   :  { %6870 = vmatprep.mubr.msk.f32.mxu0 %vm123_vm0, %v48_v16  ;;  %7535 = vmatpush3.bf16.msra.mxu0 %v7532_v26  ;;  %v94_v16 = vld [vmem:[%s11558_s0 + $0x190] sm:$0xff]  ;;  %v97_v19 = vld [vmem:[%s11558_s0 + $0x1a8] sm:$0xff]  ;;  %v1161_v22 = vld [vmem:[%s11559_s3 + $0x60] sm:$0xff] }
  0x1a   :  { %7537 = vmatprep.subr.bf16.mxu0 %v7536_v27  ;;  %7612 = vmatpush3.bf16.msra.mxu1 %v7544_v37  ;;  %v1162_v23 = vld [vmem:[%s11559_s3 + $0x68] sm:$0xff]  ;;  %v100_v24 = vld [vmem:[%s11558_s0 + $0x1c0] sm:$0xff]  ;;  %v1164_v29 = vld [vmem:[%s11559_s3 + $0x78] sm:$0xff] }
  0x1b   :  { %7605 = vmatprep.subr.bf16.mxu1 %v7548_v42  ;;  %v7552_v25 = vpack.c.bf16 %v1162_v23, %v1161_v22  ;;  %v101_v26 = vld [vmem:[%s11558_s0 + $0x1c8] sm:$0xff]  ;;  %v106_v34 = vld [vmem:[%s11558_s0 + $0x1f0] sm:$0xff]  ;;  %v107_v35 = vld [vmem:[%s11558_s0 + $0x1f8] sm:$0xff] }
  0x1c   :  { %6871 = vmatmul.mubr.msk.f32.gmra.mrb[4].mxu0 %vm123_vm0, %v49_v20  ;;  %v98_v20 = vld [vmem:[%s11558_s0 + $0x1b0] sm:$0xff] }
  0x1d   :  { %6873 = vmatprep.mubr.msk.f32.mxu0 %vm123_vm0, %v50_v21  ;;  %7539 = vmatpush3.bf16.msra.mxu0 %v7536_v27  ;;  %v99_v21 = vld [vmem:[%s11558_s0 + $0x1b8] sm:$0xff]  ;;  %v102_v27 = vld [vmem:[%s11558_s0 + $0x1d0] sm:$0xff] }
  0x1e   :  { %7541 = vmatprep.subr.bf16.mxu0 %v7540_v32  ;;  %7613 = vmatpush3.bf16.msra.mxu1 %v7548_v42 }
  0x1f   :  { %7606 = vmatprep.subr.bf16.mxu1 %v7552_v25 }
  0x20   :  { %6874 = vmatmul.mubr.msk.f32.gmra.mrb[6].mxu0 %vm123_vm0, %v51_v28  ;;  %v1163_v28 = vld [vmem:[%s11559_s3 + $0x70] sm:$0xff] }
  0x21   :  { %6876 = vmatprep.mubr.msk.f32.mxu0 %vm123_vm0, %v52_v31  ;;  %7543 = vmatpush3.bf16.msra.mxu0 %v7540_v32  ;;  %v7556_v30 = vpack.c.bf16 %v1164_v29, %v1163_v28  ;;  %v103_v31 = vld [vmem:[%s11558_s0 + $0x1d8] sm:$0xff]  ;;  %v104_v32 = vld [vmem:[%s11558_s0 + $0x1e0] sm:$0xff] }
  0x22   :  { %7545 = vmatprep.subr.bf16.mxu0 %v7544_v37  ;;  %7614 = vmatpush3.bf16.msra.mxu1 %v7552_v25 }
  0x23   :  { %7607 = vmatprep.subr.bf16.mxu1 %v7556_v30 }
  0x24   :  { %6877 = vmatmul.mubr.msk.f32.gmra.mrb[8].mxu0 %vm123_vm0, %v53_v33  ;;  %v105_v33 = vld [vmem:[%s11558_s0 + $0x1e8] sm:$0xff] }
  0x25   :  { %6879 = vmatprep.mubr.msk.f32.mxu0 %vm123_vm0, %v54_v36  ;;  %7547 = vmatpush3.bf16.msra.mxu0 %v7544_v37  ;;  %v9302_v36 = vld [vmem:[%s11560_s2] ss:$0 sm:$0xff] }
  0x26   :  { %7549 = vmatprep.subr.bf16.mxu0 %v7548_v42  ;;  %7615 = vmatpush3.bf16.msra.mxu1 %v7556_v30 }
  0x28   :  { %6880 = vmatmul.mubr.msk.f32.gmra.mrb[10].mxu0 %vm123_vm0, %v55_v38 }
  0x29   :  { %6882 = vmatprep.mubr.msk.f32.mxu0 %vm123_vm0, %v56_v41  ;;  %7551 = vmatpush3.bf16.msra.mxu0 %v7548_v42 }
  0x2a   :  { %7553 = vmatprep.subr.bf16.mxu0 %v7552_v25 }
  0x2c   :  { %6883 = vmatmul.mubr.msk.f32.gmra.mrb[12].mxu0 %vm123_vm0, %v57_v43 }
  0x2d   :  { %6885 = vmatprep.mubr.msk.f32.mxu0 %vm123_vm0, %v58_v44  ;;  %7555 = vmatpush3.bf16.msra.mxu0 %v7552_v25 }
  0x2e   :  { %7557 = vmatprep.subr.bf16.mxu0 %v7556_v30 }
  0x30   :  { %6886 = vmatmul.mubr.msk.f32.gmra.mrb[14].mxu0 %vm123_vm0, %v59_v45 }
  0x31   :  { %6888 = vmatprep.mubr.msk.f32.mxu0 %vm123_vm0, %v60_v46  ;;  %7559 = vmatpush3.bf16.msra.mxu0 %v7556_v30 }
  0x34   :  { %6889 = vmatmul.mubr.msk.f32.gmra.mrb[16].mxu0 %vm123_vm0, %v61_v47 }
  0x35   :  { %6891 = vmatprep.mubr.msk.f32.mxu0 %vm123_vm0, %v62_v48 }
  0x38   :  { %6892 = vmatmul.mubr.msk.f32.gmra.mrb[18].mxu0 %vm123_vm0, %v63_v49 }
  0x39   :  { %6894 = vmatprep.mubr.msk.f32.mxu0 %vm123_vm0, %v64_v50 }
  0x3c   :  { %6895 = vmatmul.mubr.msk.f32.gmra.mrb[20].mxu0 %vm123_vm0, %v65_v51 }
  0x3d   :  { %6897 = vmatprep.mubr.msk.f32.mxu0 %vm123_vm0, %v66_v52 }
  0x40   :  { %6898 = vmatmul.mubr.msk.f32.gmra.mrb[22].mxu0 %vm123_vm0, %v67_v53 }
  0x41   :  { %6900 = vmatprep.mubr.msk.f32.mxu0 %vm123_vm0, %v68_v54 }
  0x44   :  { %6901 = vmatmul.mubr.msk.f32.gmra.mrb[24].mxu0 %vm123_vm0, %v69_v55 }
  0x45   :  { %6903 = vmatprep.mubr.msk.f32.mxu0 %vm123_vm0, %v70_v56 }
  0x48   :  { %6904 = vmatmul.mubr.msk.f32.gmra.mrb[26].mxu0 %vm123_vm0, %v71_v57 }
  0x49   :  { %6906 = vmatprep.mubr.msk.f32.mxu0 %vm123_vm0, %v72_v58 }
  0x4c   :  { %6907 = vmatmul.mubr.msk.f32.gmra.mrb[28].mxu0 %vm123_vm0, %v73_v59 }
  0x4d   :  { %6909 = vmatprep.mubr.msk.f32.mxu0 %vm123_vm0, %v74_v60 }
  0x50   :  { %6910 = vmatmul.mubr.msk.f32.gmra.mrb[30].mxu0 %vm123_vm0, %v75_v61 }
  0x51   :  { %6912 = vmatprep.mubr.msk.f32.mxu0 %vm123_vm0, %v76_v62 }
  0x54   :  { %6913 = vmatmul.mubr.msk.f32.gmra.mrb[32].mxu0 %vm123_vm0, %v77_v63 }
  0x55   :  { %6915 = vmatprep.mubr.msk.f32.mxu0 %vm123_vm0, %v78_v0 }
  0x58   :  { %6916 = vmatmul.mubr.msk.f32.gmra.mrb[34].mxu0 %vm123_vm0, %v79_v1 }
  0x59   :  { %6918 = vmatprep.mubr.msk.f32.mxu0 %vm123_vm0, %v80_v2 }
  0x5c   :  { %6919 = vmatmul.mubr.msk.f32.gmra.mrb[36].mxu0 %vm123_vm0, %v81_v3 }
  0x5d   :  { %6921 = vmatprep.mubr.msk.f32.mxu0 %vm123_vm0, %v82_v4 }
  0x60   :  { %6922 = vmatmul.mubr.msk.f32.gmra.mrb[38].mxu0 %vm123_vm0, %v83_v5 }
  0x61   :  { %6924 = vmatprep.mubr.msk.f32.mxu0 %vm123_vm0, %v84_v6 }
  0x64   :  { %6925 = vmatmul.mubr.msk.f32.gmra.mrb[40].mxu0 %vm123_vm0, %v85_v7 }
  0x65   :  { %6927 = vmatprep.mubr.msk.f32.mxu0 %vm123_vm0, %v86_v8 }
  0x68   :  { %6928 = vmatmul.mubr.msk.f32.gmra.mrb[42].mxu0 %vm123_vm0, %v87_v9 }
  0x69   :  { %6930 = vmatprep.mubr.msk.f32.mxu0 %vm123_vm0, %v88_v10 }
  0x6c   :  { %6931 = vmatmul.mubr.msk.f32.gmra.mrb[44].mxu0 %vm123_vm0, %v89_v11 }
  0x6d   :  { %6933 = vmatprep.mubr.msk.f32.mxu0 %vm123_vm0, %v90_v12 }
  0x70   :  { %6934 = vmatmul.mubr.msk.f32.gmra.mrb[46].mxu0 %vm123_vm0, %v91_v13 }
  0x71   :  { %6936 = vmatprep.mubr.msk.f32.mxu0 %vm123_vm0, %v92_v14 }
  0x74   :  { %6937 = vmatmul.mubr.msk.f32.gmra.mrb[48].mxu0 %vm123_vm0, %v93_v15 }
  0x75   :  { %6939 = vmatprep.mubr.msk.f32.mxu0 %vm123_vm0, %v94_v16 }
  0x78   :  { %6940 = vmatmul.mubr.msk.f32.gmra.mrb[50].mxu0 %vm123_vm0, %v95_v17 }
  0x79   :  { %6942 = vmatprep.mubr.msk.f32.mxu0 %vm123_vm0, %v96_v18 }
  0x7c   :  { %6943 = vmatmul.mubr.msk.f32.gmra.mrb[52].mxu0 %vm123_vm0, %v97_v19 }
  0x7d   :  { %6945 = vmatprep.mubr.msk.f32.mxu0 %vm123_vm0, %v98_v20 }
  0x80   :  { %6946 = vmatmul.mubr.msk.f32.gmra.mrb[54].mxu0 %vm123_vm0, %v99_v21 }
  0x81   :  { %6948 = vmatprep.mubr.msk.f32.mxu0 %vm123_vm0, %v100_v24 }
  0x84   :  { %6949 = vmatmul.mubr.msk.f32.gmra.mrb[56].mxu0 %vm123_vm0, %v101_v26 }
  0x85   :  { %6951 = vmatprep.mubr.msk.f32.mxu0 %vm123_vm0, %v102_v27 }
  0x88   :  { %6952 = vmatmul.mubr.msk.f32.gmra.mrb[58].mxu0 %vm123_vm0, %v103_v31 }
  0x89   :  { %6954 = vmatprep.mubr.msk.f32.mxu0 %vm123_vm0, %v104_v32 }
  0x8c   :  { %6955 = vmatmul.mubr.msk.f32.gmra.mrb[60].mxu0 %vm123_vm0, %v105_v33 }
  0x8d   :  { %6957 = vmatprep.mubr.msk.f32.mxu0 %vm123_vm0, %v106_v34 }
  0x90   :  { %6958 = vmatmul.mubr.msk.f32.gmra.mrb[62].mxu0 %vm123_vm0, %v107_v35 }
  0xe7   :  { %v6866_v37 = vpop.f32.mrb[0].mxu0 }
  0xe8   :  { %v9305_v38 = vadd.f32 %v6866_v37, %v9302_v36  ;;  %v382_v39 = vpop.f32.mrb[1].mxu0 }
  0xe9   :  { %v9308_v40 = vadd.f32 %v9302_v36, %v382_v39 }
  0xea   :  { %v5840_v41 = vmul.f32 -1.442695, %v9305_v38 }
  0xeb   :  { %v5839_v42 = vmul.f32 -1.442695, %v9308_v40  ;;  %v6869_v43 = vpop.f32.mrb[2].mxu0 }
  0xec   :  { %7616 = vpow2.f32 %v5840_v41  ;;  %v9313_v44 = vadd.f32 %v6869_v43, %v9302_v36  ;;  %v392_v45 = vpop.f32.mrb[3].mxu0 }
  0xed   :  { %7618 = vpow2.f32 %v5839_v42  ;;  %v9316_v46 = vadd.f32 %v9302_v36, %v392_v45 }
  0xee   :  { %v5842_v47 = vmul.f32 -1.442695, %v9313_v44 }
  0xef   :  { %v5841_v48 = vmul.f32 -1.442695, %v9316_v46  ;;  %v6872_v49 = vpop.f32.mrb[4].mxu0 }
  0xf0   :  { %7620 = vpow2.f32 %v5842_v47  ;;  %v9321_v50 = vadd.f32 %v6872_v49, %v9302_v36  ;;  %v402_v51 = vpop.f32.mrb[5].mxu0 }
  0xf1   :  { %7622 = vpow2.f32 %v5841_v48  ;;  %v9324_v52 = vadd.f32 %v9302_v36, %v402_v51 }
  0xf2   :  { %v5844_v53 = vmul.f32 -1.442695, %v9321_v50 }
  0xf3   :  { %v5843_v54 = vmul.f32 -1.442695, %v9324_v52  ;;  %v6875_v55 = vpop.f32.mrb[6].mxu0 }
  0xf4   :  { %7624 = vpow2.f32 %v5844_v53  ;;  %v9329_v56 = vadd.f32 %v6875_v55, %v9302_v36  ;;  %v412_v57 = vpop.f32.mrb[7].mxu0 }
  0xf5   :  { %7626 = vpow2.f32 %v5843_v54  ;;  %v9332_v58 = vadd.f32 %v9302_v36, %v412_v57 }
  0xf6   :  { %v7617_v59 = vpop.eup %7616  ;;  %v5846_v60 = vmul.f32 -1.442695, %v9329_v56 }
  0xf7   :  { %v7619_v61 = vpop.eup %7618  ;;  %v894_v62 = vadd.f32 1.0, %v7617_v59  ;;  %v5845_v63 = vmul.f32 -1.442695, %v9332_v58  ;;  %v6878_v0 = vpop.f32.mrb[8].mxu0 }
  0xf8   :  { %v893_v1 = vadd.f32 1.0, %v7619_v61  ;;  %7628 = vpow2.f32 %v5846_v60  ;;  %v9337_v2 = vadd.f32 %v6878_v0, %v9302_v36  ;;  %v422_v3 = vpop.f32.mrb[9].mxu0 }
  0xf9   :  { %7630 = vrcp.f32 %v894_v62  ;;  %v9340_v4 = vadd.f32 %v9302_v36, %v422_v3 }
  0xfa   :  { %v7621_v5 = vpop.eup %7620  ;;  %7632 = vrcp.f32 %v893_v1  ;;  %v5848_v6 = vmul.f32 -1.442695, %v9337_v2 }
  0xfb   :  { %v7623_v7 = vpop.eup %7622  ;;  %v896_v8 = vadd.f32 1.0, %v7621_v5  ;;  %7634 = vpow2.f32 %v5845_v63  ;;  %v5847_v9 = vmul.f32 -1.442695, %v9340_v4  ;;  %v6881_v10 = vpop.f32.mrb[10].mxu0 }
  0xfc   :  { %v895_v11 = vadd.f32 1.0, %v7623_v7  ;;  %7636 = vpow2.f32 %v5848_v6  ;;  %v9345_v12 = vadd.f32 %v6881_v10, %v9302_v36  ;;  %v432_v13 = vpop.f32.mrb[11].mxu0 }
  0xfd   :  { %7638 = vrcp.f32 %v896_v8  ;;  %v9348_v14 = vadd.f32 %v9302_v36, %v432_v13 }
  0xfe   :  { %v7625_v15 = vpop.eup %7624  ;;  %7640 = vrcp.f32 %v895_v11  ;;  %v5850_v16 = vmul.f32 -1.442695, %v9345_v12 }
  0xff   :  { %v7627_v17 = vpop.eup %7626  ;;  %v898_v18 = vadd.f32 1.0, %v7625_v15  ;;  %7642 = vpow2.f32 %v5847_v9  ;;  %v5849_v19 = vmul.f32 -1.442695, %v9348_v14  ;;  %v6884_v20 = vpop.f32.mrb[12].mxu0 }
 0x100   :  { %v897_v21 = vadd.f32 1.0, %v7627_v17  ;;  %7644 = vpow2.f32 %v5850_v16  ;;  %v9353_v22 = vadd.f32 %v6884_v20, %v9302_v36  ;;  %v442_v23 = vpop.f32.mrb[13].mxu0 }
 0x101   :  { %7646 = vrcp.f32 %v898_v18  ;;  %v9356_v24 = vadd.f32 %v9302_v36, %v442_v23 }
 0x102   :  { %v7629_v25 = vpop.eup %7628  ;;  %7648 = vrcp.f32 %v897_v21  ;;  %v5852_v26 = vmul.f32 -1.442695, %v9353_v22 }
 0x103   :  { %v7631_v27 = vpop.eup %7630  ;;  %v900_v28 = vadd.f32 1.0, %v7629_v25  ;;  %7650 = vpow2.f32 %v5849_v19  ;;  %v5851_v29 = vmul.f32 -1.442695, %v9356_v24  ;;  %v6887_v30 = vpop.f32.mrb[14].mxu0 }
 0x104   :  { %v7633_v31 = vpop.eup %7632  ;;  %7652 = vpow2.f32 %v5852_v26  ;;  %v9361_v32 = vadd.f32 %v6887_v30, %v9302_v36  ;;  %v452_v33 = vpop.f32.mrb[15].mxu0  ;;  %v1086_v41 = vmul.f32 %v7631_v27, %v9305_v38 }
 0x105   :  { %v7635_v34 = vpop.eup %7634  ;;  %v1085_v35 = vmul.f32 %v7633_v31, %v9308_v40  ;;  %v9365_v37 = vadd.f32 %v9302_v36, %v452_v33  ;;  %7654 = vpow2.f32 %v5851_v29 }
 0x106   :  { %v7637_v39 = vpop.eup %7636  ;;  %v899_v42 = vadd.f32 1.0, %v7635_v34  ;;  %v5854_v43 = vmul.f32 -1.442695, %v9361_v32  ;;  %7656 = vrcp.f32 %v900_v28 }
 0x107   :  { %v7639_v45 = vpop.eup %7638  ;;  %v902_v47 = vadd.f32 1.0, %v7637_v39  ;;  %v5853_v48 = vmul.f32 -1.442695, %v9365_v37  ;;  %v6890_v49 = vpop.f32.mrb[16].mxu0  ;;  %6992 = vmatprep.mubr.f32.mxu0 %v1085_v35 }
 0x108   :  { %v7641_v51 = vpop.eup %7640  ;;  %7658 = vrcp.f32 %v899_v42  ;;  %v9371_v40 = vadd.f32 %v6890_v49, %v9302_v36  ;;  %v462_v53 = vpop.f32.mrb[17].mxu0  ;;  %6993 = vmatmul.mubr.f32.vlgmr.msra.gmra.mrb[64].mxu0 %v1086_v41  ;;  %v1088_v59 = vmul.f32 %v7639_v45, %v9313_v44 }
 0x109   :  { %v7643_v54 = vpop.eup %7642  ;;  %v1087_v38 = vmul.f32 %v7641_v51, %v9316_v46  ;;  %7660 = vrcp.f32 %v902_v47  ;;  %v9375_v55 = vadd.f32 %v9302_v36, %v462_v53 }
 0x10a   :  { %v7645_v57 = vpop.eup %7644  ;;  %v901_v60 = vadd.f32 1.0, %v7643_v54  ;;  %7662 = vpow2.f32 %v5854_v43  ;;  %v5856_v61 = vmul.f32 -1.442695, %v9371_v40 }
 0x10b   :  { %v7647_v62 = vpop.eup %7646  ;;  %v904_v63 = vadd.f32 1.0, %v7645_v57  ;;  %7664 = vpow2.f32 %v5853_v48  ;;  %v5855_v0 = vmul.f32 -1.442695, %v9375_v55  ;;  %v6893_v1 = vpop.f32.mrb[18].mxu0  ;;  %6995 = vmatprep.mubr.f32.mxu0 %v1087_v38 }
 0x10c   :  { %v7649_v3 = vpop.eup %7648  ;;  %7666 = vrcp.f32 %v901_v60  ;;  %v9381_v46 = vadd.f32 %v6893_v1, %v9302_v36  ;;  %v472_v5 = vpop.f32.mrb[19].mxu0  ;;  %6996 = vmatmul.mubr.f32.gmra.mrb[66].mxu0 %v1088_v59  ;;  %v1090_v9 = vmul.f32 %v7647_v62, %v9321_v50 }
 0x10d   :  { %v7651_v6 = vpop.eup %7650  ;;  %7668 = vrcp.f32 %v904_v63  ;;  %v9384_v44 = vadd.f32 %v9302_v36, %v472_v5  ;;  %v1089_v7 = vmul.f32 %v7649_v3, %v9324_v52 }
 0x10e   :  { %v7653_v8 = vpop.eup %7652  ;;  %v903_v10 = vadd.f32 1.0, %v7651_v6  ;;  %7670 = vpow2.f32 %v5856_v61  ;;  %v5858_v11 = vmul.f32 -1.442695, %v9381_v46 }
 0x10f   :  { %v906_v13 = vadd.f32 1.0, %v7653_v8  ;;  %7672 = vpow2.f32 %v5855_v0  ;;  %v6896_v15 = vpop.f32.mrb[20].mxu0  ;;  %6998 = vmatprep.mubr.f32.mxu1 %v1089_v7  ;;  %v7655_v16 = vpop.eup %7654  ;;  %v5857_v17 = vmul.f32 -1.442695, %v9384_v44 }
 0x110   :  { %7674 = vrcp.f32 %v903_v10  ;;  %v9391_v18 = vadd.f32 %v6896_v15, %v9302_v36  ;;  %v482_v19 = vpop.f32.mrb[21].mxu0  ;;  %6999 = vmatmul.mubr.f32.vlgmr.msra.gmra.mrb[0].mxu1 %v1090_v9  ;;  %v7657_v52 = vpop.eup %7656  ;;  %v905_v50 = vadd.f32 1.0, %v7655_v16 }
 0x111   :  { %7676 = vrcp.f32 %v906_v13  ;;  %v9394_v20 = vadd.f32 %v9302_v36, %v482_v19  ;;  %v1092_v30 = vmul.f32 %v7657_v52, %v9329_v56 }
 0x112   :  { %v7659_v21 = vpop.eup %7658  ;;  %7678 = vpow2.f32 %v5858_v11  ;;  %v5860_v23 = vmul.f32 -1.442695, %v9391_v18 }
 0x113   :  { %v7661_v25 = vpop.eup %7660  ;;  %v1091_v26 = vmul.f32 %v7659_v21, %v9332_v58  ;;  %7680 = vrcp.f32 %v905_v50  ;;  %v5859_v27 = vmul.f32 -1.442695, %v9394_v20  ;;  %v6899_v28 = vpop.f32.mrb[22].mxu0 }
 0x114   :  { %v7663_v29 = vpop.eup %7662  ;;  %7682 = vpow2.f32 %v5857_v17  ;;  %v9401_v31 = vadd.f32 %v6899_v28, %v9302_v36  ;;  %v492_v33 = vpop.f32.mrb[23].mxu0  ;;  %v1094_v49 = vmul.f32 %v7661_v25, %v9337_v2 }
 0x115   :  { %v7665_v34 = vpop.eup %7664  ;;  %v908_v35 = vadd.f32 1.0, %v7663_v29  ;;  %7684 = vpow2.f32 %v5860_v23  ;;  %7001 = vmatprep.mubr.f32.mxu1 %v1091_v26  ;;  %v9404_v39 = vadd.f32 %v9302_v36, %v492_v33 }
 0x116   :  { %v7667_v58 = vpop.eup %7666  ;;  %v907_v41 = vadd.f32 1.0, %v7665_v34  ;;  %7686 = vpow2.f32 %v5859_v27  ;;  %v5862_v42 = vmul.f32 -1.442695, %v9401_v31  ;;  %7002 = vmatmul.mubr.f32.gmra.mrb[2].mxu1 %v1092_v30 }
 0x117   :  { %v7669_v43 = vpop.eup %7668  ;;  %v1093_v56 = vmul.f32 %v7667_v58, %v9340_v4  ;;  %7688 = vrcp.f32 %v908_v35  ;;  %v5861_v45 = vmul.f32 -1.442695, %v9404_v39  ;;  %v6902_v47 = vpop.f32.mrb[24].mxu0 }
 0x118   :  { %v7671_v48 = vpop.eup %7670  ;;  %7690 = vrcp.f32 %v907_v41  ;;  %v9411_v51 = vadd.f32 %v6902_v47, %v9302_v36  ;;  %v502_v53 = vpop.f32.mrb[25].mxu0  ;;  %v1096_v1 = vmul.f32 %v7669_v43, %v9345_v12 }
 0x119   :  { %v7673_v54 = vpop.eup %7672  ;;  %v910_v38 = vadd.f32 1.0, %v7671_v48  ;;  %7692 = vpow2.f32 %v5862_v42  ;;  %7004 = vmatprep.mubr.f32.mxu1 %v1093_v56  ;;  %v9414_v57 = vadd.f32 %v9302_v36, %v502_v53 }
 0x11a   :  { %v7675_v4 = vpop.eup %7674  ;;  %v909_v59 = vadd.f32 1.0, %v7673_v54  ;;  %7694 = vpow2.f32 %v5861_v45  ;;  %v5864_v60 = vmul.f32 -1.442695, %v9411_v51  ;;  %7005 = vmatmul.mubr.f32.gmra.mrb[4].mxu1 %v1094_v49 }
 0x11b   :  { %v7677_v61 = vpop.eup %7676  ;;  %v1095_v2 = vmul.f32 %v7675_v4, %v9348_v14  ;;  %7696 = vrcp.f32 %v910_v38  ;;  %v5863_v62 = vmul.f32 -1.442695, %v9414_v57  ;;  %v6905_v63 = vpop.f32.mrb[26].mxu0 }
 0x11c   :  { %v7679_v0 = vpop.eup %7678  ;;  %7698 = vrcp.f32 %v909_v59  ;;  %v9421_v3 = vadd.f32 %v6905_v63, %v9302_v36  ;;  %v512_v5 = vpop.f32.mrb[27].mxu0  ;;  %v1098_v11 = vmul.f32 %v7677_v61, %v9353_v22 }
 0x11d   :  { %v7681_v6 = vpop.eup %7680  ;;  %v912_v7 = vadd.f32 1.0, %v7679_v0  ;;  %7700 = vpow2.f32 %v5864_v60  ;;  %7007 = vmatprep.mubr.f32.mxu1 %v1095_v2  ;;  %v9424_v8 = vadd.f32 %v9302_v36, %v512_v5 }
 0x11e   :  { %v7683_v14 = vpop.eup %7682  ;;  %v1097_v9 = vmul.f32 %v7681_v6, %v9356_v24  ;;  %7702 = vpow2.f32 %v5863_v62  ;;  %v5866_v10 = vmul.f32 -1.442695, %v9421_v3  ;;  %7008 = vmatmul.mubr.f32.gmra.mrb[6].mxu1 %v1096_v1 }
 0x11f   :  { %v7685_v12 = vpop.eup %7684  ;;  %7704 = vrcp.f32 %v912_v7  ;;  %v911_v13 = vadd.f32 1.0, %v7683_v14  ;;  %v6908_v15 = vpop.f32.mrb[28].mxu0  ;;  %v5865_v19 = vmul.f32 -1.442695, %v9424_v8 }
 0x120   :  { %v7687_v16 = vpop.eup %7686  ;;  %v914_v17 = vadd.f32 1.0, %v7685_v12  ;;  %7706 = vpow2.f32 %v5866_v10  ;;  %v9431_v52 = vadd.f32 %v6908_v15, %v9302_v36  ;;  %7010 = vmatprep.mubr.f32.mxu1 %v1097_v9  ;;  %v522_v24 = vpop.f32.mrb[29].mxu0 }
 0x121   :  { %v7689_v50 = vpop.eup %7688  ;;  %7708 = vrcp.f32 %v911_v13  ;;  %v913_v21 = vadd.f32 1.0, %v7687_v16  ;;  %v9434_v23 = vadd.f32 %v9302_v36, %v522_v24 }
 0x122   :  { %v7691_v22 = vpop.eup %7690  ;;  %7710 = vrcp.f32 %v914_v17  ;;  %v5868_v25 = vmul.f32 -1.442695, %v9431_v52  ;;  %7011 = vmatmul.mubr.f32.gmra.mrb[8].mxu1 %v1098_v11  ;;  %v1100_v27 = vmul.f32 %v7689_v50, %v9361_v32 }
 0x123   :  { %v7693_v26 = vpop.eup %7692  ;;  %v1099_v28 = vmul.f32 %v7691_v22, %v9365_v37  ;;  %7712 = vrcp.f32 %v913_v21  ;;  %v6911_v29 = vpop.f32.mrb[30].mxu0  ;;  %v5867_v34 = vmul.f32 -1.442695, %v9434_v23 }
 0x124   :  { %v7695_v30 = vpop.eup %7694  ;;  %v916_v33 = vadd.f32 1.0, %v7693_v26  ;;  %7714 = vpow2.f32 %v5865_v19  ;;  %v9441_v35 = vadd.f32 %v6911_v29, %v9302_v36  ;;  %v532_v58 = vpop.f32.mrb[31].mxu0 }
 0x125   :  { %v7697_v41 = vpop.eup %7696  ;;  %v915_v42 = vadd.f32 1.0, %v7695_v30  ;;  %7716 = vpow2.f32 %v5868_v25  ;;  %7013 = vmatprep.mubr.f32.mxu1 %v1099_v28  ;;  %v9444_v43 = vadd.f32 %v9302_v36, %v532_v58 }
 0x126   :  { %v7699_v32 = vpop.eup %7698  ;;  %7718 = vrcp.f32 %v916_v33  ;;  %v5870_v37 = vmul.f32 -1.442695, %v9441_v35  ;;  %7014 = vmatmul.mubr.f32.gmra.mrb[10].mxu1 %v1100_v27  ;;  %v1102_v45 = vmul.f32 %v7697_v41, %v9371_v40 }
 0x127   :  { %v7701_v56 = vpop.eup %7700  ;;  %v1101_v47 = vmul.f32 %v7699_v32, %v9375_v55  ;;  %7720 = vrcp.f32 %v915_v42  ;;  %v6914_v48 = vpop.f32.mrb[32].mxu0  ;;  %v5869_v54 = vmul.f32 -1.442695, %v9444_v43 }
 0x128   :  { %v7703_v49 = vpop.eup %7702  ;;  %v918_v53 = vadd.f32 1.0, %v7701_v56  ;;  %7722 = vpow2.f32 %v5867_v34  ;;  %v9451_v38 = vadd.f32 %v6914_v48, %v9302_v36  ;;  %v542_v4 = vpop.f32.mrb[33].mxu0 }
 0x129   :  { %v7705_v59 = vpop.eup %7704  ;;  %v917_v60 = vadd.f32 1.0, %v7703_v49  ;;  %7724 = vpow2.f32 %v5870_v37  ;;  %7016 = vmatprep.mubr.f32.mxu1 %v1101_v47  ;;  %v9454_v61 = vadd.f32 %v9302_v36, %v542_v4 }
 0x12a   :  { %v7707_v40 = vpop.eup %7706  ;;  %7726 = vrcp.f32 %v918_v53  ;;  %v5872_v55 = vmul.f32 -1.442695, %v9451_v38  ;;  %7017 = vmatmul.mubr.f32.gmra.mrb[12].mxu1 %v1102_v45  ;;  %v1104_v9 = vmul.f32 %v7705_v59, %v9381_v46 }
 0x12b   :  { %v7709_v2 = vpop.eup %7708  ;;  %7728 = vrcp.f32 %v917_v60  ;;  %v920_v62 = vadd.f32 1.0, %v7707_v40  ;;  %v5871_v63 = vmul.f32 -1.442695, %v9454_v61  ;;  %v6917_v0 = vpop.f32.mrb[34].mxu0 }
 0x12c   :  { %v7711_v1 = vpop.eup %7710  ;;  %v1103_v5 = vmul.f32 %v7709_v2, %v9384_v44  ;;  %7730 = vpow2.f32 %v5869_v54  ;;  %v9460_v6 = vadd.f32 %v6917_v0, %v9302_v36  ;;  %v552_v7 = vpop.f32.mrb[35].mxu0 }
 0x12d   :  { %v7713_v14 = vpop.eup %7712  ;;  %7732 = vrcp.f32 %v920_v62  ;;  %v9464_v10 = vadd.f32 %v9302_v36, %v552_v7  ;;  %v1106_v21 = vmul.f32 %v7711_v1, %v9391_v18 }
 0x12e   :  { %v7715_v12 = vpop.eup %7714  ;;  %v1105_v11 = vmul.f32 %v7713_v14, %v9394_v20  ;;  %7734 = vpow2.f32 %v5872_v55  ;;  %v5874_v13 = vmul.f32 -1.442695, %v9460_v6  ;;  %7019 = vmatprep.mubr.f32.mxu1 %v1103_v5 }
 0x12f   :  { %v7717_v44 = vpop.eup %7716  ;;  %v919_v15 = vadd.f32 1.0, %v7715_v12  ;;  %7736 = vpow2.f32 %v5871_v63  ;;  %v5873_v16 = vmul.f32 -1.442695, %v9464_v10  ;;  %7020 = vmatmul.mubr.f32.gmra.mrb[14].mxu1 %v1104_v9  ;;  %v6920_v17 = vpop.f32.mrb[36].mxu0 }
 0x130   :  { %v7719_v19 = vpop.eup %7718  ;;  %v922_v46 = vadd.f32 1.0, %v7717_v44  ;;  %7738 = vpow2.f32 %v5874_v13  ;;  %v9470_v24 = vadd.f32 %v6920_v17, %v9302_v36  ;;  %7022 = vmatprep.mubr.f32.mxu1 %v1105_v11  ;;  %v562_v50 = vpop.f32.mrb[37].mxu0 }
 0x131   :  { %v7721_v20 = vpop.eup %7720  ;;  %7740 = vrcp.f32 %v919_v15  ;;  %v9474_v22 = vadd.f32 %v9302_v36, %v562_v50 }
 0x132   :  { %v7723_v25 = vpop.eup %7722  ;;  %v1107_v26 = vmul.f32 %v7721_v20, %v9404_v39  ;;  %7742 = vrcp.f32 %v922_v46  ;;  %v5876_v27 = vmul.f32 -1.442695, %v9470_v24  ;;  %v1108_v39 = vmul.f32 %v7719_v19, %v9401_v31 }
 0x133   :  { %v7725_v28 = vpop.eup %7724  ;;  %v921_v29 = vadd.f32 1.0, %v7723_v25  ;;  %7744 = vpow2.f32 %v5873_v16  ;;  %v5875_v30 = vmul.f32 -1.442695, %v9474_v22  ;;  %7023 = vmatmul.mubr.f32.gmra.mrb[16].mxu1 %v1106_v21  ;;  %v6923_v33 = vpop.f32.mrb[38].mxu0 }
 0x134   :  { %v7727_v34 = vpop.eup %7726  ;;  %v924_v58 = vadd.f32 1.0, %v7725_v28  ;;  %7746 = vpow2.f32 %v5876_v27  ;;  %v9480_v18 = vadd.f32 %v6923_v33, %v9302_v36  ;;  %7025 = vmatprep.mubr.f32.mxu1 %v1107_v26  ;;  %v572_v41 = vpop.f32.mrb[39].mxu0 }
 0x135   :  { %v7729_v42 = vpop.eup %7728  ;;  %7748 = vrcp.f32 %v921_v29  ;;  %v9484_v32 = vadd.f32 %v9302_v36, %v572_v41 }
 0x136   :  { %v7731_v37 = vpop.eup %7730  ;;  %v1109_v56 = vmul.f32 %v7729_v42, %v9414_v57  ;;  %7750 = vrcp.f32 %v924_v58  ;;  %v5878_v45 = vmul.f32 -1.442695, %v9480_v18  ;;  %v1110_v57 = vmul.f32 %v7727_v34, %v9411_v51 }
 0x137   :  { %v7733_v47 = vpop.eup %7732  ;;  %v923_v48 = vadd.f32 1.0, %v7731_v37  ;;  %7752 = vpow2.f32 %v5875_v30  ;;  %v5877_v49 = vmul.f32 -1.442695, %v9484_v32  ;;  %7026 = vmatmul.mubr.f32.gmra.mrb[18].mxu1 %v1108_v39  ;;  %v6926_v53 = vpop.f32.mrb[40].mxu0 }
 0x138   :  { %v7735_v54 = vpop.eup %7734  ;;  %7754 = vpow2.f32 %v5878_v45  ;;  %v9490_v31 = vadd.f32 %v6926_v53, %v9302_v36  ;;  %7028 = vmatprep.mubr.f32.mxu1 %v1109_v56  ;;  %v582_v4 = vpop.f32.mrb[41].mxu0  ;;  %v1112_v11 = vmul.f32 %v7733_v47, %v9421_v3 }
 0x139   :  { %v7737_v59 = vpop.eup %7736  ;;  %7756 = vrcp.f32 %v923_v48  ;;  %v926_v60 = vadd.f32 1.0, %v7735_v54  ;;  %v9494_v40 = vadd.f32 %v9302_v36, %v582_v4 }
 0x13a   :  { %v7739_v55 = vpop.eup %7738  ;;  %v925_v2 = vadd.f32 1.0, %v7737_v59  ;;  %7758 = vpow2.f32 %v5877_v49  ;;  %v5880_v62 = vmul.f32 -1.442695, %v9490_v31 }
 0x13b   :  { %v7741_v63 = vpop.eup %7740  ;;  %7760 = vrcp.f32 %v926_v60  ;;  %v928_v0 = vadd.f32 1.0, %v7739_v55  ;;  %v5879_v1 = vmul.f32 -1.442695, %v9494_v40  ;;  %7029 = vmatmul.mubr.f32.gmra.mrb[20].mxu1 %v1110_v57  ;;  %v6929_v5 = vpop.f32.mrb[42].mxu0 }
 0x13c   :  { %v7743_v7 = vpop.eup %7742  ;;  %v1111_v51 = vmul.f32 %v7741_v63, %v9424_v8  ;;  %7762 = vrcp.f32 %v925_v2  ;;  %v9500_v14 = vadd.f32 %v6929_v5, %v9302_v36  ;;  %v592_v9 = vpop.f32.mrb[43].mxu0 }
 0x13d   :  { %v7745_v12 = vpop.eup %7744  ;;  %7764 = vrcp.f32 %v928_v0  ;;  %v9504_v13 = vadd.f32 %v9302_v36, %v592_v9  ;;  %v1114_v26 = vmul.f32 %v7743_v7, %v9431_v52 }
 0x13e   :  { %v7747_v44 = vpop.eup %7746  ;;  %v927_v15 = vadd.f32 1.0, %v7745_v12  ;;  %7766 = vpow2.f32 %v5880_v62  ;;  %v5882_v16 = vmul.f32 -1.442695, %v9500_v14  ;;  %7031 = vmatprep.mubr.f32.mxu1 %v1111_v51 }
 0x13f   :  { %v7749_v17 = vpop.eup %7748  ;;  %v930_v8 = vadd.f32 1.0, %v7747_v44  ;;  %7768 = vpow2.f32 %v5879_v1  ;;  %v5881_v19 = vmul.f32 -1.442695, %v9504_v13  ;;  %7032 = vmatmul.mubr.f32.gmra.mrb[22].mxu1 %v1112_v11  ;;  %v6932_v46 = vpop.f32.mrb[44].mxu0 }
 0x140   :  { %v7751_v50 = vpop.eup %7750  ;;  %v1113_v3 = vmul.f32 %v7749_v17, %v9434_v23  ;;  %7770 = vrcp.f32 %v927_v15  ;;  %v9510_v20 = vadd.f32 %v6932_v46, %v9302_v36  ;;  %v602_v21 = vpop.f32.mrb[45].mxu0 }
 0x141   :  { %v7753_v25 = vpop.eup %7752  ;;  %7772 = vrcp.f32 %v930_v8  ;;  %v9514_v27 = vadd.f32 %v9302_v36, %v602_v21  ;;  %v1116_v56 = vmul.f32 %v7751_v50, %v9441_v35 }
 0x142   :  { %v7755_v28 = vpop.eup %7754  ;;  %v929_v29 = vadd.f32 1.0, %v7753_v25  ;;  %7774 = vpow2.f32 %v5882_v16  ;;  %v5884_v30 = vmul.f32 -1.442695, %v9510_v20  ;;  %7034 = vmatprep.mubr.f32.mxu1 %v1113_v3 }
 0x143   :  { %v7757_v33 = vpop.eup %7756  ;;  %v932_v23 = vadd.f32 1.0, %v7755_v28  ;;  %7776 = vpow2.f32 %v5881_v19  ;;  %7035 = vmatmul.mubr.f32.gmra.mrb[24].mxu1 %v1114_v26  ;;  %v6935_v34 = vpop.f32.mrb[46].mxu0  ;;  %v5883_v52 = vmul.f32 -1.442695, %v9514_v27 }
 0x144   :  { %v7759_v58 = vpop.eup %7758  ;;  %v1115_v41 = vmul.f32 %v7757_v33, %v9444_v43  ;;  %7778 = vrcp.f32 %v929_v29  ;;  %v9520_v42 = vadd.f32 %v6935_v34, %v9302_v36  ;;  %v612_v39 = vpop.f32.mrb[47].mxu0 }
 0x145   :  { %v7761_v37 = vpop.eup %7760  ;;  %7780 = vrcp.f32 %v932_v23  ;;  %v931_v45 = vadd.f32 1.0, %v7759_v58  ;;  %v9524_v47 = vadd.f32 %v9302_v36, %v612_v39 }
 0x146   :  { %v7763_v48 = vpop.eup %7762  ;;  %7782 = vpow2.f32 %v5884_v30  ;;  %v5886_v49 = vmul.f32 -1.442695, %v9520_v42  ;;  %7037 = vmatprep.mubr.f32.mxu1 %v1115_v41  ;;  %v1118_v55 = vmul.f32 %v7761_v37, %v9451_v38 }
 0x147   :  { %v7765_v43 = vpop.eup %7764  ;;  %v1117_v53 = vmul.f32 %v7763_v48, %v9454_v61  ;;  %7784 = vrcp.f32 %v931_v45  ;;  %v5885_v54 = vmul.f32 -1.442695, %v9524_v47  ;;  %7038 = vmatmul.mubr.f32.gmra.mrb[26].mxu1 %v1116_v56  ;;  %v6938_v4 = vpop.f32.mrb[48].mxu0 }
 0x148   :  { %v7767_v59 = vpop.eup %7766  ;;  %7786 = vpow2.f32 %v5883_v52  ;;  %v9530_v35 = vadd.f32 %v6938_v4, %v9302_v36  ;;  %v622_v57 = vpop.f32.mrb[49].mxu0  ;;  %v1120_v44 = vmul.f32 %v7765_v43, %v9460_v6 }
 0x149   :  { %v7769_v60 = vpop.eup %7768  ;;  %v934_v2 = vadd.f32 1.0, %v7767_v59  ;;  %7788 = vpow2.f32 %v5886_v49  ;;  %7040 = vmatprep.mubr.f32.mxu1 %v1117_v53  ;;  %v9534_v62 = vadd.f32 %v9302_v36, %v622_v57 }
 0x14a   :  { %v7771_v61 = vpop.eup %7770  ;;  %v933_v63 = vadd.f32 1.0, %v7769_v60  ;;  %7790 = vpow2.f32 %v5885_v54  ;;  %v5888_v0 = vmul.f32 -1.442695, %v9530_v35 }
 0x14b   :  { %v7773_v1 = vpop.eup %7772  ;;  %v1119_v5 = vmul.f32 %v7771_v61, %v9464_v10  ;;  %7792 = vrcp.f32 %v934_v2  ;;  %v5887_v7 = vmul.f32 -1.442695, %v9534_v62  ;;  %7041 = vmatmul.mubr.f32.gmra.mrb[28].mxu1 %v1118_v55  ;;  %v6941_v51 = vpop.f32.mrb[50].mxu0 }
 0x14c   :  { %v7775_v38 = vpop.eup %7774  ;;  %7794 = vrcp.f32 %v933_v63  ;;  %v9540_v9 = vadd.f32 %v6941_v51, %v9302_v36  ;;  %v632_v12 = vpop.f32.mrb[51].mxu0  ;;  %v1122_v28 = vmul.f32 %v7773_v1, %v9470_v24 }
 0x14d   :  { %v7777_v11 = vpop.eup %7776  ;;  %v936_v15 = vadd.f32 1.0, %v7775_v38  ;;  %7796 = vpow2.f32 %v5888_v0  ;;  %7043 = vmatprep.mubr.f32.mxu1 %v1119_v5  ;;  %v9544_v16 = vadd.f32 %v9302_v36, %v632_v12 }
 0x14e   :  { %v7779_v10 = vpop.eup %7778  ;;  %v935_v17 = vadd.f32 1.0, %v7777_v11  ;;  %7798 = vpow2.f32 %v5887_v7  ;;  %v5890_v8 = vmul.f32 -1.442695, %v9540_v9 }
 0x14f   :  { %v7781_v19 = vpop.eup %7780  ;;  %v1121_v46 = vmul.f32 %v7779_v10, %v9474_v22  ;;  %7800 = vrcp.f32 %v936_v15  ;;  %v5889_v50 = vmul.f32 -1.442695, %v9544_v16  ;;  %7044 = vmatmul.mubr.f32.gmra.mrb[30].mxu1 %v1120_v44  ;;  %v6944_v3 = vpop.f32.mrb[52].mxu0 }
 0x150   :  { %v7783_v6 = vpop.eup %7782  ;;  %7802 = vrcp.f32 %v935_v17  ;;  %v9550_v21 = vadd.f32 %v6944_v3, %v9302_v36  ;;  %v642_v25 = vpop.f32.mrb[53].mxu0 }
 0x151   :  { %v7785_v26 = vpop.eup %7784  ;;  %v938_v29 = vadd.f32 1.0, %v7783_v6  ;;  %7804 = vpow2.f32 %v5890_v8  ;;  %7046 = vmatprep.mubr.f32.mxu1 %v1121_v46  ;;  %v9554_v30 = vadd.f32 %v9302_v36, %v642_v25 }
 0x152   :  { %v7787_v22 = vpop.eup %7786  ;;  %v1123_v33 = vmul.f32 %v7785_v26, %v9484_v32  ;;  %7806 = vpow2.f32 %v5889_v50  ;;  %v5892_v23 = vmul.f32 -1.442695, %v9550_v21  ;;  %v1124_v32 = vmul.f32 %v7781_v19, %v9480_v18 }
 0x153   :  { %v7789_v34 = vpop.eup %7788  ;;  %7808 = vrcp.f32 %v938_v29  ;;  %v937_v58 = vadd.f32 1.0, %v7787_v22  ;;  %7047 = vmatmul.mubr.f32.gmra.mrb[32].mxu1 %v1122_v28  ;;  %v6947_v41 = vpop.f32.mrb[54].mxu0  ;;  %v5891_v24 = vmul.f32 -1.442695, %v9554_v30 }
 0x154   :  { %v7791_v52 = vpop.eup %7790  ;;  %v940_v39 = vadd.f32 1.0, %v7789_v34  ;;  %7810 = vpow2.f32 %v5892_v23  ;;  %v9560_v37 = vadd.f32 %v6947_v41, %v9302_v36  ;;  %7049 = vmatprep.mubr.f32.mxu1 %v1123_v33  ;;  %v652_v56 = vpop.f32.mrb[55].mxu0 }
 0x155   :  { %v7793_v45 = vpop.eup %7792  ;;  %7812 = vrcp.f32 %v937_v58  ;;  %v939_v48 = vadd.f32 1.0, %v7791_v52  ;;  %v9564_v49 = vadd.f32 %v9302_v36, %v652_v56 }
 0x156   :  { %v7795_v43 = vpop.eup %7794  ;;  %7814 = vrcp.f32 %v940_v39  ;;  %v5894_v53 = vmul.f32 -1.442695, %v9560_v37  ;;  %v1126_v63 = vmul.f32 %v7793_v45, %v9490_v31 }
 0x157   :  { %v7797_v54 = vpop.eup %7796  ;;  %v1125_v4 = vmul.f32 %v7795_v43, %v9494_v40  ;;  %7816 = vrcp.f32 %v939_v48  ;;  %7050 = vmatmul.mubr.f32.gmra.mrb[34].mxu1 %v1124_v32  ;;  %v6950_v59 = vpop.f32.mrb[56].mxu0  ;;  %v5893_v18 = vmul.f32 -1.442695, %v9564_v49 }
 0x158   :  { %v7799_v57 = vpop.eup %7798  ;;  %v942_v60 = vadd.f32 1.0, %v7797_v54  ;;  %7818 = vpow2.f32 %v5891_v24  ;;  %v9570_v55 = vadd.f32 %v6950_v59, %v9302_v36  ;;  %v662_v2 = vpop.f32.mrb[57].mxu0 }
 0x159   :  { %v7801_v61 = vpop.eup %7800  ;;  %v941_v0 = vadd.f32 1.0, %v7799_v57  ;;  %7820 = vpow2.f32 %v5894_v53  ;;  %7052 = vmatprep.mubr.f32.mxu1 %v1125_v4  ;;  %v9574_v40 = vadd.f32 %v9302_v36, %v662_v2  ;;  %v8896_v36 = vld [vmem:[%s11560_s2] ss:$0 sm:$0xff] }
 0x15a   :  { %v7803_v1 = vpop.eup %7802  ;;  %7822 = vrcp.f32 %v942_v60  ;;  %v5896_v5 = vmul.f32 -1.442695, %v9570_v55  ;;  %v1128_v17 = vmul.f32 %v7801_v61, %v9500_v14 }
 0x15b   :  { %v7805_v7 = vpop.eup %7804  ;;  %v1127_v51 = vmul.f32 %v7803_v1, %v9504_v13  ;;  %7824 = vrcp.f32 %v941_v0  ;;  %7053 = vmatmul.mubr.f32.gmra.mrb[36].mxu1 %v1126_v63  ;;  %v6953_v38 = vpop.f32.mrb[58].mxu0  ;;  %v5895_v31 = vmul.f32 -1.442695, %v9574_v40 }
 0x15c   :  { %v7807_v12 = vpop.eup %7806  ;;  %v944_v11 = vadd.f32 1.0, %v7805_v7  ;;  %7826 = vpow2.f32 %v5893_v18  ;;  %v9582_v44 = vadd.f32 %v8896_v36, %v6953_v38  ;;  %v672_v15 = vpop.f32.mrb[59].mxu0 }
 0x15d   :  { %v7809_v10 = vpop.eup %7808  ;;  %v943_v8 = vadd.f32 1.0, %v7807_v12  ;;  %7828 = vpow2.f32 %v5896_v5  ;;  %7055 = vmatprep.mubr.f32.mxu1 %v1127_v51  ;;  %v9585_v13 = vadd.f32 %v8896_v36, %v672_v15 }
 0x15e   :  { %v7811_v19 = vpop.eup %7810  ;;  %7830 = vrcp.f32 %v944_v11  ;;  %v5898_v46 = vmul.f32 -1.442695, %v9582_v44  ;;  %v1130_v33 = vmul.f32 %v7809_v10, %v9510_v20 }
 0x15f   :  { %v7813_v50 = vpop.eup %7812  ;;  %7832 = vrcp.f32 %v943_v8  ;;  %v946_v3 = vadd.f32 1.0, %v7811_v19  ;;  %v5897_v6 = vmul.f32 -1.442695, %v9585_v13  ;;  %7056 = vmatmul.mubr.f32.gmra.mrb[38].mxu1 %v1128_v17  ;;  %v6956_v25 = vpop.f32.mrb[60].mxu0 }
 0x160   :  { %v7815_v26 = vpop.eup %7814  ;;  %v1129_v28 = vmul.f32 %v7813_v50, %v9514_v27  ;;  %7834 = vpow2.f32 %v5895_v31  ;;  %v9590_v14 = vadd.f32 %v8896_v36, %v6956_v25  ;;  %v682_v29 = vpop.f32.mrb[61].mxu0  ;;  %v2005_v50 = vld [vmem:[%s11561_s5] sm:$0xff] }
 0x161   :  { %v7817_v22 = vpop.eup %7816  ;;  %7836 = vrcp.f32 %v946_v3  ;;  %v9593_v23 = vadd.f32 %v8896_v36, %v682_v29  ;;  %v2007_v29 = vld [vmem:[%s11561_s5 + $0x10] sm:$0xff] }
 0x162   :  { %v7819_v34 = vpop.eup %7818  ;;  %v1131_v58 = vmul.f32 %v7817_v22, %v9524_v47  ;;  %7838 = vpow2.f32 %v5898_v46  ;;  %v5900_v41 = vmul.f32 -1.442695, %v9590_v14  ;;  %7058 = vmatprep.mubr.f32.mxu1 %v1129_v28  ;;  %v1132_v47 = vmul.f32 %v7815_v26, %v9520_v42 }
 0x163   :  { %v7821_v52 = vpop.eup %7820  ;;  %v945_v39 = vadd.f32 1.0, %v7819_v34  ;;  %7840 = vpow2.f32 %v5897_v6  ;;  %v5899_v27 = vmul.f32 -1.442695, %v9593_v23  ;;  %7059 = vmatmul.mubr.f32.gmra.mrb[40].mxu1 %v1130_v33  ;;  %v6959_v24 = vpop.f32.mrb[62].mxu0 }
 0x164   :  { %v7823_v56 = vpop.eup %7822  ;;  %v948_v45 = vadd.f32 1.0, %v7821_v52  ;;  %7842 = vpow2.f32 %v5900_v41  ;;  %v9598_v20 = vadd.f32 %v8896_v36, %v6959_v24  ;;  %7061 = vmatprep.mubr.f32.mxu1 %v1131_v58  ;;  %v692_v32 = vpop.f32.mrb[63].mxu0 }
 0x165   :  { %v7825_v48 = vpop.eup %7824  ;;  %7844 = vrcp.f32 %v945_v39  ;;  %v9601_v43 = vadd.f32 %v8896_v36, %v692_v32  ;;  %v1134_v61 = vmul.f32 %v7823_v56, %v9530_v35 }
 0x166   :  { %v7827_v53 = vpop.eup %7826  ;;  %v1133_v54 = vmul.f32 %v7825_v48, %v9534_v62  ;;  %7846 = vrcp.f32 %v948_v45  ;;  %v5902_v4 = vmul.f32 -1.442695, %v9598_v20 }
 0x167   :  { %v7829_v59 = vpop.eup %7828  ;;  %v947_v57 = vadd.f32 1.0, %v7827_v53  ;;  %7848 = vpow2.f32 %v5899_v27  ;;  %v5901_v60 = vmul.f32 -1.442695, %v9601_v43  ;;  %7062 = vmatmul.mubr.f32.gmra.mrb[42].mxu1 %v1132_v47 }
 0x168   :  { %v7831_v18 = vpop.eup %7830  ;;  %v950_v2 = vadd.f32 1.0, %v7829_v59  ;;  %7850 = vpow2.f32 %v5902_v4  ;;  %7064 = vmatprep.mubr.f32.mxu1 %v1133_v54 }
 0x169   :  { %v7833_v42 = vpop.eup %7832  ;;  %7852 = vrcp.f32 %v947_v57  ;;  %v1136_v51 = vmul.f32 %v7831_v18, %v9540_v9 }
 0x16a   :  { %v7835_v63 = vpop.eup %7834  ;;  %v1135_v62 = vmul.f32 %v7833_v42, %v9544_v16  ;;  %7854 = vpow2.f32 %v5901_v60 }
 0x16b   :  { %v7837_v0 = vpop.eup %7836  ;;  %v949_v1 = vadd.f32 1.0, %v7835_v63  ;;  %7065 = vmatmul.mubr.f32.gmra.mrb[44].mxu1 %v1134_v61  ;;  %7856 = vrcp.f32 %v950_v2 }
 0x16c   :  { %v7839_v5 = vpop.eup %7838  ;;  %7067 = vmatprep.mubr.f32.mxu1 %v1135_v62  ;;  %v1138_v10 = vmul.f32 %v7837_v0, %v9550_v21 }
 0x16d   :  { %v7841_v7 = vpop.eup %7840  ;;  %7858 = vrcp.f32 %v949_v1  ;;  %v952_v38 = vadd.f32 1.0, %v7839_v5 }
 0x16e   :  { %v7843_v12 = vpop.eup %7842  ;;  %v951_v11 = vadd.f32 1.0, %v7841_v7 }
 0x16f   :  { %v7845_v31 = vpop.eup %7844  ;;  %7860 = vrcp.f32 %v952_v38  ;;  %v954_v35 = vadd.f32 1.0, %v7843_v12  ;;  %7068 = vmatmul.mubr.f32.gmra.mrb[46].mxu1 %v1136_v51 }
 0x170   :  { %v7847_v36 = vpop.eup %7846  ;;  %v1137_v16 = vmul.f32 %v7845_v31, %v9554_v30  ;;  %7862 = vrcp.f32 %v951_v11  ;;  %v2006_v30 = vld [vmem:[%s11561_s5 + $0x8] sm:$0xff] }
 0x171   :  { %v7849_v15 = vpop.eup %7848  ;;  %7864 = vrcp.f32 %v954_v35  ;;  %v1140_v21 = vmul.f32 %v7847_v36, %v9560_v37  ;;  %v7560_v6 = vpack.c.bf16 %v2006_v30, %v2005_v50  ;;  %v2008_v37 = vld [vmem:[%s11561_s5 + $0x18] sm:$0xff] }
 0x172   :  { %v7851_v17 = vpop.eup %7850  ;;  %v953_v8 = vadd.f32 1.0, %v7849_v15  ;;  %7070 = vmatprep.mubr.f32.mxu1 %v1137_v16  ;;  %v7564_v34 = vpack.c.bf16 %v2008_v37, %v2007_v29 }
 0x173   :  { %v7853_v19 = vpop.eup %7852  ;;  %v956_v9 = vadd.f32 1.0, %v7851_v17  ;;  %7071 = vmatmul.mubr.f32.gmra.mrb[48].mxu1 %v1138_v10  ;;  %7561 = vmatprep.subr.bf16.mxu0 %v7560_v6 }
 0x174   :  { %v1139_v46 = vmul.f32 %v7853_v19, %v9564_v49  ;;  %7866 = vrcp.f32 %v953_v8  ;;  %v7855_v3 = vpop.eup %7854  ;;  %7563 = vmatpush3.bf16.msra.mxu0 %v7560_v6 }
 0x175   :  { %v7857_v25 = vpop.eup %7856  ;;  %v955_v26 = vadd.f32 1.0, %v7855_v3  ;;  %7868 = vrcp.f32 %v956_v9  ;;  %7565 = vmatprep.subr.bf16.mxu0 %v7564_v34 }
 0x176   :  { %7073 = vmatprep.mubr.f32.mxu1 %v1139_v46  ;;  %v1142_v33 = vmul.f32 %v7857_v25, %v9570_v55 }
 0x177   :  { %v7859_v28 = vpop.eup %7858  ;;  %7074 = vmatmul.mubr.f32.gmra.mrb[50].mxu1 %v1140_v21  ;;  %7870 = vrcp.f32 %v955_v26 }
 0x178   :  { %v1141_v49 = vmul.f32 %v7859_v28, %v9574_v40  ;;  %7567 = vmatpush3.bf16.msra.mxu0 %v7564_v34 }
 0x179   :  { %v7861_v22 = vpop.eup %7860 }
 0x17a   :  { %v7863_v58 = vpop.eup %7862  ;;  %7076 = vmatprep.mubr.f32.mxu1 %v1141_v49  ;;  %v1144_v52 = vmul.f32 %v7861_v22, %v9582_v44  ;;  %v9636_v44 = vld [vmem:[%s11562_s4] ss:$0 sm:$0xff] }
 0x17b   :  { %v1143_v41 = vmul.f32 %v7863_v58, %v9585_v13  ;;  %7077 = vmatmul.mubr.f32.gmra.mrb[52].mxu1 %v1142_v33  ;;  %v7865_v40 = vpop.eup %7864 }
 0x17c   :  { %v1146_v56 = vmul.f32 %v7865_v40, %v9590_v14 }
 0x17d   :  { %7079 = vmatprep.mubr.f32.mxu1 %v1143_v41 }
 0x17e   :  { %v7867_v39 = vpop.eup %7866 }
 0x17f   :  { %v1145_v27 = vmul.f32 %v7867_v39, %v9593_v23  ;;  %7080 = vmatmul.mubr.f32.gmra.mrb[54].mxu1 %v1144_v52  ;;  %v7869_v24 = vpop.eup %7868 }
 0x180   :  { %v1148_v13 = vmul.f32 %v7869_v24, %v9598_v20 }
 0x181   :  { %7082 = vmatprep.mubr.f32.mxu1 %v1145_v27  ;;  %v7871_v55 = vpop.eup %7870 }
 0x182   :  { %v1147_v45 = vmul.f32 %v7871_v55, %v9601_v43 }
 0x183   :  { %7083 = vmatmul.mubr.f32.gmra.mrb[56].mxu1 %v1146_v56 }
 0x184   :  { %7085 = vmatprep.mubr.f32.mxu1 %v1147_v45 }
 0x187   :  { %7086 = vmatmul.mubr.f32.gmra.mrb[58].mxu1 %v1148_v13 }
 0x1db   :  { %v6994_v32 = vpop.f32.mrb[64].mxu0 }
 0x1dc   :  { %v9639_v23 = vadd.f32 %v6994_v32, %v9636_v44  ;;  %v1238_v48 = vpop.f32.mrb[65].mxu0 }
 0x1dd   :  { %v9642_v14 = vadd.f32 %v9636_v44, %v1238_v48 }
 0x1de   :  { %v5905_v47 = vmul.f32 -1.442695, %v9639_v23 }
 0x1df   :  { %v5904_v43 = vmul.f32 -1.442695, %v9642_v14  ;;  %v6997_v20 = vpop.f32.mrb[66].mxu0 }
 0x1e0   :  { %7872 = vpow2.f32 %v5905_v47  ;;  %v9647_v53 = vadd.f32 %v6997_v20, %v9636_v44  ;;  %v1248_v54 = vpop.f32.mrb[67].mxu0 }
 0x1e1   :  { %7874 = vpow2.f32 %v5904_v43  ;;  %v9650_v4 = vadd.f32 %v9636_v44, %v1248_v54 }
 0x1e2   :  { %v5907_v59 = vmul.f32 -1.442695, %v9647_v53 }
 0x1e3   :  { %v5906_v57 = vmul.f32 -1.442695, %v9650_v4  ;;  %v7000_v60 = vpop.f32.mrb[0].mxu1 }
 0x1e4   :  { %7876 = vpow2.f32 %v5907_v59  ;;  %v9655_v18 = vadd.f32 %v7000_v60, %v9636_v44  ;;  %v1258_v2 = vpop.f32.mrb[1].mxu1 }
 0x1e5   :  { %7878 = vpow2.f32 %v5906_v57  ;;  %v9658_v42 = vadd.f32 %v9636_v44, %v1258_v2 }
 0x1e6   :  { %v5909_v61 = vmul.f32 -1.442695, %v9655_v18 }
 0x1e7   :  { %v5908_v63 = vmul.f32 -1.442695, %v9658_v42 }
 0x1e8   :  { %7880 = vpow2.f32 %v5909_v61 }
 0x1e9   :  { %7882 = vpow2.f32 %v5908_v63  ;;  %v7003_v62 = vpop.f32.mrb[2].mxu1 }
 0x1ea   :  { %v7873_v0 = vpop.eup %7872  ;;  %v9663_v1 = vadd.f32 %v7003_v62, %v9636_v44  ;;  %v1268_v5 = vpop.f32.mrb[3].mxu1 }
 0x1eb   :  { %v7875_v7 = vpop.eup %7874  ;;  %v1750_v51 = vadd.f32 1.0, %v7873_v0  ;;  %v9666_v38 = vadd.f32 %v9636_v44, %v1268_v5  ;;  %v3042_v0 = vld [vmem:[%s11563_s7] sm:$0xff] }
 0x1ec   :  { %v1749_v12 = vadd.f32 1.0, %v7875_v7  ;;  %v5911_v11 = vmul.f32 -1.442695, %v9663_v1 }
 0x1ed   :  { %7884 = vrcp.f32 %v1750_v51  ;;  %v5910_v31 = vmul.f32 -1.442695, %v9666_v38  ;;  %v7006_v35 = vpop.f32.mrb[4].mxu1 }
 0x1ee   :  { %v7877_v36 = vpop.eup %7876  ;;  %7886 = vrcp.f32 %v1749_v12  ;;  %v9671_v16 = vadd.f32 %v7006_v35, %v9636_v44  ;;  %v1278_v15 = vpop.f32.mrb[5].mxu1  ;;  %v3045_v35 = vld [vmem:[%s11563_s7 + $0x18] sm:$0xff] }
 0x1ef   :  { %v7879_v10 = vpop.eup %7878  ;;  %v1752_v17 = vadd.f32 1.0, %v7877_v36  ;;  %7888 = vpow2.f32 %v5911_v11  ;;  %v9674_v8 = vadd.f32 %v9636_v44, %v1278_v15 }
 0x1f0   :  { %v1751_v19 = vadd.f32 1.0, %v7879_v10  ;;  %7890 = vpow2.f32 %v5910_v31  ;;  %v5913_v9 = vmul.f32 -1.442695, %v9671_v16  ;;  %v3044_v31 = vld [vmem:[%s11563_s7 + $0x10] sm:$0xff] }
 0x1f1   :  { %7892 = vrcp.f32 %v1752_v17  ;;  %v5912_v46 = vmul.f32 -1.442695, %v9674_v8  ;;  %v7009_v50 = vpop.f32.mrb[6].mxu1  ;;  %v7572_v17 = vpack.c.bf16 %v3045_v35, %v3044_v31 }
 0x1f2   :  { %v7881_v30 = vpop.eup %7880  ;;  %7894 = vrcp.f32 %v1751_v19  ;;  %v9679_v3 = vadd.f32 %v7009_v50, %v9636_v44  ;;  %v1288_v21 = vpop.f32.mrb[7].mxu1 }
 0x1f3   :  { %v7883_v6 = vpop.eup %7882  ;;  %v1754_v25 = vadd.f32 1.0, %v7881_v30  ;;  %7896 = vpow2.f32 %v5913_v9  ;;  %v9682_v26 = vadd.f32 %v9636_v44, %v1288_v21 }
 0x1f4   :  { %v1753_v28 = vadd.f32 1.0, %v7883_v6  ;;  %7898 = vpow2.f32 %v5912_v46  ;;  %v5915_v49 = vmul.f32 -1.442695, %v9679_v3 }
 0x1f5   :  { %7900 = vrcp.f32 %v1754_v25  ;;  %v5914_v29 = vmul.f32 -1.442695, %v9682_v26  ;;  %v7012_v37 = vpop.f32.mrb[8].mxu1 }
 0x1f6   :  { %7902 = vrcp.f32 %v1753_v28  ;;  %v9687_v22 = vadd.f32 %v7012_v37, %v9636_v44  ;;  %v1298_v33 = vpop.f32.mrb[9].mxu1 }
 0x1f7   :  { %v7885_v34 = vpop.eup %7884  ;;  %7904 = vpow2.f32 %v5915_v49  ;;  %v9690_v58 = vadd.f32 %v9636_v44, %v1298_v33 }
 0x1f8   :  { %v7887_v41 = vpop.eup %7886  ;;  %7906 = vpow2.f32 %v5914_v29  ;;  %v5917_v40 = vmul.f32 -1.442695, %v9687_v22  ;;  %v1942_v55 = vmul.f32 %v7885_v34, %v9639_v23 }
 0x1f9   :  { %v7889_v52 = vpop.eup %7888  ;;  %v1941_v39 = vmul.f32 %v7887_v41, %v9642_v14  ;;  %v5916_v27 = vmul.f32 -1.442695, %v9690_v58  ;;  %v7015_v24 = vpop.f32.mrb[10].mxu1 }
 0x1fa   :  { %v7891_v56 = vpop.eup %7890  ;;  %v1756_v45 = vadd.f32 1.0, %v7889_v52  ;;  %7908 = vpow2.f32 %v5917_v40  ;;  %v9697_v13 = vadd.f32 %v7015_v24, %v9636_v44  ;;  %v1308_v32 = vpop.f32.mrb[11].mxu1 }
 0x1fb   :  { %v7893_v48 = vpop.eup %7892  ;;  %v1755_v47 = vadd.f32 1.0, %v7891_v56  ;;  %7910 = vpow2.f32 %v5916_v27  ;;  %v9700_v43 = vadd.f32 %v9636_v44, %v1308_v32  ;;  %7096 = vmatprep.mubr.msk.f32.mxu0 %vm2016_vm1, %v1941_v39 }
 0x1fc   :  { %v7895_v14 = vpop.eup %7894  ;;  %7912 = vrcp.f32 %v1756_v45  ;;  %v5919_v20 = vmul.f32 -1.442695, %v9697_v13  ;;  %7097 = vmatmul.mubr.msk.f32.vlgmr.msra.gmra.mrb[68].mxu0 %vm2016_vm1, %v1942_v55  ;;  %v1944_v2 = vmul.f32 %v7893_v48, %v9647_v53 }
 0x1fd   :  { %v7897_v23 = vpop.eup %7896  ;;  %v1943_v54 = vmul.f32 %v7895_v14, %v9650_v4  ;;  %7914 = vrcp.f32 %v1755_v47  ;;  %v5918_v59 = vmul.f32 -1.442695, %v9700_v43  ;;  %v7018_v57 = vpop.f32.mrb[12].mxu1  ;;  %v3043_v4 = vld [vmem:[%s11563_s7 + $0x8] sm:$0xff] }
 0x1fe   :  { %v7899_v60 = vpop.eup %7898  ;;  %v1758_v61 = vadd.f32 1.0, %v7897_v23  ;;  %7916 = vpow2.f32 %v5919_v20  ;;  %v9709_v63 = vadd.f32 %v7018_v57, %v9636_v44  ;;  %v1318_v62 = vpop.f32.mrb[13].mxu1  ;;  %v7568_v53 = vpack.c.bf16 %v3043_v4, %v3042_v0 }
 0x1ff   :  { %v7901_v5 = vpop.eup %7900  ;;  %v1757_v7 = vadd.f32 1.0, %v7899_v60  ;;  %7918 = vpow2.f32 %v5918_v59  ;;  %v9718_v51 = vadd.f32 %v9636_v44, %v1318_v62  ;;  %7099 = vmatprep.mubr.msk.f32.mxu0 %vm2016_vm1, %v1943_v54 }
 0x200   :  { %v7903_v12 = vpop.eup %7902  ;;  %7920 = vrcp.f32 %v1758_v61  ;;  %v5921_v11 = vmul.f32 -1.442695, %v9709_v63  ;;  %7100 = vmatmul.mubr.msk.f32.gmra.mrb[70].mxu0 %vm2016_vm1, %v1944_v2  ;;  %7569 = vmatprep.subr.bf16.mxu1 %v7568_v53  ;;  %v1946_v9 = vmul.f32 %v7901_v5, %v9655_v18 }
 0x201   :  { %v7905_v36 = vpop.eup %7904  ;;  %v1945_v15 = vmul.f32 %v7903_v12, %v9658_v42  ;;  %7922 = vrcp.f32 %v1757_v7  ;;  %v5920_v10 = vmul.f32 -1.442695, %v9718_v51  ;;  %7571 = vmatpush3.bf16.msra.mxu1 %v7568_v53 }
 0x202   :  { %v7907_v19 = vpop.eup %7906  ;;  %v1760_v46 = vadd.f32 1.0, %v7905_v36  ;;  %7924 = vpow2.f32 %v5921_v11  ;;  %v7021_v50 = vpop.f32.mrb[14].mxu1  ;;  %7573 = vmatprep.subr.bf16.mxu1 %v7572_v17 }
 0x203   :  { %v1759_v30 = vadd.f32 1.0, %v7907_v19  ;;  %7926 = vpow2.f32 %v5920_v10  ;;  %v9733_v21 = vadd.f32 %v7021_v50, %v9636_v44  ;;  %v1328_v6 = vpop.f32.mrb[15].mxu1  ;;  %7102 = vmatprep.mubr.msk.f32.mxu0 %vm2016_vm1, %v1945_v15 }
 0x204   :  { %v7909_v42 = vpop.eup %7908  ;;  %7928 = vrcp.f32 %v1760_v46  ;;  %v9737_v25 = vadd.f32 %v9636_v44, %v1328_v6  ;;  %7103 = vmatmul.mubr.msk.f32.gmra.mrb[72].mxu0 %vm2016_vm1, %v1946_v9 }
 0x205   :  { %v7911_v18 = vpop.eup %7910  ;;  %7930 = vrcp.f32 %v1759_v30  ;;  %v1762_v28 = vadd.f32 1.0, %v7909_v42  ;;  %v5923_v49 = vmul.f32 -1.442695, %v9733_v21  ;;  %7575 = vmatpush3.bf16.msra.mxu1 %v7572_v17 }
 0x206   :  { %v7913_v29 = vpop.eup %7912  ;;  %v1761_v37 = vadd.f32 1.0, %v7911_v18  ;;  %v5922_v33 = vmul.f32 -1.442695, %v9737_v25  ;;  %v7024_v34 = vpop.f32.mrb[16].mxu1 }
 0x207   :  { %v7915_v41 = vpop.eup %7914  ;;  %7932 = vrcp.f32 %v1762_v28  ;;  %v9743_v40 = vadd.f32 %v7024_v34, %v9636_v44  ;;  %v1338_v52 = vpop.f32.mrb[17].mxu1  ;;  %v1948_v55 = vmul.f32 %v7913_v29, %v9663_v1 }
 0x208   :  { %v7917_v39 = vpop.eup %7916  ;;  %v1947_v27 = vmul.f32 %v7915_v41, %v9666_v38  ;;  %7934 = vrcp.f32 %v1761_v37  ;;  %v9747_v24 = vadd.f32 %v9636_v44, %v1338_v52 }
 0x209   :  { %v7919_v56 = vpop.eup %7918  ;;  %v1764_v45 = vadd.f32 1.0, %v7917_v39  ;;  %7936 = vpow2.f32 %v5923_v49  ;;  %v5925_v32 = vmul.f32 -1.442695, %v9743_v40 }
 0x20a   :  { %v7921_v48 = vpop.eup %7920  ;;  %v1763_v47 = vadd.f32 1.0, %v7919_v56  ;;  %7938 = vpow2.f32 %v5922_v33  ;;  %v5924_v14 = vmul.f32 -1.442695, %v9747_v24  ;;  %v7027_v20 = vpop.f32.mrb[18].mxu1  ;;  %7105 = vmatprep.mubr.msk.f32.mxu0 %vm2016_vm1, %v1947_v27 }
 0x20b   :  { %v7923_v38 = vpop.eup %7922  ;;  %7940 = vrcp.f32 %v1764_v45  ;;  %v9754_v23 = vadd.f32 %v7027_v20, %v9636_v44  ;;  %v1348_v54 = vpop.f32.mrb[19].mxu1  ;;  %7106 = vmatmul.mubr.msk.f32.gmra.mrb[74].mxu0 %vm2016_vm1, %v1948_v55  ;;  %v1950_v2 = vmul.f32 %v7921_v48, %v9671_v16 }
 0x20c   :  { %v7925_v1 = vpop.eup %7924  ;;  %v1949_v59 = vmul.f32 %v7923_v38, %v9674_v8  ;;  %7942 = vrcp.f32 %v1763_v47  ;;  %v9759_v57 = vadd.f32 %v9636_v44, %v1348_v54 }
 0x20d   :  { %v7927_v60 = vpop.eup %7926  ;;  %v1766_v61 = vadd.f32 1.0, %v7925_v1  ;;  %7944 = vpow2.f32 %v5925_v32  ;;  %v5927_v62 = vmul.f32 -1.442695, %v9754_v23 }
 0x20e   :  { %v7929_v0 = vpop.eup %7928  ;;  %v1765_v4 = vadd.f32 1.0, %v7927_v60  ;;  %7946 = vpow2.f32 %v5924_v14  ;;  %v5926_v5 = vmul.f32 -1.442695, %v9759_v57  ;;  %v7030_v7 = vpop.f32.mrb[20].mxu1  ;;  %7108 = vmatprep.mubr.msk.f32.mxu0 %vm2016_vm1, %v1949_v59 }
 0x20f   :  { %v7931_v8 = vpop.eup %7930  ;;  %7948 = vrcp.f32 %v1766_v61  ;;  %v9766_v53 = vadd.f32 %v7030_v7, %v9636_v44  ;;  %v1358_v12 = vpop.f32.mrb[21].mxu1  ;;  %7109 = vmatmul.mubr.msk.f32.gmra.mrb[76].mxu0 %vm2016_vm1, %v1950_v2  ;;  %v1952_v35 = vmul.f32 %v7929_v0, %v9679_v3 }
 0x210   :  { %v1951_v16 = vmul.f32 %v7931_v8, %v9682_v26  ;;  %7950 = vrcp.f32 %v1765_v4  ;;  %v9771_v11 = vadd.f32 %v9636_v44, %v1358_v12 }
 0x211   :  { %v7933_v31 = vpop.eup %7932  ;;  %7952 = vpow2.f32 %v5927_v62  ;;  %v5929_v36 = vmul.f32 -1.442695, %v9766_v53 }
 0x212   :  { %v7935_v15 = vpop.eup %7934  ;;  %7954 = vpow2.f32 %v5926_v5  ;;  %v5928_v10 = vmul.f32 -1.442695, %v9771_v11  ;;  %v7033_v17 = vpop.f32.mrb[22].mxu1  ;;  %7111 = vmatprep.mubr.msk.f32.mxu0 %vm2016_vm1, %v1951_v16  ;;  %v1954_v42 = vmul.f32 %v7933_v31, %v9687_v22 }
 0x213   :  { %v7937_v19 = vpop.eup %7936  ;;  %v1953_v26 = vmul.f32 %v7935_v15, %v9690_v58  ;;  %7956 = vpow2.f32 %v5929_v36  ;;  %v9779_v9 = vadd.f32 %v7033_v17, %v9636_v44  ;;  %v1368_v46 = vpop.f32.mrb[23].mxu1  ;;  %7112 = vmatmul.mubr.msk.f32.gmra.mrb[78].mxu0 %vm2016_vm1, %v1952_v35 }
 0x214   :  { %v7939_v3 = vpop.eup %7938  ;;  %v1768_v50 = vadd.f32 1.0, %v7937_v19  ;;  %7958 = vpow2.f32 %v5928_v10  ;;  %v9783_v30 = vadd.f32 %v9636_v44, %v1368_v46 }
 0x215   :  { %v7941_v6 = vpop.eup %7940  ;;  %v1767_v18 = vadd.f32 1.0, %v7939_v3  ;;  %v5931_v28 = vmul.f32 -1.442695, %v9779_v9  ;;  %7114 = vmatprep.mubr.msk.f32.mxu0 %vm2016_vm1, %v1953_v26 }
 0x216   :  { %v7943_v58 = vpop.eup %7942  ;;  %7960 = vrcp.f32 %v1768_v50  ;;  %v5930_v49 = vmul.f32 -1.442695, %v9783_v30  ;;  %v7036_v29 = vpop.f32.mrb[24].mxu1  ;;  %v1956_v56 = vmul.f32 %v7941_v6, %v9697_v13 }
 0x217   :  { %v7945_v37 = vpop.eup %7944  ;;  %v1955_v33 = vmul.f32 %v7943_v58, %v9700_v43  ;;  %7962 = vrcp.f32 %v1767_v18  ;;  %v9791_v34 = vadd.f32 %v7036_v29, %v9636_v44  ;;  %v1378_v41 = vpop.f32.mrb[25].mxu1  ;;  %7115 = vmatmul.mubr.msk.f32.gmra.mrb[80].mxu0 %vm2016_vm1, %v1954_v42 }
 0x218   :  { %v7947_v22 = vpop.eup %7946  ;;  %v1770_v52 = vadd.f32 1.0, %v7945_v37  ;;  %7964 = vpow2.f32 %v5931_v28  ;;  %v9795_v39 = vadd.f32 %v9636_v44, %v1378_v41 }
 0x219   :  { %v7949_v27 = vpop.eup %7948  ;;  %v1769_v55 = vadd.f32 1.0, %v7947_v22  ;;  %7966 = vpow2.f32 %v5930_v49  ;;  %v5933_v43 = vmul.f32 -1.442695, %v9791_v34  ;;  %7117 = vmatprep.mubr.msk.f32.mxu0 %vm2016_vm1, %v1955_v33 }
 0x21a   :  { %v7951_v45 = vpop.eup %7950  ;;  %7968 = vrcp.f32 %v1770_v52  ;;  %v5932_v32 = vmul.f32 -1.442695, %v9795_v39  ;;  %v7039_v48 = vpop.f32.mrb[26].mxu1  ;;  %v1958_v60 = vmul.f32 %v7949_v27, %v9709_v63 }
 0x21b   :  { %v7953_v47 = vpop.eup %7952  ;;  %v1957_v14 = vmul.f32 %v7951_v45, %v9718_v51  ;;  %7970 = vrcp.f32 %v1769_v55  ;;  %v9803_v20 = vadd.f32 %v7039_v48, %v9636_v44  ;;  %v1388_v38 = vpop.f32.mrb[27].mxu1  ;;  %7118 = vmatmul.mubr.msk.f32.gmra.mrb[82].mxu0 %vm2016_vm1, %v1956_v56 }
 0x21c   :  { %v7955_v13 = vpop.eup %7954  ;;  %v1772_v54 = vadd.f32 1.0, %v7953_v47  ;;  %7972 = vpow2.f32 %v5933_v43  ;;  %v9807_v1 = vadd.f32 %v9636_v44, %v1388_v38 }
 0x21d   :  { %v7957_v59 = vpop.eup %7956  ;;  %v1771_v2 = vadd.f32 1.0, %v7955_v13  ;;  %7974 = vpow2.f32 %v5932_v32  ;;  %7120 = vmatprep.mubr.msk.f32.mxu0 %vm2016_vm1, %v1957_v14  ;;  %v5935_v62 = vmul.f32 -1.442695, %v9803_v20 }
 0x21e   :  { %v7959_v51 = vpop.eup %7958  ;;  %7976 = vrcp.f32 %v1772_v54  ;;  %v1774_v61 = vadd.f32 1.0, %v7957_v59  ;;  %v7042_v0 = vpop.f32.mrb[28].mxu1  ;;  %v5934_v5 = vmul.f32 -1.442695, %v9807_v1 }
 0x21f   :  { %7978 = vrcp.f32 %v1771_v2  ;;  %v1773_v4 = vadd.f32 1.0, %v7959_v51  ;;  %v9814_v7 = vadd.f32 %v7042_v0, %v9636_v44  ;;  %v1398_v8 = vpop.f32.mrb[29].mxu1  ;;  %7121 = vmatmul.mubr.msk.f32.gmra.mrb[84].mxu0 %vm2016_vm1, %v1958_v60 }
 0x220   :  { %v7961_v63 = vpop.eup %7960  ;;  %7980 = vrcp.f32 %v1774_v61  ;;  %v9818_v12 = vadd.f32 %v9636_v44, %v1398_v8 }
 0x221   :  { %v7963_v16 = vpop.eup %7962  ;;  %7982 = vrcp.f32 %v1773_v4  ;;  %v5937_v31 = vmul.f32 -1.442695, %v9814_v7  ;;  %v1960_v36 = vmul.f32 %v7961_v63, %v9733_v21 }
 0x222   :  { %v7965_v35 = vpop.eup %7964  ;;  %v1959_v15 = vmul.f32 %v7963_v16, %v9737_v25  ;;  %7984 = vpow2.f32 %v5935_v62  ;;  %v7045_v10 = vpop.f32.mrb[30].mxu1  ;;  %v5936_v26 = vmul.f32 -1.442695, %v9818_v12 }
 0x223   :  { %v7967_v17 = vpop.eup %7966  ;;  %v1776_v19 = vadd.f32 1.0, %v7965_v35  ;;  %7986 = vpow2.f32 %v5934_v5  ;;  %v9825_v46 = vadd.f32 %v7045_v10, %v9636_v44  ;;  %v1408_v3 = vpop.f32.mrb[31].mxu1 }
 0x224   :  { %v7969_v50 = vpop.eup %7968  ;;  %v1775_v6 = vadd.f32 1.0, %v7967_v17  ;;  %7988 = vpow2.f32 %v5937_v31  ;;  %7123 = vmatprep.mubr.msk.f32.mxu0 %vm2016_vm1, %v1959_v15  ;;  %v9829_v21 = vadd.f32 %v9636_v44, %v1408_v3 }
 0x225   :  { %v7971_v25 = vpop.eup %7970  ;;  %7990 = vrcp.f32 %v1776_v19  ;;  %v5939_v42 = vmul.f32 -1.442695, %v9825_v46  ;;  %7124 = vmatmul.mubr.msk.f32.gmra.mrb[86].mxu0 %vm2016_vm1, %v1960_v36  ;;  %v1962_v28 = vmul.f32 %v7969_v50, %v9743_v40 }
 0x226   :  { %v7973_v18 = vpop.eup %7972  ;;  %v1961_v58 = vmul.f32 %v7971_v25, %v9747_v24  ;;  %7992 = vrcp.f32 %v1775_v6  ;;  %v7048_v49 = vpop.f32.mrb[32].mxu1  ;;  %v5938_v33 = vmul.f32 -1.442695, %v9829_v21 }
 0x227   :  { %v7975_v29 = vpop.eup %7974  ;;  %v1778_v37 = vadd.f32 1.0, %v7973_v18  ;;  %7994 = vpow2.f32 %v5936_v26  ;;  %v9837_v41 = vadd.f32 %v7048_v49, %v9636_v44  ;;  %v1418_v22 = vpop.f32.mrb[33].mxu1 }
 0x228   :  { %v7977_v52 = vpop.eup %7976  ;;  %v1777_v27 = vadd.f32 1.0, %v7975_v29  ;;  %7996 = vpow2.f32 %v5939_v42  ;;  %7126 = vmatprep.mubr.msk.f32.mxu0 %vm2016_vm1, %v1961_v58  ;;  %v9841_v40 = vadd.f32 %v9636_v44, %v1418_v22 }
 0x229   :  { %v7979_v24 = vpop.eup %7978  ;;  %7998 = vrcp.f32 %v1778_v37  ;;  %v5941_v56 = vmul.f32 -1.442695, %v9837_v41  ;;  %7127 = vmatmul.mubr.msk.f32.gmra.mrb[88].mxu0 %vm2016_vm1, %v1962_v28  ;;  %v1964_v47 = vmul.f32 %v7977_v52, %v9754_v23 }
 0x22a   :  { %v7981_v55 = vpop.eup %7980  ;;  %v1963_v43 = vmul.f32 %v7979_v24, %v9759_v57  ;;  %8000 = vrcp.f32 %v1777_v27  ;;  %v5940_v45 = vmul.f32 -1.442695, %v9841_v40  ;;  %v7051_v32 = vpop.f32.mrb[34].mxu1 }
 0x22b   :  { %v7983_v48 = vpop.eup %7982  ;;  %8002 = vpow2.f32 %v5938_v33  ;;  %v9849_v14 = vadd.f32 %v7051_v32, %v9636_v44  ;;  %v1428_v38 = vpop.f32.mrb[35].mxu1  ;;  %v1966_v2 = vmul.f32 %v7981_v55, %v9766_v53 }
 0x22c   :  { %v7985_v13 = vpop.eup %7984  ;;  %v1965_v54 = vmul.f32 %v7983_v48, %v9771_v11  ;;  %8004 = vpow2.f32 %v5941_v56  ;;  %7129 = vmatprep.mubr.msk.f32.mxu0 %vm2016_vm1, %v1963_v43  ;;  %v9854_v57 = vadd.f32 %v9636_v44, %v1428_v38 }
 0x22d   :  { %v7987_v59 = vpop.eup %7986  ;;  %v1780_v60 = vadd.f32 1.0, %v7985_v13  ;;  %8006 = vpow2.f32 %v5940_v45  ;;  %7130 = vmatmul.mubr.msk.f32.gmra.mrb[90].mxu0 %vm2016_vm1, %v1964_v47  ;;  %v5943_v61 = vmul.f32 -1.442695, %v9849_v14 }
 0x22e   :  { %v7989_v23 = vpop.eup %7988  ;;  %v1779_v51 = vadd.f32 1.0, %v7987_v59  ;;  %v7054_v62 = vpop.f32.mrb[36].mxu1  ;;  %7132 = vmatprep.mubr.msk.f32.mxu0 %vm2016_vm1, %v1965_v54  ;;  %v5942_v4 = vmul.f32 -1.442695, %v9854_v57 }
 0x22f   :  { %v7991_v11 = vpop.eup %7990  ;;  %8008 = vrcp.f32 %v1780_v60  ;;  %v1782_v0 = vadd.f32 1.0, %v7989_v23  ;;  %v9862_v5 = vadd.f32 %v7054_v62, %v9636_v44  ;;  %v1438_v8 = vpop.f32.mrb[37].mxu1 }
 0x230   :  { %v7993_v63 = vpop.eup %7992  ;;  %8010 = vrcp.f32 %v1779_v51  ;;  %v9865_v16 = vadd.f32 %v9636_v44, %v1438_v8  ;;  %v1968_v36 = vmul.f32 %v7991_v11, %v9779_v9 }
 0x231   :  { %v7995_v53 = vpop.eup %7994  ;;  %v1967_v31 = vmul.f32 %v7993_v63, %v9783_v30  ;;  %8012 = vrcp.f32 %v1782_v0  ;;  %7133 = vmatmul.mubr.msk.f32.gmra.mrb[92].mxu0 %vm2016_vm1, %v1966_v2  ;;  %v5945_v10 = vmul.f32 -1.442695, %v9862_v5 }
 0x232   :  { %v7997_v35 = vpop.eup %7996  ;;  %v1781_v15 = vadd.f32 1.0, %v7995_v53  ;;  %8014 = vpow2.f32 %v5943_v61  ;;  %v7057_v17 = vpop.f32.mrb[38].mxu1  ;;  %v5944_v3 = vmul.f32 -1.442695, %v9865_v16 }
 0x233   :  { %v7999_v19 = vpop.eup %7998  ;;  %v1784_v26 = vadd.f32 1.0, %v7997_v35  ;;  %8016 = vpow2.f32 %v5942_v4  ;;  %v9873_v50 = vadd.f32 %v7057_v17, %v9636_v44  ;;  %7135 = vmatprep.mubr.msk.f32.mxu0 %vm2016_vm1, %v1967_v31  ;;  %v1448_v30 = vpop.f32.mrb[39].mxu1 }
 0x234   :  { %v8001_v6 = vpop.eup %8000  ;;  %8018 = vrcp.f32 %v1781_v15  ;;  %v9877_v9 = vadd.f32 %v9636_v44, %v1448_v30  ;;  %v1970_v28 = vmul.f32 %v7999_v19, %v9791_v34 }
 0x235   :  { %v8003_v25 = vpop.eup %8002  ;;  %v1969_v42 = vmul.f32 %v8001_v6, %v9795_v39  ;;  %8020 = vrcp.f32 %v1784_v26  ;;  %7136 = vmatmul.mubr.msk.f32.gmra.mrb[94].mxu0 %vm2016_vm1, %v1968_v36  ;;  %v5947_v33 = vmul.f32 -1.442695, %v9873_v50 }
 0x236   :  { %v8005_v18 = vpop.eup %8004  ;;  %v1783_v58 = vadd.f32 1.0, %v8003_v25  ;;  %8022 = vpow2.f32 %v5945_v10  ;;  %v7060_v49 = vpop.f32.mrb[40].mxu1  ;;  %v5946_v27 = vmul.f32 -1.442695, %v9877_v9 }
 0x237   :  { %v8007_v29 = vpop.eup %8006  ;;  %v1786_v37 = vadd.f32 1.0, %v8005_v18  ;;  %8024 = vpow2.f32 %v5944_v3  ;;  %v9884_v22 = vadd.f32 %v7060_v49, %v9636_v44  ;;  %7138 = vmatprep.mubr.msk.f32.mxu0 %vm2016_vm1, %v1969_v42  ;;  %v1458_v39 = vpop.f32.mrb[41].mxu1 }
 0x238   :  { %8026 = vrcp.f32 %v1783_v58  ;;  %v1785_v52 = vadd.f32 1.0, %v8007_v29  ;;  %v9889_v34 = vadd.f32 %v9636_v44, %v1458_v39 }
 0x239   :  { %v8009_v24 = vpop.eup %8008  ;;  %8028 = vrcp.f32 %v1786_v37  ;;  %v5949_v56 = vmul.f32 -1.442695, %v9884_v22  ;;  %7139 = vmatmul.mubr.msk.f32.gmra.mrb[96].mxu0 %vm2016_vm1, %v1970_v28 }
 0x23a   :  { %v8011_v55 = vpop.eup %8010  ;;  %8030 = vrcp.f32 %v1785_v52  ;;  %v5948_v43 = vmul.f32 -1.442695, %v9889_v34  ;;  %v7063_v45 = vpop.f32.mrb[42].mxu1  ;;  %v1972_v54 = vmul.f32 %v8009_v24, %v9803_v20 }
 0x23b   :  { %v8013_v32 = vpop.eup %8012  ;;  %v1971_v48 = vmul.f32 %v8011_v55, %v9807_v1  ;;  %8032 = vpow2.f32 %v5947_v33  ;;  %v9896_v47 = vadd.f32 %v7063_v45, %v9636_v44  ;;  %v1468_v38 = vpop.f32.mrb[43].mxu1 }
 0x23c   :  { %v8015_v13 = vpop.eup %8014  ;;  %8034 = vpow2.f32 %v5946_v27  ;;  %v9900_v59 = vadd.f32 %v9636_v44, %v1468_v38  ;;  %v1974_v63 = vmul.f32 %v8013_v32, %v9814_v7 }
 0x23d   :  { %v8017_v60 = vpop.eup %8016  ;;  %v1788_v23 = vadd.f32 1.0, %v8015_v13  ;;  %8036 = vpow2.f32 %v5949_v56  ;;  %v5951_v2 = vmul.f32 -1.442695, %v9896_v47  ;;  %7141 = vmatprep.mubr.msk.f32.mxu0 %vm2016_vm1, %v1971_v48 }
 0x23e   :  { %v8019_v1 = vpop.eup %8018  ;;  %v1787_v51 = vadd.f32 1.0, %v8017_v60  ;;  %8038 = vpow2.f32 %v5948_v43  ;;  %v5950_v61 = vmul.f32 -1.442695, %v9900_v59  ;;  %7142 = vmatmul.mubr.msk.f32.gmra.mrb[98].mxu0 %vm2016_vm1, %v1972_v54  ;;  %v7066_v62 = vpop.f32.mrb[44].mxu1 }
 0x23f   :  { %v8021_v20 = vpop.eup %8020  ;;  %v1973_v11 = vmul.f32 %v8019_v1, %v9818_v12  ;;  %8040 = vrcp.f32 %v1788_v23  ;;  %v9908_v0 = vadd.f32 %v7066_v62, %v9636_v44  ;;  %v1478_v4 = vpop.f32.mrb[45].mxu1 }
 0x240   :  { %v8023_v8 = vpop.eup %8022  ;;  %8042 = vrcp.f32 %v1787_v51  ;;  %v9912_v53 = vadd.f32 %v9636_v44, %v1478_v4  ;;  %v1976_v6 = vmul.f32 %v8021_v20, %v9825_v46 }
 0x241   :  { %v8025_v31 = vpop.eup %8024  ;;  %v1790_v35 = vadd.f32 1.0, %v8023_v8  ;;  %8044 = vpow2.f32 %v5951_v2  ;;  %v5953_v36 = vmul.f32 -1.442695, %v9908_v0  ;;  %7144 = vmatprep.mubr.msk.f32.mxu0 %vm2016_vm1, %v1973_v11 }
 0x242   :  { %v8027_v12 = vpop.eup %8026  ;;  %v1789_v15 = vadd.f32 1.0, %v8025_v31  ;;  %8046 = vpow2.f32 %v5950_v61  ;;  %v5952_v10 = vmul.f32 -1.442695, %v9912_v53  ;;  %7145 = vmatmul.mubr.msk.f32.gmra.mrb[100].mxu0 %vm2016_vm1, %v1974_v63  ;;  %v7069_v17 = vpop.f32.mrb[46].mxu1 }
 0x243   :  { %v8029_v7 = vpop.eup %8028  ;;  %v1975_v19 = vmul.f32 %v8027_v12, %v9829_v21  ;;  %8048 = vrcp.f32 %v1790_v35  ;;  %v9920_v26 = vadd.f32 %v7069_v17, %v9636_v44  ;;  %v1488_v3 = vpop.f32.mrb[47].mxu1 }
 0x244   :  { %v8031_v30 = vpop.eup %8030  ;;  %8050 = vrcp.f32 %v1789_v15  ;;  %v9924_v25 = vadd.f32 %v9636_v44, %v1488_v3  ;;  %v1978_v46 = vmul.f32 %v8029_v7, %v9837_v41  ;;  %v8897_v3 = vld [vmem:[%s11562_s4] ss:$0 sm:$0xff] }
 0x245   :  { %v8033_v42 = vpop.eup %8032  ;;  %v1977_v18 = vmul.f32 %v8031_v30, %v9841_v40  ;;  %8052 = vpow2.f32 %v5953_v36  ;;  %v5955_v28 = vmul.f32 -1.442695, %v9920_v26  ;;  %7147 = vmatprep.mubr.msk.f32.mxu0 %vm2016_vm1, %v1975_v19 }
 0x246   :  { %v8035_v21 = vpop.eup %8034  ;;  %v1792_v58 = vadd.f32 1.0, %v8033_v42  ;;  %8054 = vpow2.f32 %v5952_v10  ;;  %7148 = vmatmul.mubr.msk.f32.gmra.mrb[102].mxu0 %vm2016_vm1, %v1976_v6  ;;  %v7072_v49 = vpop.f32.mrb[48].mxu1  ;;  %v5954_v27 = vmul.f32 -1.442695, %v9924_v25 }
 0x247   :  { %v8037_v29 = vpop.eup %8036  ;;  %v1791_v37 = vadd.f32 1.0, %v8035_v21  ;;  %8056 = vpow2.f32 %v5955_v28  ;;  %v9932_v33 = vadd.f32 %v7072_v49, %v9636_v44  ;;  %7150 = vmatprep.mubr.msk.f32.mxu0 %vm2016_vm1, %v1977_v18  ;;  %v1498_v40 = vpop.f32.mrb[49].mxu1 }
 0x248   :  { %v8039_v39 = vpop.eup %8038  ;;  %8058 = vrcp.f32 %v1792_v58  ;;  %v1794_v52 = vadd.f32 1.0, %v8037_v29  ;;  %v9937_v24 = vadd.f32 %v9636_v44, %v1498_v40 }
 0x249   :  { %v8041_v56 = vpop.eup %8040  ;;  %8060 = vrcp.f32 %v1791_v37  ;;  %v1793_v55 = vadd.f32 1.0, %v8039_v39  ;;  %v5957_v41 = vmul.f32 -1.442695, %v9932_v33 }
 0x24a   :  { %v8043_v43 = vpop.eup %8042  ;;  %8062 = vrcp.f32 %v1794_v52  ;;  %7151 = vmatmul.mubr.msk.f32.gmra.mrb[104].mxu0 %vm2016_vm1, %v1978_v46  ;;  %v7075_v45 = vpop.f32.mrb[50].mxu1  ;;  %v1980_v60 = vmul.f32 %v8041_v56, %v9849_v14  ;;  %v5956_v2 = vmul.f32 -1.442695, %v9937_v24 }
 0x24b   :  { %v8045_v32 = vpop.eup %8044  ;;  %v1979_v48 = vmul.f32 %v8043_v43, %v9854_v57  ;;  %8064 = vrcp.f32 %v1793_v55  ;;  %v9943_v38 = vadd.f32 %v7075_v45, %v9636_v44  ;;  %v1508_v13 = vpop.f32.mrb[51].mxu1 }
 0x24c   :  { %v8047_v54 = vpop.eup %8046  ;;  %v1796_v23 = vadd.f32 1.0, %v8045_v32  ;;  %8066 = vpow2.f32 %v5954_v27  ;;  %v9950_v57 = vadd.f32 %v9636_v44, %v1508_v13 }
 0x24d   :  { %v8049_v1 = vpop.eup %8048  ;;  %v1795_v51 = vadd.f32 1.0, %v8047_v54  ;;  %8068 = vpow2.f32 %v5957_v41  ;;  %v5959_v61 = vmul.f32 -1.442695, %v9943_v38  ;;  %7153 = vmatprep.mubr.msk.f32.mxu0 %vm2016_vm1, %v1979_v48 }
 0x24e   :  { %v8051_v62 = vpop.eup %8050  ;;  %8070 = vrcp.f32 %v1796_v23  ;;  %7154 = vmatmul.mubr.msk.f32.gmra.mrb[106].mxu0 %vm2016_vm1, %v1980_v60  ;;  %v7078_v20 = vpop.f32.mrb[52].mxu1  ;;  %v1982_v31 = vmul.f32 %v8049_v1, %v9862_v5  ;;  %v5958_v10 = vmul.f32 -1.442695, %v9950_v57 }
 0x24f   :  { %v8053_v14 = vpop.eup %8052  ;;  %v1981_v11 = vmul.f32 %v8051_v62, %v9865_v16  ;;  %8072 = vrcp.f32 %v1795_v51  ;;  %v9955_v4 = vadd.f32 %v7078_v20, %v9636_v44  ;;  %v1518_v8 = vpop.f32.mrb[53].mxu1 }
 0x250   :  { %v8055_v63 = vpop.eup %8054  ;;  %v1798_v35 = vadd.f32 1.0, %v8053_v14  ;;  %8074 = vpow2.f32 %v5956_v2  ;;  %v9959_v36 = vadd.f32 %v9636_v44, %v1518_v8 }
 0x251   :  { %v8057_v12 = vpop.eup %8056  ;;  %v1797_v15 = vadd.f32 1.0, %v8055_v63  ;;  %8076 = vpow2.f32 %v5959_v61  ;;  %7156 = vmatprep.mubr.msk.f32.mxu0 %vm2016_vm1, %v1981_v11  ;;  %v5961_v7 = vmul.f32 -1.442695, %v9955_v4 }
 0x252   :  { %v8059_v16 = vpop.eup %8058  ;;  %8078 = vrcp.f32 %v1798_v35  ;;  %v1800_v17 = vadd.f32 1.0, %v8057_v12  ;;  %7157 = vmatmul.mubr.msk.f32.gmra.mrb[108].mxu0 %vm2016_vm1, %v1982_v31  ;;  %v7081_v5 = vpop.f32.mrb[54].mxu1  ;;  %v5960_v44 = vmul.f32 -1.442695, %v9959_v36 }
 0x253   :  { %v8061_v19 = vpop.eup %8060  ;;  %8080 = vrcp.f32 %v1797_v15  ;;  %v9969_v30 = vadd.f32 %v8897_v3, %v7081_v5  ;;  %v1528_v6 = vpop.f32.mrb[55].mxu1  ;;  %v1984_v58 = vmul.f32 %v8059_v16, %v9873_v50 }
 0x254   :  { %v8063_v42 = vpop.eup %8062  ;;  %v1983_v18 = vmul.f32 %v8061_v19, %v9877_v9  ;;  %8082 = vrcp.f32 %v1800_v17  ;;  %v9972_v28 = vadd.f32 %v8897_v3, %v1528_v6 }
 0x255   :  { %v8065_v21 = vpop.eup %8064  ;;  %8084 = vpow2.f32 %v5958_v10  ;;  %v5963_v49 = vmul.f32 -1.442695, %v9969_v30  ;;  %v1986_v41 = vmul.f32 %v8063_v42, %v9884_v22 }
 0x256   :  { %v8067_v29 = vpop.eup %8066  ;;  %v1985_v46 = vmul.f32 %v8065_v21, %v9889_v34  ;;  %8086 = vpow2.f32 %v5961_v7  ;;  %7159 = vmatprep.mubr.msk.f32.mxu0 %vm2016_vm1, %v1983_v18  ;;  %v7084_v37 = vpop.f32.mrb[56].mxu1  ;;  %v5962_v9 = vmul.f32 -1.442695, %v9972_v28 }
 0x257   :  { %v8069_v40 = vpop.eup %8068  ;;  %v1799_v39 = vadd.f32 1.0, %v8067_v29  ;;  %8088 = vpow2.f32 %v5960_v44  ;;  %7160 = vmatmul.mubr.msk.f32.gmra.mrb[110].mxu0 %vm2016_vm1, %v1984_v58  ;;  %v9980_v52 = vadd.f32 %v8897_v3, %v7084_v37  ;;  %v1538_v50 = vpop.f32.mrb[57].mxu1 }
 0x258   :  { %v8071_v27 = vpop.eup %8070  ;;  %v1802_v56 = vadd.f32 1.0, %v8069_v40  ;;  %8090 = vpow2.f32 %v5963_v49  ;;  %7162 = vmatprep.mubr.msk.f32.mxu0 %vm2016_vm1, %v1985_v46  ;;  %v9983_v34 = vadd.f32 %v8897_v3, %v1538_v50 }
 0x259   :  { %v8073_v55 = vpop.eup %8072  ;;  %8092 = vrcp.f32 %v1799_v39  ;;  %v5965_v43 = vmul.f32 -1.442695, %v9980_v52  ;;  %v1988_v61 = vmul.f32 %v8071_v27, %v9896_v47 }
 0x25a   :  { %v8075_v45 = vpop.eup %8074  ;;  %v1987_v32 = vmul.f32 %v8073_v55, %v9900_v59  ;;  %8094 = vrcp.f32 %v1802_v56  ;;  %v7087_v48 = vpop.f32.mrb[58].mxu1  ;;  %v5964_v60 = vmul.f32 -1.442695, %v9983_v34 }
 0x25b   :  { %v8077_v13 = vpop.eup %8076  ;;  %v1801_v54 = vadd.f32 1.0, %v8075_v45  ;;  %8096 = vpow2.f32 %v5962_v9  ;;  %7163 = vmatmul.mubr.msk.f32.gmra.mrb[112].mxu0 %vm2016_vm1, %v1986_v41  ;;  %v9990_v23 = vadd.f32 %v8897_v3, %v7087_v48  ;;  %v1548_v2 = vpop.f32.mrb[59].mxu1 }
 0x25c   :  { %v8079_v1 = vpop.eup %8078  ;;  %v1804_v22 = vadd.f32 1.0, %v8077_v13  ;;  %8098 = vpow2.f32 %v5965_v43  ;;  %7165 = vmatprep.mubr.msk.f32.mxu0 %vm2016_vm1, %v1987_v32  ;;  %v9993_v51 = vadd.f32 %v8897_v3, %v1548_v2 }
 0x25d   :  { %v8081_v59 = vpop.eup %8080  ;;  %8100 = vrcp.f32 %v1801_v54  ;;  %v5967_v62 = vmul.f32 -1.442695, %v9990_v23  ;;  %v1990_v47 = vmul.f32 %v8079_v1, %v9908_v0 }
 0x25e   :  { %v8083_v20 = vpop.eup %8082  ;;  %v1989_v14 = vmul.f32 %v8081_v59, %v9912_v53  ;;  %8102 = vrcp.f32 %v1804_v22  ;;  %v5966_v11 = vmul.f32 -1.442695, %v9993_v51 }
 0x25f   :  { %v8085_v8 = vpop.eup %8084  ;;  %8104 = vpow2.f32 %v5964_v60  ;;  %7166 = vmatmul.mubr.msk.f32.gmra.mrb[114].mxu0 %vm2016_vm1, %v1988_v61  ;;  %v1992_v5 = vmul.f32 %v8083_v20, %v9920_v26 }
 0x260   :  { %v8087_v63 = vpop.eup %8086  ;;  %v1803_v31 = vadd.f32 1.0, %v8085_v8  ;;  %8106 = vpow2.f32 %v5967_v62  ;;  %7168 = vmatprep.mubr.msk.f32.mxu0 %vm2016_vm1, %v1989_v14 }
 0x261   :  { %v8089_v35 = vpop.eup %8088  ;;  %v1806_v12 = vadd.f32 1.0, %v8087_v63  ;;  %8108 = vpow2.f32 %v5966_v11 }
 0x262   :  { %v8091_v15 = vpop.eup %8090  ;;  %8110 = vrcp.f32 %v1803_v31  ;;  %v1805_v53 = vadd.f32 1.0, %v8089_v35 }
 0x263   :  { %v8093_v10 = vpop.eup %8092  ;;  %7169 = vmatmul.mubr.msk.f32.gmra.mrb[116].mxu0 %vm2016_vm1, %v1990_v47  ;;  %v1808_v19 = vadd.f32 1.0, %v8091_v15 }
 0x264   :  { %v8095_v16 = vpop.eup %8094  ;;  %v1991_v17 = vmul.f32 %v8093_v10, %v9924_v25  ;;  %8112 = vrcp.f32 %v1805_v53 }
 0x265   :  { %v8097_v7 = vpop.eup %8096  ;;  %8114 = vrcp.f32 %v1806_v12  ;;  %v1994_v25 = vmul.f32 %v8095_v16, %v9932_v33 }
 0x266   :  { %v8099_v44 = vpop.eup %8098  ;;  %v1807_v3 = vadd.f32 1.0, %v8097_v7  ;;  %7171 = vmatprep.mubr.msk.f32.mxu0 %vm2016_vm1, %v1991_v17 }
 0x267   :  { %v8101_v0 = vpop.eup %8100  ;;  %7172 = vmatmul.mubr.msk.f32.gmra.mrb[118].mxu0 %vm2016_vm1, %v1992_v5  ;;  %v1810_v21 = vadd.f32 1.0, %v8099_v44 }
 0x268   :  { %v8103_v6 = vpop.eup %8102  ;;  %v1993_v42 = vmul.f32 %v8101_v0, %v9937_v24  ;;  %8116 = vrcp.f32 %v1807_v3 }
 0x269   :  { %v8105_v18 = vpop.eup %8104  ;;  %8118 = vrcp.f32 %v1808_v19  ;;  %v1996_v39 = vmul.f32 %v8103_v6, %v9943_v38 }
 0x26a   :  { %v8107_v58 = vpop.eup %8106  ;;  %v1809_v26 = vadd.f32 1.0, %v8105_v18  ;;  %7174 = vmatprep.mubr.msk.f32.mxu0 %vm2016_vm1, %v1993_v42 }
 0x26b   :  { %v8109_v49 = vpop.eup %8108  ;;  %7175 = vmatmul.mubr.msk.f32.gmra.mrb[120].mxu0 %vm2016_vm1, %v1994_v25  ;;  %v1812_v24 = vadd.f32 1.0, %v8107_v58 }
 0x26c   :  { %v8111_v29 = vpop.eup %8110  ;;  %8120 = vrcp.f32 %v1809_v26  ;;  %v1811_v46 = vadd.f32 1.0, %v8109_v49 }
 0x26d   :  { %v1995_v37 = vmul.f32 %v8111_v29, %v9950_v57  ;;  %8122 = vrcp.f32 %v1810_v21 }
 0x26e   :  { %v8113_v40 = vpop.eup %8112  ;;  %8124 = vrcp.f32 %v1811_v46 }
 0x26f   :  { %v8115_v33 = vpop.eup %8114  ;;  %v1997_v9 = vmul.f32 %v8113_v40, %v9959_v36  ;;  %7177 = vmatprep.mubr.msk.f32.mxu0 %vm2016_vm1, %v1995_v37  ;;  %8126 = vrcp.f32 %v1812_v24 }
 0x270   :  { %7178 = vmatmul.mubr.msk.f32.gmra.mrb[122].mxu0 %vm2016_vm1, %v1996_v39  ;;  %v1998_v27 = vmul.f32 %v8115_v33, %v9955_v4 }
 0x271   :  { %7180 = vmatprep.mubr.msk.f32.mxu0 %vm2016_vm1, %v1997_v9 }
 0x272   :  { %v8117_v50 = vpop.eup %8116 }
 0x273   :  { %v8119_v57 = vpop.eup %8118  ;;  %v1999_v56 = vmul.f32 %v8117_v50, %v9972_v28 }
 0x274   :  { %7181 = vmatmul.mubr.msk.f32.gmra.mrb[124].mxu0 %vm2016_vm1, %v1998_v27  ;;  %v2000_v36 = vmul.f32 %v8119_v57, %v9969_v30  ;;  %v10034_v30 = vld [vmem:[%s11564_s6] ss:$0 sm:$0xff] }
 0x275   :  { %7183 = vmatprep.mubr.msk.f32.mxu0 %vm2016_vm1, %v1999_v56 }
 0x276   :  { %v8121_v38 = vpop.eup %8120 }
 0x277   :  { %v8123_v55 = vpop.eup %8122  ;;  %v2001_v41 = vmul.f32 %v8121_v38, %v9983_v34 }
 0x278   :  { %v8125_v43 = vpop.eup %8124  ;;  %7184 = vmatmul.mubr.msk.f32.gmra.mrb[126].mxu0 %vm2016_vm1, %v2000_v36  ;;  %v2002_v4 = vmul.f32 %v8123_v55, %v9980_v52 }
 0x279   :  { %v2003_v45 = vmul.f32 %v8125_v43, %v9993_v51  ;;  %7186 = vmatprep.mubr.msk.f32.mxu0 %vm2016_vm1, %v2001_v41  ;;  %v8127_v28 = vpop.eup %8126 }
 0x27a   :  { %v2004_v32 = vmul.f32 %v8127_v28, %v9990_v23 }
 0x27c   :  { %7187 = vmatmul.mubr.msk.f32.gmra.mrb[128].mxu0 %vm2016_vm1, %v2002_v4 }
 0x27d   :  { %7189 = vmatprep.mubr.msk.f32.mxu0 %vm2016_vm1, %v2003_v45 }
 0x280   :  { %7190 = vmatmul.mubr.msk.f32.gmra.mrb[130].mxu0 %vm2016_vm1, %v2004_v32 }
 0x2cf   :  { %v7098_v34 = vpop.f32.mrb[68].mxu0 }
 0x2d0   :  { %v10037_v48 = vadd.f32 %v7098_v34, %v10034_v30  ;;  %v2275_v13 = vpop.f32.mrb[69].mxu0 }
 0x2d1   :  { %v10040_v52 = vadd.f32 %v10034_v30, %v2275_v13 }
 0x2d2   :  { %v6034_v54 = vmul.f32 -1.442695, %v10037_v48 }
 0x2d3   :  { %v6033_v60 = vmul.f32 -1.442695, %v10040_v52  ;;  %v7101_v23 = vpop.f32.mrb[70].mxu0 }
 0x2d4   :  { %8128 = vpow2.f32 %v6034_v54  ;;  %v10045_v2 = vadd.f32 %v7101_v23, %v10034_v30  ;;  %v2285_v1 = vpop.f32.mrb[71].mxu0 }
 0x2d5   :  { %8130 = vpow2.f32 %v6033_v60  ;;  %v10048_v22 = vadd.f32 %v10034_v30, %v2285_v1 }
 0x2d6   :  { %v6036_v51 = vmul.f32 -1.442695, %v10045_v2 }
 0x2d7   :  { %v6035_v59 = vmul.f32 -1.442695, %v10048_v22  ;;  %v7104_v61 = vpop.f32.mrb[72].mxu0 }
 0x2d8   :  { %8132 = vpow2.f32 %v6036_v51  ;;  %v10053_v62 = vadd.f32 %v7104_v61, %v10034_v30  ;;  %v2295_v20 = vpop.f32.mrb[73].mxu0 }
 0x2d9   :  { %8134 = vpow2.f32 %v6035_v59  ;;  %v10056_v14 = vadd.f32 %v10034_v30, %v2295_v20 }
 0x2da   :  { %v6038_v11 = vmul.f32 -1.442695, %v10053_v62 }
 0x2db   :  { %v6037_v8 = vmul.f32 -1.442695, %v10056_v14 }
 0x2dc   :  { %8136 = vpow2.f32 %v6038_v11 }
 0x2dd   :  { %8138 = vpow2.f32 %v6037_v8 }
 0x2de   :  { %v8129_v63 = vpop.eup %8128  ;;  %v7107_v31 = vpop.f32.mrb[74].mxu0 }
 0x2df   :  { %v8131_v35 = vpop.eup %8130  ;;  %v2787_v47 = vadd.f32 1.0, %v8129_v63  ;;  %v10061_v12 = vadd.f32 %v7107_v31, %v10034_v30  ;;  %v2305_v15 = vpop.f32.mrb[75].mxu0 }
 0x2e0   :  { %v2786_v53 = vadd.f32 1.0, %v8131_v35  ;;  %v10064_v10 = vadd.f32 %v10034_v30, %v2305_v15  ;;  %v4079_v15 = vld [vmem:[%s11565_s9 + $0x8] sm:$0xff] }
 0x2e1   :  { %8140 = vrcp.f32 %v2787_v47  ;;  %v6040_v16 = vmul.f32 -1.442695, %v10061_v12 }
 0x2e2   :  { %v8133_v17 = vpop.eup %8132  ;;  %8142 = vrcp.f32 %v2786_v53  ;;  %v6039_v7 = vmul.f32 -1.442695, %v10064_v10  ;;  %v7110_v5 = vpop.f32.mrb[76].mxu0 }
 0x2e3   :  { %v8135_v19 = vpop.eup %8134  ;;  %v2789_v44 = vadd.f32 1.0, %v8133_v17  ;;  %8144 = vpow2.f32 %v6040_v16  ;;  %v10069_v3 = vadd.f32 %v7110_v5, %v10034_v30  ;;  %v2315_v0 = vpop.f32.mrb[77].mxu0 }
 0x2e4   :  { %v2788_v6 = vadd.f32 1.0, %v8135_v19  ;;  %8146 = vpow2.f32 %v6039_v7  ;;  %v10072_v42 = vadd.f32 %v10034_v30, %v2315_v0 }
 0x2e5   :  { %8148 = vrcp.f32 %v2789_v44  ;;  %v6042_v18 = vmul.f32 -1.442695, %v10069_v3 }
 0x2e6   :  { %v8137_v25 = vpop.eup %8136  ;;  %8150 = vrcp.f32 %v2788_v6  ;;  %v6041_v21 = vmul.f32 -1.442695, %v10072_v42  ;;  %v7113_v58 = vpop.f32.mrb[78].mxu0  ;;  %v4080_v6 = vld [vmem:[%s11565_s9 + $0x10] sm:$0xff] }
 0x2e7   :  { %v8139_v26 = vpop.eup %8138  ;;  %v2791_v49 = vadd.f32 1.0, %v8137_v25  ;;  %8152 = vpow2.f32 %v6042_v18  ;;  %v10077_v29 = vadd.f32 %v7113_v58, %v10034_v30  ;;  %v2325_v46 = vpop.f32.mrb[79].mxu0  ;;  %v4081_v18 = vld [vmem:[%s11565_s9 + $0x18] sm:$0xff] }
 0x2e8   :  { %v2790_v37 = vadd.f32 1.0, %v8139_v26  ;;  %8154 = vpow2.f32 %v6041_v21  ;;  %v10080_v24 = vadd.f32 %v10034_v30, %v2325_v46  ;;  %v7580_v25 = vpack.c.bf16 %v4081_v18, %v4080_v6 }
 0x2e9   :  { %8156 = vrcp.f32 %v2791_v49  ;;  %v6044_v40 = vmul.f32 -1.442695, %v10077_v29 }
 0x2ea   :  { %8158 = vrcp.f32 %v2790_v37  ;;  %v6043_v39 = vmul.f32 -1.442695, %v10080_v24  ;;  %v7116_v33 = vpop.f32.mrb[80].mxu0 }
 0x2eb   :  { %v8141_v9 = vpop.eup %8140  ;;  %8160 = vpow2.f32 %v6044_v40  ;;  %v10085_v50 = vadd.f32 %v7116_v33, %v10034_v30  ;;  %v2335_v27 = vpop.f32.mrb[81].mxu0 }
 0x2ec   :  { %v8143_v57 = vpop.eup %8142  ;;  %8162 = vpow2.f32 %v6043_v39  ;;  %v10088_v56 = vadd.f32 %v10034_v30, %v2335_v27  ;;  %v2979_v43 = vmul.f32 %v8141_v9, %v10037_v48 }
 0x2ed   :  { %v8145_v38 = vpop.eup %8144  ;;  %v2978_v36 = vmul.f32 %v8143_v57, %v10040_v52  ;;  %v6046_v55 = vmul.f32 -1.442695, %v10085_v50 }
 0x2ee   :  { %v8147_v41 = vpop.eup %8146  ;;  %v2793_v45 = vadd.f32 1.0, %v8145_v38  ;;  %v6045_v4 = vmul.f32 -1.442695, %v10088_v56  ;;  %v7119_v28 = vpop.f32.mrb[82].mxu0 }
 0x2ef   :  { %v8149_v32 = vpop.eup %8148  ;;  %v2792_v34 = vadd.f32 1.0, %v8147_v41  ;;  %8164 = vpow2.f32 %v6046_v55  ;;  %v10095_v13 = vadd.f32 %v7119_v28, %v10034_v30  ;;  %v2345_v54 = vpop.f32.mrb[83].mxu0  ;;  %7200 = vmatprep.mubr.msk.f32.mxu1 %vm2016_vm1, %v2978_v36 }
 0x2f0   :  { %v8151_v60 = vpop.eup %8150  ;;  %8166 = vrcp.f32 %v2793_v45  ;;  %v10099_v52 = vadd.f32 %v10034_v30, %v2345_v54  ;;  %7201 = vmatmul.mubr.msk.f32.vlgmr.msra.gmra.mrb[60].mxu1 %vm2016_vm1, %v2979_v43  ;;  %v2981_v59 = vmul.f32 %v8149_v32, %v10045_v2  ;;  %v4078_v2 = vld [vmem:[%s11565_s9] sm:$0xff] }
 0x2f1   :  { %v8153_v48 = vpop.eup %8152  ;;  %v2980_v23 = vmul.f32 %v8151_v60, %v10048_v22  ;;  %8168 = vrcp.f32 %v2792_v34  ;;  %v6048_v1 = vmul.f32 -1.442695, %v10095_v13  ;;  %v7576_v7 = vpack.c.bf16 %v4079_v15, %v4078_v2 }
 0x2f2   :  { %v8155_v51 = vpop.eup %8154  ;;  %v2795_v61 = vadd.f32 1.0, %v8153_v48  ;;  %8170 = vpow2.f32 %v6045_v4  ;;  %v6047_v20 = vmul.f32 -1.442695, %v10099_v52  ;;  %v7122_v11 = vpop.f32.mrb[84].mxu0 }
 0x2f3   :  { %v8157_v8 = vpop.eup %8156  ;;  %v2794_v63 = vadd.f32 1.0, %v8155_v51  ;;  %8172 = vpow2.f32 %v6048_v1  ;;  %v10107_v31 = vadd.f32 %v7122_v11, %v10034_v30  ;;  %v2355_v35 = vpop.f32.mrb[85].mxu0  ;;  %7203 = vmatprep.mubr.msk.f32.mxu1 %vm2016_vm1, %v2980_v23  ;;  %7577 = vmatprep.subr.bf16.mxu0 %v7576_v7 }
 0x2f4   :  { %v8159_v22 = vpop.eup %8158  ;;  %8174 = vrcp.f32 %v2795_v61  ;;  %v10111_v47 = vadd.f32 %v10034_v30, %v2355_v35  ;;  %7204 = vmatmul.mubr.msk.f32.gmra.mrb[62].mxu1 %vm2016_vm1, %v2981_v59  ;;  %v2983_v19 = vmul.f32 %v8157_v8, %v10053_v62  ;;  %7579 = vmatpush3.bf16.msra.mxu0 %v7576_v7 }
 0x2f5   :  { %v8161_v53 = vpop.eup %8160  ;;  %v2982_v16 = vmul.f32 %v8159_v22, %v10056_v14  ;;  %8176 = vrcp.f32 %v2794_v63  ;;  %v6050_v17 = vmul.f32 -1.442695, %v10107_v31  ;;  %7581 = vmatprep.subr.bf16.mxu0 %v7580_v25 }
 0x2f6   :  { %v8163_v5 = vpop.eup %8162  ;;  %v2797_v44 = vadd.f32 1.0, %v8161_v53  ;;  %8178 = vpow2.f32 %v6047_v20  ;;  %v6049_v0 = vmul.f32 -1.442695, %v10111_v47 }
 0x2f7   :  { %v2796_v14 = vadd.f32 1.0, %v8163_v5  ;;  %8180 = vpow2.f32 %v6050_v17  ;;  %7206 = vmatprep.mubr.msk.f32.mxu1 %vm2016_vm1, %v2982_v16 }
 0x2f8   :  { %8182 = vrcp.f32 %v2797_v44  ;;  %v7125_v62 = vpop.f32.mrb[86].mxu0  ;;  %7207 = vmatmul.mubr.msk.f32.gmra.mrb[64].mxu1 %vm2016_vm1, %v2983_v19  ;;  %7583 = vmatpush3.bf16.msra.mxu0 %v7580_v25 }
 0x2f9   :  { %v8165_v21 = vpop.eup %8164  ;;  %8184 = vrcp.f32 %v2796_v14  ;;  %v10133_v58 = vadd.f32 %v7125_v62, %v10034_v30  ;;  %v2365_v26 = vpop.f32.mrb[87].mxu0 }
 0x2fa   :  { %v8167_v49 = vpop.eup %8166  ;;  %v2799_v46 = vadd.f32 1.0, %v8165_v21  ;;  %8186 = vpow2.f32 %v6049_v0  ;;  %v10136_v37 = vadd.f32 %v10034_v30, %v2365_v26 }
 0x2fb   :  { %v8169_v40 = vpop.eup %8168  ;;  %v6052_v39 = vmul.f32 -1.442695, %v10133_v58  ;;  %v2985_v36 = vmul.f32 %v8167_v49, %v10061_v12 }
 0x2fc   :  { %v8171_v33 = vpop.eup %8170  ;;  %v2984_v9 = vmul.f32 %v8169_v40, %v10064_v10  ;;  %8188 = vrcp.f32 %v2799_v46  ;;  %v6051_v27 = vmul.f32 -1.442695, %v10136_v37  ;;  %v7128_v57 = vpop.f32.mrb[88].mxu0 }
 0x2fd   :  { %v8173_v38 = vpop.eup %8172  ;;  %v2798_v55 = vadd.f32 1.0, %v8171_v33  ;;  %8190 = vpow2.f32 %v6052_v39  ;;  %v10143_v41 = vadd.f32 %v7128_v57, %v10034_v30  ;;  %v2375_v43 = vpop.f32.mrb[89].mxu0 }
 0x2fe   :  { %v8175_v45 = vpop.eup %8174  ;;  %v2801_v4 = vadd.f32 1.0, %v8173_v38  ;;  %8192 = vpow2.f32 %v6051_v27  ;;  %v10146_v28 = vadd.f32 %v10034_v30, %v2375_v43  ;;  %7209 = vmatprep.mubr.msk.f32.mxu1 %vm2016_vm1, %v2984_v9 }
 0x2ff   :  { %v8177_v10 = vpop.eup %8176  ;;  %8194 = vrcp.f32 %v2798_v55  ;;  %v6054_v32 = vmul.f32 -1.442695, %v10143_v41  ;;  %7210 = vmatmul.mubr.msk.f32.gmra.mrb[66].mxu1 %vm2016_vm1, %v2985_v36  ;;  %v2987_v23 = vmul.f32 %v8175_v45, %v10069_v3 }
 0x300   :  { %v8179_v12 = vpop.eup %8178  ;;  %v2986_v34 = vmul.f32 %v8177_v10, %v10072_v42  ;;  %8196 = vrcp.f32 %v2801_v4  ;;  %v6053_v54 = vmul.f32 -1.442695, %v10146_v28  ;;  %v7131_v60 = vpop.f32.mrb[90].mxu0 }
 0x301   :  { %v8181_v48 = vpop.eup %8180  ;;  %v2800_v1 = vadd.f32 1.0, %v8179_v12  ;;  %8198 = vpow2.f32 %v6054_v32  ;;  %v10155_v51 = vadd.f32 %v7131_v60, %v10034_v30  ;;  %v2385_v59 = vpop.f32.mrb[91].mxu0 }
 0x302   :  { %v8183_v61 = vpop.eup %8182  ;;  %v2803_v20 = vadd.f32 1.0, %v8181_v48  ;;  %8200 = vpow2.f32 %v6053_v54  ;;  %v10158_v11 = vadd.f32 %v10034_v30, %v2385_v59  ;;  %7212 = vmatprep.mubr.msk.f32.mxu1 %vm2016_vm1, %v2986_v34 }
 0x303   :  { %v8185_v42 = vpop.eup %8184  ;;  %8202 = vrcp.f32 %v2800_v1  ;;  %v6056_v8 = vmul.f32 -1.442695, %v10155_v51  ;;  %7213 = vmatmul.mubr.msk.f32.gmra.mrb[68].mxu1 %vm2016_vm1, %v2987_v23  ;;  %v2989_v2 = vmul.f32 %v8183_v61, %v10077_v29 }
 0x304   :  { %v8187_v3 = vpop.eup %8186  ;;  %v2988_v63 = vmul.f32 %v8185_v42, %v10080_v24  ;;  %8204 = vrcp.f32 %v2803_v20  ;;  %v6055_v35 = vmul.f32 -1.442695, %v10158_v11  ;;  %v7134_v22 = vpop.f32.mrb[92].mxu0 }
 0x305   :  { %v2802_v15 = vadd.f32 1.0, %v8187_v3  ;;  %8206 = vpow2.f32 %v6056_v8  ;;  %v10167_v53 = vadd.f32 %v7134_v22, %v10034_v30  ;;  %v2395_v16 = vpop.f32.mrb[93].mxu0 }
 0x306   :  { %v8189_v17 = vpop.eup %8188  ;;  %8208 = vpow2.f32 %v6055_v35  ;;  %v10170_v7 = vadd.f32 %v10034_v30, %v2395_v16  ;;  %7215 = vmatprep.mubr.msk.f32.mxu1 %vm2016_vm1, %v2988_v63 }
 0x307   :  { %v8191_v24 = vpop.eup %8190  ;;  %8210 = vrcp.f32 %v2802_v15  ;;  %v6058_v5 = vmul.f32 -1.442695, %v10167_v53  ;;  %7216 = vmatmul.mubr.msk.f32.gmra.mrb[70].mxu1 %vm2016_vm1, %v2989_v2  ;;  %v2991_v46 = vmul.f32 %v8189_v17, %v10085_v50 }
 0x308   :  { %v8193_v29 = vpop.eup %8192  ;;  %v2805_v19 = vadd.f32 1.0, %v8191_v24  ;;  %v6057_v44 = vmul.f32 -1.442695, %v10170_v7  ;;  %v7137_v0 = vpop.f32.mrb[94].mxu0 }
 0x309   :  { %v8195_v6 = vpop.eup %8194  ;;  %v2804_v18 = vadd.f32 1.0, %v8193_v29  ;;  %8212 = vpow2.f32 %v6058_v5  ;;  %v10177_v14 = vadd.f32 %v7137_v0, %v10034_v30  ;;  %v2405_v25 = vpop.f32.mrb[95].mxu0 }
 0x30a   :  { %v8197_v62 = vpop.eup %8196  ;;  %v2990_v21 = vmul.f32 %v8195_v6, %v10088_v56  ;;  %8214 = vrcp.f32 %v2805_v19  ;;  %v10181_v26 = vadd.f32 %v10034_v30, %v2405_v25 }
 0x30b   :  { %v8199_v49 = vpop.eup %8198  ;;  %8216 = vrcp.f32 %v2804_v18  ;;  %v6060_v40 = vmul.f32 -1.442695, %v10177_v14  ;;  %v2993_v4 = vmul.f32 %v8197_v62, %v10095_v13 }
 0x30c   :  { %v8201_v39 = vpop.eup %8200  ;;  %v2807_v33 = vadd.f32 1.0, %v8199_v49  ;;  %8218 = vpow2.f32 %v6057_v44  ;;  %v6059_v9 = vmul.f32 -1.442695, %v10181_v26  ;;  %v7140_v27 = vpop.f32.mrb[96].mxu0  ;;  %7218 = vmatprep.mubr.msk.f32.mxu1 %vm2016_vm1, %v2990_v21 }
 0x30d   :  { %v8203_v57 = vpop.eup %8202  ;;  %v2806_v56 = vadd.f32 1.0, %v8201_v39  ;;  %8220 = vpow2.f32 %v6060_v40  ;;  %v10188_v38 = vadd.f32 %v7140_v27, %v10034_v30  ;;  %v2415_v36 = vpop.f32.mrb[97].mxu0  ;;  %7219 = vmatmul.mubr.msk.f32.gmra.mrb[72].mxu1 %vm2016_vm1, %v2991_v46 }
 0x30e   :  { %v8205_v50 = vpop.eup %8204  ;;  %v2992_v55 = vmul.f32 %v8203_v57, %v10099_v52  ;;  %8222 = vrcp.f32 %v2807_v33  ;;  %v10193_v43 = vadd.f32 %v10034_v30, %v2415_v36 }
 0x30f   :  { %v8207_v45 = vpop.eup %8206  ;;  %8224 = vrcp.f32 %v2806_v56  ;;  %v6062_v10 = vmul.f32 -1.442695, %v10188_v38  ;;  %v2995_v59 = vmul.f32 %v8205_v50, %v10107_v31 }
 0x310   :  { %v8209_v32 = vpop.eup %8208  ;;  %v2809_v12 = vadd.f32 1.0, %v8207_v45  ;;  %8226 = vpow2.f32 %v6059_v9  ;;  %v6061_v34 = vmul.f32 -1.442695, %v10193_v43  ;;  %7221 = vmatprep.mubr.msk.f32.mxu1 %vm2016_vm1, %v2992_v55 }
 0x311   :  { %v8211_v54 = vpop.eup %8210  ;;  %v2808_v60 = vadd.f32 1.0, %v8209_v32  ;;  %8228 = vpow2.f32 %v6062_v10  ;;  %v7143_v52 = vpop.f32.mrb[98].mxu0  ;;  %7222 = vmatmul.mubr.msk.f32.gmra.mrb[74].mxu1 %vm2016_vm1, %v2993_v4 }
 0x312   :  { %v2994_v48 = vmul.f32 %v8211_v54, %v10111_v47  ;;  %8230 = vrcp.f32 %v2809_v12  ;;  %v10202_v13 = vadd.f32 %v7143_v52, %v10034_v30  ;;  %v2425_v23 = vpop.f32.mrb[99].mxu0 }
 0x313   :  { %v8213_v1 = vpop.eup %8212  ;;  %8232 = vrcp.f32 %v2808_v60  ;;  %v10206_v61 = vadd.f32 %v10034_v30, %v2425_v23 }
 0x314   :  { %v8215_v20 = vpop.eup %8214  ;;  %v2811_v42 = vadd.f32 1.0, %v8213_v1  ;;  %8234 = vpow2.f32 %v6061_v34  ;;  %v6064_v8 = vmul.f32 -1.442695, %v10202_v13  ;;  %7224 = vmatprep.mubr.msk.f32.mxu1 %vm2016_vm1, %v2994_v48 }
 0x315   :  { %v8217_v47 = vpop.eup %8216  ;;  %v6063_v3 = vmul.f32 -1.442695, %v10206_v61  ;;  %v7146_v63 = vpop.f32.mrb[100].mxu0  ;;  %7225 = vmatmul.mubr.msk.f32.gmra.mrb[76].mxu1 %vm2016_vm1, %v2995_v59  ;;  %v2997_v16 = vmul.f32 %v8215_v20, %v10133_v58 }
 0x316   :  { %v8219_v35 = vpop.eup %8218  ;;  %v2996_v31 = vmul.f32 %v8217_v47, %v10136_v37  ;;  %8236 = vrcp.f32 %v2811_v42  ;;  %v10214_v22 = vadd.f32 %v7146_v63, %v10034_v30  ;;  %v2435_v2 = vpop.f32.mrb[101].mxu0 }
 0x317   :  { %v8221_v15 = vpop.eup %8220  ;;  %v2810_v17 = vadd.f32 1.0, %v8219_v35  ;;  %8238 = vpow2.f32 %v6064_v8  ;;  %v10218_v24 = vadd.f32 %v10034_v30, %v2435_v2 }
 0x318   :  { %v8223_v5 = vpop.eup %8222  ;;  %v2813_v29 = vadd.f32 1.0, %v8221_v15  ;;  %8240 = vpow2.f32 %v6063_v3  ;;  %v6066_v19 = vmul.f32 -1.442695, %v10214_v22  ;;  %7227 = vmatprep.mubr.msk.f32.mxu1 %vm2016_vm1, %v2996_v31 }
 0x319   :  { %v8225_v37 = vpop.eup %8224  ;;  %8242 = vrcp.f32 %v2810_v17  ;;  %v6065_v44 = vmul.f32 -1.442695, %v10218_v24  ;;  %v7149_v0 = vpop.f32.mrb[102].mxu0  ;;  %7228 = vmatmul.mubr.msk.f32.gmra.mrb[78].mxu1 %vm2016_vm1, %v2997_v16  ;;  %v2999_v21 = vmul.f32 %v8223_v5, %v10143_v41 }
 0x31a   :  { %v8227_v58 = vpop.eup %8226  ;;  %v2998_v6 = vmul.f32 %v8225_v37, %v10146_v28  ;;  %8244 = vrcp.f32 %v2813_v29  ;;  %v10226_v18 = vadd.f32 %v7149_v0, %v10034_v30  ;;  %v2445_v25 = vpop.f32.mrb[103].mxu0 }
 0x31b   :  { %v8229_v62 = vpop.eup %8228  ;;  %v2812_v49 = vadd.f32 1.0, %v8227_v58  ;;  %8246 = vpow2.f32 %v6066_v19  ;;  %v10230_v46 = vadd.f32 %v10034_v30, %v2445_v25 }
 0x31c   :  { %v8231_v40 = vpop.eup %8230  ;;  %v2815_v39 = vadd.f32 1.0, %v8229_v62  ;;  %8248 = vpow2.f32 %v6065_v44  ;;  %v6068_v33 = vmul.f32 -1.442695, %v10226_v18  ;;  %7230 = vmatprep.mubr.msk.f32.mxu1 %vm2016_vm1, %v2998_v6 }
 0x31d   :  { %v8233_v28 = vpop.eup %8232  ;;  %8250 = vrcp.f32 %v2812_v49  ;;  %v6067_v9 = vmul.f32 -1.442695, %v10230_v46  ;;  %v7152_v27 = vpop.f32.mrb[104].mxu0  ;;  %7231 = vmatmul.mubr.msk.f32.gmra.mrb[80].mxu1 %vm2016_vm1, %v2999_v21  ;;  %v3001_v50 = vmul.f32 %v8231_v40, %v10155_v51 }
 0x31e   :  { %v8235_v41 = vpop.eup %8234  ;;  %v3000_v57 = vmul.f32 %v8233_v28, %v10158_v11  ;;  %8252 = vrcp.f32 %v2815_v39  ;;  %v10238_v56 = vadd.f32 %v7152_v27, %v10034_v30  ;;  %v2455_v36 = vpop.f32.mrb[105].mxu0 }
 0x31f   :  { %v2814_v55 = vadd.f32 1.0, %v8235_v41  ;;  %8254 = vpow2.f32 %v6068_v33  ;;  %v10242_v45 = vadd.f32 %v10034_v30, %v2455_v36 }
 0x320   :  { %v8237_v4 = vpop.eup %8236  ;;  %8256 = vpow2.f32 %v6067_v9  ;;  %v6070_v10 = vmul.f32 -1.442695, %v10238_v56  ;;  %7233 = vmatprep.mubr.msk.f32.mxu1 %vm2016_vm1, %v3000_v57 }
 0x321   :  { %v8239_v32 = vpop.eup %8238  ;;  %8258 = vrcp.f32 %v2814_v55  ;;  %v6069_v11 = vmul.f32 -1.442695, %v10242_v45  ;;  %v7155_v12 = vpop.f32.mrb[106].mxu0  ;;  %7234 = vmatmul.mubr.msk.f32.gmra.mrb[82].mxu1 %vm2016_vm1, %v3001_v50  ;;  %v3003_v8 = vmul.f32 %v8237_v4, %v10167_v53 }
 0x322   :  { %v8241_v34 = vpop.eup %8240  ;;  %v2817_v51 = vadd.f32 1.0, %v8239_v32  ;;  %8260 = vpow2.f32 %v6070_v10  ;;  %v10249_v54 = vadd.f32 %v7155_v12, %v10034_v30  ;;  %v2465_v60 = vpop.f32.mrb[107].mxu0 }
 0x323   :  { %v8243_v52 = vpop.eup %8242  ;;  %v2816_v48 = vadd.f32 1.0, %v8241_v34  ;;  %8262 = vpow2.f32 %v6069_v11  ;;  %v10252_v23 = vadd.f32 %v10034_v30, %v2465_v60 }
 0x324   :  { %v8245_v1 = vpop.eup %8244  ;;  %v3002_v59 = vmul.f32 %v8243_v52, %v10170_v7  ;;  %8264 = vrcp.f32 %v2817_v51  ;;  %v6072_v20 = vmul.f32 -1.442695, %v10249_v54 }
 0x325   :  { %v8247_v42 = vpop.eup %8246  ;;  %8266 = vrcp.f32 %v2816_v48  ;;  %v6071_v47 = vmul.f32 -1.442695, %v10252_v23  ;;  %v7158_v3 = vpop.f32.mrb[108].mxu0  ;;  %v3005_v19 = vmul.f32 %v8245_v1, %v10177_v14 }
 0x326   :  { %v8249_v63 = vpop.eup %8248  ;;  %v2819_v35 = vadd.f32 1.0, %v8247_v42  ;;  %8268 = vpow2.f32 %v6072_v20  ;;  %v10259_v31 = vadd.f32 %v7158_v3, %v10034_v30  ;;  %7236 = vmatprep.mubr.msk.f32.mxu1 %vm2016_vm1, %v3002_v59  ;;  %v2475_v2 = vpop.f32.mrb[109].mxu0 }
 0x327   :  { %v8251_v7 = vpop.eup %8250  ;;  %v2818_v15 = vadd.f32 1.0, %v8249_v63  ;;  %8270 = vpow2.f32 %v6071_v47  ;;  %v10263_v16 = vadd.f32 %v10034_v30, %v2475_v2  ;;  %7237 = vmatmul.mubr.msk.f32.gmra.mrb[84].mxu1 %vm2016_vm1, %v3003_v8 }
 0x328   :  { %v8253_v53 = vpop.eup %8252  ;;  %v3004_v17 = vmul.f32 %v8251_v7, %v10181_v26  ;;  %8272 = vrcp.f32 %v2819_v35  ;;  %v6074_v5 = vmul.f32 -1.442695, %v10259_v31 }
 0x329   :  { %v8255_v29 = vpop.eup %8254  ;;  %8274 = vrcp.f32 %v2818_v15  ;;  %v6073_v37 = vmul.f32 -1.442695, %v10263_v16  ;;  %v3007_v39 = vmul.f32 %v8253_v53, %v10188_v38 }
 0x32a   :  { %v8257_v44 = vpop.eup %8256  ;;  %v2821_v0 = vadd.f32 1.0, %v8255_v29  ;;  %8276 = vpow2.f32 %v6074_v5  ;;  %v7161_v58 = vpop.f32.mrb[110].mxu0  ;;  %7239 = vmatprep.mubr.msk.f32.mxu1 %vm2016_vm1, %v3004_v17 }
 0x32b   :  { %v8259_v6 = vpop.eup %8258  ;;  %v2820_v25 = vadd.f32 1.0, %v8257_v44  ;;  %8278 = vpow2.f32 %v6073_v37  ;;  %v10272_v26 = vadd.f32 %v7161_v58, %v10034_v30  ;;  %v2485_v62 = vpop.f32.mrb[111].mxu0  ;;  %7240 = vmatmul.mubr.msk.f32.gmra.mrb[86].mxu1 %vm2016_vm1, %v3005_v19 }
 0x32c   :  { %v8261_v21 = vpop.eup %8260  ;;  %v3006_v14 = vmul.f32 %v8259_v6, %v10193_v43  ;;  %8280 = vrcp.f32 %v2821_v0  ;;  %v10277_v49 = vadd.f32 %v10034_v30, %v2485_v62 }
 0x32d   :  { %v8263_v40 = vpop.eup %8262  ;;  %8282 = vrcp.f32 %v2820_v25  ;;  %v2823_v33 = vadd.f32 1.0, %v8261_v21  ;;  %v6076_v28 = vmul.f32 -1.442695, %v10272_v26 }
 0x32e   :  { %v8265_v9 = vpop.eup %8264  ;;  %v2822_v27 = vadd.f32 1.0, %v8263_v40  ;;  %v6075_v41 = vmul.f32 -1.442695, %v10277_v49  ;;  %v7164_v57 = vpop.f32.mrb[112].mxu0  ;;  %7242 = vmatprep.mubr.msk.f32.mxu1 %vm2016_vm1, %v3006_v14 }
 0x32f   :  { %v8267_v36 = vpop.eup %8266  ;;  %8284 = vrcp.f32 %v2823_v33  ;;  %v10284_v43 = vadd.f32 %v7164_v57, %v10034_v30  ;;  %v2495_v50 = vpop.f32.mrb[113].mxu0  ;;  %7243 = vmatmul.mubr.msk.f32.gmra.mrb[88].mxu1 %vm2016_vm1, %v3007_v39  ;;  %v3009_v32 = vmul.f32 %v8265_v9, %v10202_v13 }
 0x330   :  { %v8269_v38 = vpop.eup %8268  ;;  %v3008_v55 = vmul.f32 %v8267_v36, %v10206_v61  ;;  %8286 = vrcp.f32 %v2822_v27  ;;  %v10289_v4 = vadd.f32 %v10034_v30, %v2495_v50 }
 0x331   :  { %v8271_v10 = vpop.eup %8270  ;;  %v2825_v11 = vadd.f32 1.0, %v8269_v38  ;;  %8288 = vpow2.f32 %v6076_v28  ;;  %v6078_v12 = vmul.f32 -1.442695, %v10284_v43 }
 0x332   :  { %v8273_v34 = vpop.eup %8272  ;;  %v2824_v51 = vadd.f32 1.0, %v8271_v10  ;;  %8290 = vpow2.f32 %v6075_v41  ;;  %v6077_v60 = vmul.f32 -1.442695, %v10289_v4  ;;  %v7167_v52 = vpop.f32.mrb[114].mxu0  ;;  %7245 = vmatprep.mubr.msk.f32.mxu1 %vm2016_vm1, %v3008_v55 }
 0x333   :  { %v8275_v61 = vpop.eup %8274  ;;  %8292 = vrcp.f32 %v2825_v11  ;;  %v10296_v48 = vadd.f32 %v7167_v52, %v10034_v30  ;;  %v2505_v1 = vpop.f32.mrb[115].mxu0  ;;  %7246 = vmatmul.mubr.msk.f32.gmra.mrb[90].mxu1 %vm2016_vm1, %v3009_v32  ;;  %v3011_v8 = vmul.f32 %v8273_v34, %v10214_v22 }
 0x334   :  { %v8277_v13 = vpop.eup %8276  ;;  %v3010_v59 = vmul.f32 %v8275_v61, %v10218_v24  ;;  %8294 = vrcp.f32 %v2824_v51  ;;  %v10301_v20 = vadd.f32 %v10034_v30, %v2505_v1 }
 0x335   :  { %v8279_v42 = vpop.eup %8278  ;;  %v2827_v47 = vadd.f32 1.0, %v8277_v13  ;;  %8296 = vpow2.f32 %v6078_v12  ;;  %v6080_v3 = vmul.f32 -1.442695, %v10296_v48 }
 0x336   :  { %v8281_v63 = vpop.eup %8280  ;;  %v2826_v35 = vadd.f32 1.0, %v8279_v42  ;;  %8298 = vpow2.f32 %v6077_v60  ;;  %v6079_v2 = vmul.f32 -1.442695, %v10301_v20  ;;  %v7170_v7 = vpop.f32.mrb[116].mxu0  ;;  %7248 = vmatprep.mubr.msk.f32.mxu1 %vm2016_vm1, %v3010_v59 }
 0x337   :  { %v8283_v24 = vpop.eup %8282  ;;  %8300 = vrcp.f32 %v2827_v47  ;;  %v10308_v15 = vadd.f32 %v7170_v7, %v10034_v30  ;;  %v2515_v53 = vpop.f32.mrb[117].mxu0  ;;  %7249 = vmatmul.mubr.msk.f32.gmra.mrb[92].mxu1 %vm2016_vm1, %v3011_v8  ;;  %v3013_v29 = vmul.f32 %v8281_v63, %v10226_v18 }
 0x338   :  { %v3012_v22 = vmul.f32 %v8283_v24, %v10230_v46  ;;  %8302 = vrcp.f32 %v2826_v35  ;;  %v10313_v17 = vadd.f32 %v10034_v30, %v2515_v53 }
 0x339   :  { %v8285_v5 = vpop.eup %8284  ;;  %8304 = vpow2.f32 %v6080_v3  ;;  %v6082_v19 = vmul.f32 -1.442695, %v10308_v15 }
 0x33a   :  { %v8287_v37 = vpop.eup %8286  ;;  %8306 = vpow2.f32 %v6079_v2  ;;  %v6081_v44 = vmul.f32 -1.442695, %v10313_v17  ;;  %v7173_v0 = vpop.f32.mrb[118].mxu0  ;;  %7251 = vmatprep.mubr.msk.f32.mxu1 %vm2016_vm1, %v3012_v22  ;;  %v3015_v40 = vmul.f32 %v8285_v5, %v10238_v56  ;;  %v8898_v22 = vld [vmem:[%s11564_s6] ss:$0 sm:$0xff] }
 0x33b   :  { %v8289_v58 = vpop.eup %8288  ;;  %v3014_v46 = vmul.f32 %v8287_v37, %v10242_v45  ;;  %8308 = vpow2.f32 %v6082_v19  ;;  %v10321_v6 = vadd.f32 %v7173_v0, %v10034_v30  ;;  %v2525_v25 = vpop.f32.mrb[119].mxu0  ;;  %7252 = vmatmul.mubr.msk.f32.gmra.mrb[94].mxu1 %vm2016_vm1, %v3013_v29 }
 0x33c   :  { %v8291_v18 = vpop.eup %8290  ;;  %v2829_v62 = vadd.f32 1.0, %v8289_v58  ;;  %8310 = vpow2.f32 %v6081_v44  ;;  %v10325_v21 = vadd.f32 %v10034_v30, %v2525_v25 }
 0x33d   :  { %v8293_v14 = vpop.eup %8292  ;;  %v2828_v39 = vadd.f32 1.0, %v8291_v18  ;;  %v6084_v33 = vmul.f32 -1.442695, %v10321_v6  ;;  %7254 = vmatprep.mubr.msk.f32.mxu1 %vm2016_vm1, %v3014_v46 }
 0x33e   :  { %v8295_v45 = vpop.eup %8294  ;;  %8312 = vrcp.f32 %v2829_v62  ;;  %v6083_v28 = vmul.f32 -1.442695, %v10325_v21  ;;  %v7176_v9 = vpop.f32.mrb[120].mxu0  ;;  %v3017_v10 = vmul.f32 %v8293_v14, %v10249_v54 }
 0x33f   :  { %v8297_v27 = vpop.eup %8296  ;;  %v3016_v41 = vmul.f32 %v8295_v45, %v10252_v23  ;;  %8314 = vrcp.f32 %v2828_v39  ;;  %v10333_v57 = vadd.f32 %v7176_v9, %v10034_v30  ;;  %v2535_v36 = vpop.f32.mrb[121].mxu0  ;;  %7255 = vmatmul.mubr.msk.f32.gmra.mrb[96].mxu1 %vm2016_vm1, %v3015_v40 }
 0x340   :  { %v8299_v56 = vpop.eup %8298  ;;  %v2831_v50 = vadd.f32 1.0, %v8297_v27  ;;  %8316 = vpow2.f32 %v6084_v33  ;;  %v10337_v38 = vadd.f32 %v10034_v30, %v2535_v36 }
 0x341   :  { %v8301_v55 = vpop.eup %8300  ;;  %v2830_v32 = vadd.f32 1.0, %v8299_v56  ;;  %8318 = vpow2.f32 %v6083_v28  ;;  %v6086_v23 = vmul.f32 -1.442695, %v10333_v57  ;;  %7257 = vmatprep.mubr.msk.f32.mxu1 %vm2016_vm1, %v3016_v41 }
 0x342   :  { %v8303_v11 = vpop.eup %8302  ;;  %8320 = vrcp.f32 %v2831_v50  ;;  %v6085_v12 = vmul.f32 -1.442695, %v10337_v38  ;;  %v3019_v59 = vmul.f32 %v8301_v55, %v10259_v31 }
 0x343   :  { %v8305_v34 = vpop.eup %8304  ;;  %v3018_v51 = vmul.f32 %v8303_v11, %v10263_v16  ;;  %8322 = vrcp.f32 %v2830_v32  ;;  %v7179_v60 = vpop.f32.mrb[122].mxu0  ;;  %7258 = vmatmul.mubr.msk.f32.gmra.mrb[98].mxu1 %vm2016_vm1, %v3017_v10 }
 0x344   :  { %v8307_v52 = vpop.eup %8306  ;;  %v2833_v61 = vadd.f32 1.0, %v8305_v34  ;;  %8324 = vpow2.f32 %v6086_v23  ;;  %v10346_v54 = vadd.f32 %v7179_v60, %v10034_v30  ;;  %v2545_v1 = vpop.f32.mrb[123].mxu0 }
 0x345   :  { %v8309_v13 = vpop.eup %8308  ;;  %v2832_v42 = vadd.f32 1.0, %v8307_v52  ;;  %8326 = vpow2.f32 %v6085_v12  ;;  %v10350_v8 = vadd.f32 %v10034_v30, %v2545_v1  ;;  %7260 = vmatprep.mubr.msk.f32.mxu1 %vm2016_vm1, %v3018_v51 }
 0x346   :  { %v8311_v16 = vpop.eup %8310  ;;  %8328 = vrcp.f32 %v2833_v61  ;;  %v2835_v47 = vadd.f32 1.0, %v8309_v13  ;;  %v6088_v3 = vmul.f32 -1.442695, %v10346_v54 }
 0x347   :  { %8330 = vrcp.f32 %v2832_v42  ;;  %v2834_v63 = vadd.f32 1.0, %v8311_v16  ;;  %v6087_v35 = vmul.f32 -1.442695, %v10350_v8  ;;  %v7182_v2 = vpop.f32.mrb[124].mxu0  ;;  %7261 = vmatmul.mubr.msk.f32.gmra.mrb[100].mxu1 %vm2016_vm1, %v3019_v59 }
 0x348   :  { %v8313_v31 = vpop.eup %8312  ;;  %8332 = vrcp.f32 %v2835_v47  ;;  %v10357_v7 = vadd.f32 %v7182_v2, %v10034_v30  ;;  %v2555_v24 = vpop.f32.mrb[125].mxu0 }
 0x349   :  { %v8315_v53 = vpop.eup %8314  ;;  %8334 = vrcp.f32 %v2834_v63  ;;  %v10362_v5 = vadd.f32 %v8898_v22, %v2555_v24  ;;  %v3021_v0 = vmul.f32 %v8313_v31, %v10272_v26 }
 0x34a   :  { %v8317_v29 = vpop.eup %8316  ;;  %v3020_v19 = vmul.f32 %v8315_v53, %v10277_v49  ;;  %8336 = vpow2.f32 %v6088_v3  ;;  %v6090_v37 = vmul.f32 -1.442695, %v10357_v7 }
 0x34b   :  { %v8319_v44 = vpop.eup %8318  ;;  %v2837_v30 = vadd.f32 1.0, %v8317_v29  ;;  %8338 = vpow2.f32 %v6087_v35  ;;  %v6089_v58 = vmul.f32 -1.442695, %v10362_v5  ;;  %v7185_v46 = vpop.f32.mrb[126].mxu0 }
 0x34c   :  { %v8321_v25 = vpop.eup %8320  ;;  %v2836_v18 = vadd.f32 1.0, %v8319_v44  ;;  %8340 = vpow2.f32 %v6090_v37  ;;  %v10368_v62 = vadd.f32 %v8898_v22, %v7185_v46  ;;  %7263 = vmatprep.mubr.msk.f32.mxu1 %vm2016_vm1, %v3020_v19  ;;  %v2565_v14 = vpop.f32.mrb[127].mxu0 }
 0x34d   :  { %v8323_v49 = vpop.eup %8322  ;;  %8342 = vrcp.f32 %v2837_v30  ;;  %v10371_v40 = vadd.f32 %v8898_v22, %v2565_v14  ;;  %7264 = vmatmul.mubr.msk.f32.gmra.mrb[102].mxu1 %vm2016_vm1, %v3021_v0  ;;  %v3023_v28 = vmul.f32 %v8321_v25, %v10284_v43 }
 0x34e   :  { %v8325_v26 = vpop.eup %8324  ;;  %v3022_v39 = vmul.f32 %v8323_v49, %v10289_v4  ;;  %8344 = vrcp.f32 %v2836_v18  ;;  %v6092_v33 = vmul.f32 -1.442695, %v10368_v62 }
 0x34f   :  { %v8327_v45 = vpop.eup %8326  ;;  %v2839_v9 = vadd.f32 1.0, %v8325_v26  ;;  %8346 = vpow2.f32 %v6089_v58  ;;  %v6091_v27 = vmul.f32 -1.442695, %v10371_v40  ;;  %v7188_v41 = vpop.f32.mrb[128].mxu0 }
 0x350   :  { %v8329_v36 = vpop.eup %8328  ;;  %v2838_v56 = vadd.f32 1.0, %v8327_v45  ;;  %8348 = vpow2.f32 %v6092_v33  ;;  %v10378_v50 = vadd.f32 %v8898_v22, %v7188_v41  ;;  %7266 = vmatprep.mubr.msk.f32.mxu1 %vm2016_vm1, %v3022_v39  ;;  %v2575_v55 = vpop.f32.mrb[129].mxu0 }
 0x351   :  { %v8331_v4 = vpop.eup %8330  ;;  %8350 = vrcp.f32 %v2839_v9  ;;  %v10381_v10 = vadd.f32 %v8898_v22, %v2575_v55  ;;  %7267 = vmatmul.mubr.msk.f32.gmra.mrb[104].mxu1 %vm2016_vm1, %v3023_v28  ;;  %v3025_v12 = vmul.f32 %v8329_v36, %v10296_v48 }
 0x352   :  { %v8333_v43 = vpop.eup %8332  ;;  %v3024_v32 = vmul.f32 %v8331_v4, %v10301_v20  ;;  %8352 = vrcp.f32 %v2838_v56  ;;  %v6094_v23 = vmul.f32 -1.442695, %v10378_v50 }
 0x353   :  { %v8335_v11 = vpop.eup %8334  ;;  %8354 = vpow2.f32 %v6091_v27  ;;  %v6093_v34 = vmul.f32 -1.442695, %v10381_v10  ;;  %v7191_v51 = vpop.f32.mrb[130].mxu0  ;;  %v3027_v47 = vmul.f32 %v8333_v43, %v10308_v15 }
 0x354   :  { %v8337_v60 = vpop.eup %8336  ;;  %v3026_v52 = vmul.f32 %v8335_v11, %v10313_v17  ;;  %8356 = vpow2.f32 %v6094_v23  ;;  %v10389_v61 = vadd.f32 %v8898_v22, %v7191_v51  ;;  %7269 = vmatprep.mubr.msk.f32.mxu1 %vm2016_vm1, %v3024_v32  ;;  %v2585_v1 = vpop.f32.mrb[131].mxu0 }
 0x355   :  { %v8339_v20 = vpop.eup %8338  ;;  %v2841_v13 = vadd.f32 1.0, %v8337_v60  ;;  %8358 = vpow2.f32 %v6093_v34  ;;  %v10392_v59 = vadd.f32 %v8898_v22, %v2585_v1  ;;  %7270 = vmatmul.mubr.msk.f32.gmra.mrb[106].mxu1 %vm2016_vm1, %v3025_v12 }
 0x356   :  { %v8341_v48 = vpop.eup %8340  ;;  %v2840_v42 = vadd.f32 1.0, %v8339_v20  ;;  %v6096_v16 = vmul.f32 -1.442695, %v10389_v61  ;;  %7272 = vmatprep.mubr.msk.f32.mxu1 %vm2016_vm1, %v3026_v52 }
 0x357   :  { %v8343_v17 = vpop.eup %8342  ;;  %8360 = vrcp.f32 %v2841_v13  ;;  %v2843_v3 = vadd.f32 1.0, %v8341_v48  ;;  %v6095_v63 = vmul.f32 -1.442695, %v10392_v59 }
 0x358   :  { %v8345_v35 = vpop.eup %8344  ;;  %8362 = vrcp.f32 %v2840_v42  ;;  %v3029_v29 = vmul.f32 %v8343_v17, %v10321_v6 }
 0x359   :  { %v8347_v2 = vpop.eup %8346  ;;  %v3028_v31 = vmul.f32 %v8345_v35, %v10325_v21  ;;  %8364 = vrcp.f32 %v2843_v3  ;;  %7273 = vmatmul.mubr.msk.f32.gmra.mrb[108].mxu1 %vm2016_vm1, %v3027_v47 }
 0x35a   :  { %v8349_v24 = vpop.eup %8348  ;;  %v2842_v53 = vadd.f32 1.0, %v8347_v2  ;;  %8366 = vpow2.f32 %v6096_v16 }
 0x35b   :  { %v8351_v22 = vpop.eup %8350  ;;  %v2845_v19 = vadd.f32 1.0, %v8349_v24  ;;  %8368 = vpow2.f32 %v6095_v63  ;;  %7275 = vmatprep.mubr.msk.f32.mxu1 %vm2016_vm1, %v3028_v31 }
 0x35c   :  { %v8353_v15 = vpop.eup %8352  ;;  %8370 = vrcp.f32 %v2842_v53  ;;  %v3031_v58 = vmul.f32 %v8351_v22, %v10333_v57 }
 0x35d   :  { %v8355_v37 = vpop.eup %8354  ;;  %v3030_v44 = vmul.f32 %v8353_v15, %v10337_v38  ;;  %7276 = vmatmul.mubr.msk.f32.gmra.mrb[110].mxu1 %vm2016_vm1, %v3029_v29  ;;  %8372 = vrcp.f32 %v2845_v19 }
 0x35e   :  { %v8357_v21 = vpop.eup %8356  ;;  %v2844_v0 = vadd.f32 1.0, %v8355_v37 }
 0x35f   :  { %v8359_v30 = vpop.eup %8358  ;;  %v2847_v46 = vadd.f32 1.0, %v8357_v21  ;;  %7278 = vmatprep.mubr.msk.f32.mxu1 %vm2016_vm1, %v3030_v44 }
 0x360   :  { %8374 = vrcp.f32 %v2844_v0  ;;  %v2846_v6 = vadd.f32 1.0, %v8359_v30 }
 0x361   :  { %v8361_v25 = vpop.eup %8360  ;;  %7279 = vmatmul.mubr.msk.f32.gmra.mrb[112].mxu1 %vm2016_vm1, %v3031_v58 }
 0x362   :  { %v8363_v18 = vpop.eup %8362  ;;  %8376 = vrcp.f32 %v2846_v6  ;;  %v3033_v26 = vmul.f32 %v8361_v25, %v10346_v54 }
 0x363   :  { %v8365_v14 = vpop.eup %8364  ;;  %v3032_v38 = vmul.f32 %v8363_v18, %v10350_v8  ;;  %8378 = vrcp.f32 %v2847_v46 }
 0x364   :  { %v8367_v49 = vpop.eup %8366  ;;  %v3035_v9 = vmul.f32 %v8365_v14, %v10357_v7 }
 0x365   :  { %v8369_v39 = vpop.eup %8368  ;;  %v2849_v57 = vadd.f32 1.0, %v8367_v49  ;;  %7281 = vmatprep.mubr.msk.f32.mxu1 %vm2016_vm1, %v3032_v38 }
 0x366   :  { %v8371_v33 = vpop.eup %8370  ;;  %v2848_v45 = vadd.f32 1.0, %v8369_v39  ;;  %7282 = vmatmul.mubr.msk.f32.gmra.mrb[114].mxu1 %vm2016_vm1, %v3033_v26 }
 0x367   :  { %v3034_v28 = vmul.f32 %v8371_v33, %v10362_v5  ;;  %8380 = vrcp.f32 %v2849_v57  ;;  %v8373_v27 = vpop.eup %8372 }
 0x368   :  { %8382 = vrcp.f32 %v2848_v45  ;;  %v3037_v36 = vmul.f32 %v8373_v27, %v10368_v62  ;;  %v10431_v62 = vld [vmem:[%s11566_s8] ss:$0 sm:$0xff] }
 0x369   :  { %7284 = vmatprep.mubr.msk.f32.mxu1 %vm2016_vm1, %v3034_v28 }
 0x36a   :  { %v8375_v8 = vpop.eup %8374  ;;  %7285 = vmatmul.mubr.msk.f32.gmra.mrb[116].mxu1 %vm2016_vm1, %v3035_v9 }
 0x36b   :  { %v3036_v54 = vmul.f32 %v8375_v8, %v10371_v40 }
 0x36c   :  { %v8377_v41 = vpop.eup %8376 }
 0x36d   :  { %v8379_v56 = vpop.eup %8378  ;;  %v3038_v55 = vmul.f32 %v8377_v41, %v10381_v10  ;;  %7287 = vmatprep.mubr.msk.f32.mxu1 %vm2016_vm1, %v3036_v54 }
 0x36e   :  { %7288 = vmatmul.mubr.msk.f32.gmra.mrb[118].mxu1 %vm2016_vm1, %v3037_v36  ;;  %v3039_v7 = vmul.f32 %v8379_v56, %v10378_v50 }
 0x36f   :  { %7290 = vmatprep.mubr.msk.f32.mxu1 %vm2016_vm1, %v3038_v55 }
 0x371   :  { %v8381_v5 = vpop.eup %8380 }
 0x372   :  { %v8383_v4 = vpop.eup %8382  ;;  %7291 = vmatmul.mubr.msk.f32.gmra.mrb[120].mxu1 %vm2016_vm1, %v3039_v7  ;;  %v3041_v43 = vmul.f32 %v8381_v5, %v10389_v61 }
 0x373   :  { %v3040_v40 = vmul.f32 %v8383_v4, %v10392_v59 }
 0x375   :  { %7293 = vmatprep.mubr.msk.f32.mxu1 %vm2016_vm1, %v3040_v40 }
 0x376   :  { %7294 = vmatmul.mubr.msk.f32.gmra.mrb[122].mxu1 %vm2016_vm1, %v3041_v43 }
 0x3c3   :  { %v7202_v10 = vpop.f32.mrb[60].mxu1 }
 0x3c4   :  { %v10434_v50 = vadd.f32 %v7202_v10, %v10431_v62  ;;  %v3311_v32 = vpop.f32.mrb[61].mxu1 }
 0x3c5   :  { %v10437_v23 = vadd.f32 %v10431_v62, %v3311_v32 }
 0x3c6   :  { %v6163_v11 = vmul.f32 -1.442695, %v10434_v50 }
 0x3c7   :  { %v6162_v12 = vmul.f32 -1.442695, %v10437_v23  ;;  %v7205_v34 = vpop.f32.mrb[62].mxu1 }
 0x3c8   :  { %8384 = vpow2.f32 %v6163_v11  ;;  %v10442_v51 = vadd.f32 %v7205_v34, %v10431_v62  ;;  %v3321_v60 = vpop.f32.mrb[63].mxu1 }
 0x3c9   :  { %8386 = vpow2.f32 %v6162_v12  ;;  %v10445_v52 = vadd.f32 %v10431_v62, %v3321_v60 }
 0x3ca   :  { %v6165_v61 = vmul.f32 -1.442695, %v10442_v51 }
 0x3cb   :  { %v6164_v1 = vmul.f32 -1.442695, %v10445_v52  ;;  %v7208_v20 = vpop.f32.mrb[64].mxu1 }
 0x3cc   :  { %8388 = vpow2.f32 %v6165_v61  ;;  %v10450_v13 = vadd.f32 %v7208_v20, %v10431_v62  ;;  %v3331_v59 = vpop.f32.mrb[65].mxu1 }
 0x3cd   :  { %8390 = vpow2.f32 %v6164_v1  ;;  %v10453_v48 = vadd.f32 %v10431_v62, %v3331_v59 }
 0x3ce   :  { %v6167_v42 = vmul.f32 -1.442695, %v10450_v13 }
 0x3cf   :  { %v6166_v16 = vmul.f32 -1.442695, %v10453_v48 }
 0x3d0   :  { %8392 = vpow2.f32 %v6167_v42 }
 0x3d1   :  { %8394 = vpow2.f32 %v6166_v16 }
 0x3d2   :  { %v8385_v17 = vpop.eup %8384  ;;  %v7211_v47 = vpop.f32.mrb[66].mxu1 }
 0x3d3   :  { %v8387_v3 = vpop.eup %8386  ;;  %v3823_v63 = vadd.f32 1.0, %v8385_v17  ;;  %v10458_v35 = vadd.f32 %v7211_v47, %v10431_v62  ;;  %v3341_v2 = vpop.f32.mrb[67].mxu1  ;;  %v5115_v47 = vld [vmem:[%s11567_s11 + $0x8] sm:$0xff] }
 0x3d4   :  { %v3822_v31 = vadd.f32 1.0, %v8387_v3  ;;  %v10461_v24 = vadd.f32 %v10431_v62, %v3341_v2 }
 0x3d5   :  { %8396 = vrcp.f32 %v3823_v63  ;;  %v6169_v53 = vmul.f32 -1.442695, %v10458_v35 }
 0x3d6   :  { %v8389_v22 = vpop.eup %8388  ;;  %8398 = vrcp.f32 %v3822_v31  ;;  %v6168_v29 = vmul.f32 -1.442695, %v10461_v24  ;;  %v7214_v19 = vpop.f32.mrb[68].mxu1 }
 0x3d7   :  { %v8391_v15 = vpop.eup %8390  ;;  %v3825_v37 = vadd.f32 1.0, %v8389_v22  ;;  %8400 = vpow2.f32 %v6169_v53  ;;  %v10466_v44 = vadd.f32 %v7214_v19, %v10431_v62  ;;  %v3351_v21 = vpop.f32.mrb[69].mxu1 }
 0x3d8   :  { %v3824_v0 = vadd.f32 1.0, %v8391_v15  ;;  %8402 = vpow2.f32 %v6168_v29  ;;  %v10469_v30 = vadd.f32 %v10431_v62, %v3351_v21 }
 0x3d9   :  { %8404 = vrcp.f32 %v3825_v37  ;;  %v6171_v58 = vmul.f32 -1.442695, %v10466_v44 }
 0x3da   :  { %v8393_v46 = vpop.eup %8392  ;;  %8406 = vrcp.f32 %v3824_v0  ;;  %v6170_v6 = vmul.f32 -1.442695, %v10469_v30  ;;  %v7217_v25 = vpop.f32.mrb[70].mxu1  ;;  %v5118_v0 = vld [vmem:[%s11567_s11 + $0x20] sm:$0xff] }
 0x3db   :  { %v8395_v18 = vpop.eup %8394  ;;  %v3827_v14 = vadd.f32 1.0, %v8393_v46  ;;  %8408 = vpow2.f32 %v6171_v58  ;;  %v10474_v38 = vadd.f32 %v7217_v25, %v10431_v62  ;;  %v3361_v49 = vpop.f32.mrb[71].mxu1  ;;  %v5119_v25 = vld [vmem:[%s11567_s11 + $0x28] sm:$0xff] }
 0x3dc   :  { %v3826_v26 = vadd.f32 1.0, %v8395_v18  ;;  %8410 = vpow2.f32 %v6170_v6  ;;  %v10477_v39 = vadd.f32 %v10431_v62, %v3361_v49  ;;  %v7592_v49 = vpack.c.bf16 %v5119_v25, %v5118_v0 }
 0x3dd   :  { %8412 = vrcp.f32 %v3827_v14  ;;  %v6173_v57 = vmul.f32 -1.442695, %v10474_v38 }
 0x3de   :  { %8414 = vrcp.f32 %v3826_v26  ;;  %v6172_v33 = vmul.f32 -1.442695, %v10477_v39 }
 0x3df   :  { %v8397_v45 = vpop.eup %8396  ;;  %8416 = vpow2.f32 %v6173_v57 }
 0x3e0   :  { %v8399_v28 = vpop.eup %8398  ;;  %8418 = vpow2.f32 %v6172_v33  ;;  %v7220_v9 = vpop.f32.mrb[72].mxu1  ;;  %v4015_v56 = vmul.f32 %v8397_v45, %v10434_v50 }
 0x3e1   :  { %v8401_v27 = vpop.eup %8400  ;;  %v4014_v8 = vmul.f32 %v8399_v28, %v10437_v23  ;;  %v10483_v54 = vadd.f32 %v7220_v9, %v10431_v62  ;;  %v3371_v41 = vpop.f32.mrb[73].mxu1 }
 0x3e2   :  { %v8403_v36 = vpop.eup %8402  ;;  %v3829_v55 = vadd.f32 1.0, %v8401_v27  ;;  %v10487_v7 = vadd.f32 %v10431_v62, %v3371_v41 }
 0x3e3   :  { %v8405_v5 = vpop.eup %8404  ;;  %v3828_v4 = vadd.f32 1.0, %v8403_v36  ;;  %v6175_v40 = vmul.f32 -1.442695, %v10483_v54  ;;  %7304 = vmatprep.mubr.msk.f32.mxu0 %vm2016_vm1, %v4014_v8 }
 0x3e4   :  { %v8407_v43 = vpop.eup %8406  ;;  %8420 = vrcp.f32 %v3829_v55  ;;  %v6174_v10 = vmul.f32 -1.442695, %v10487_v7  ;;  %v7223_v32 = vpop.f32.mrb[74].mxu1  ;;  %7305 = vmatmul.mubr.msk.f32.vlgmr.msra.gmra.mrb[132].mxu0 %vm2016_vm1, %v4015_v56  ;;  %v4017_v60 = vmul.f32 %v8405_v5, %v10442_v51  ;;  %v5114_v51 = vld [vmem:[%s11567_s11] sm:$0xff] }
 0x3e5   :  { %v8409_v23 = vpop.eup %8408  ;;  %v4016_v50 = vmul.f32 %v8407_v43, %v10445_v52  ;;  %8422 = vrcp.f32 %v3828_v4  ;;  %v10495_v11 = vadd.f32 %v7223_v32, %v10431_v62  ;;  %v3381_v12 = vpop.f32.mrb[75].mxu1  ;;  %v7584_v53 = vpack.c.bf16 %v5115_v47, %v5114_v51 }
 0x3e6   :  { %v8411_v34 = vpop.eup %8410  ;;  %v3831_v61 = vadd.f32 1.0, %v8409_v23  ;;  %8424 = vpow2.f32 %v6175_v40  ;;  %v10499_v1 = vadd.f32 %v10431_v62, %v3381_v12 }
 0x3e7   :  { %v8413_v20 = vpop.eup %8412  ;;  %v3830_v59 = vadd.f32 1.0, %v8411_v34  ;;  %8426 = vpow2.f32 %v6174_v10  ;;  %v6177_v42 = vmul.f32 -1.442695, %v10495_v11  ;;  %7307 = vmatprep.mubr.msk.f32.mxu0 %vm2016_vm1, %v4016_v50  ;;  %7585 = vmatprep.subr.bf16.mxu1 %v7584_v53 }
 0x3e8   :  { %v8415_v52 = vpop.eup %8414  ;;  %8428 = vrcp.f32 %v3831_v61  ;;  %v6176_v16 = vmul.f32 -1.442695, %v10499_v1  ;;  %v7226_v17 = vpop.f32.mrb[76].mxu1  ;;  %7308 = vmatmul.mubr.msk.f32.gmra.mrb[134].mxu0 %vm2016_vm1, %v4017_v60  ;;  %v4019_v29 = vmul.f32 %v8413_v20, %v10450_v13  ;;  %v5117_v13 = vld [vmem:[%s11567_s11 + $0x18] sm:$0xff]  ;;  %7587 = vmatpush3.bf16.msra.mxu1 %v7584_v53 }
 0x3e9   :  { %v8417_v3 = vpop.eup %8416  ;;  %v4018_v63 = vmul.f32 %v8415_v52, %v10453_v48  ;;  %8430 = vrcp.f32 %v3830_v59  ;;  %v10513_v2 = vadd.f32 %v7226_v17, %v10431_v62  ;;  %v3391_v31 = vpop.f32.mrb[77].mxu1  ;;  %v5116_v48 = vld [vmem:[%s11567_s11 + $0x10] sm:$0xff] }
 0x3ea   :  { %v8419_v22 = vpop.eup %8418  ;;  %v3833_v19 = vadd.f32 1.0, %v8417_v3  ;;  %8432 = vpow2.f32 %v6177_v42  ;;  %v10517_v15 = vadd.f32 %v10431_v62, %v3391_v31  ;;  %v7588_v6 = vpack.c.bf16 %v5117_v13, %v5116_v48 }
 0x3eb   :  { %v3832_v37 = vadd.f32 1.0, %v8419_v22  ;;  %8434 = vpow2.f32 %v6176_v16  ;;  %v6179_v21 = vmul.f32 -1.442695, %v10513_v2  ;;  %7310 = vmatprep.mubr.msk.f32.mxu0 %vm2016_vm1, %v4018_v63 }
 0x3ec   :  { %8436 = vrcp.f32 %v3833_v19  ;;  %v6178_v58 = vmul.f32 -1.442695, %v10517_v15  ;;  %v7229_v46 = vpop.f32.mrb[78].mxu1  ;;  %7311 = vmatmul.mubr.msk.f32.gmra.mrb[136].mxu0 %vm2016_vm1, %v4019_v29  ;;  %7589 = vmatprep.subr.bf16.mxu1 %v7588_v6 }
 0x3ed   :  { %8438 = vrcp.f32 %v3832_v37  ;;  %v10536_v18 = vadd.f32 %v7229_v46, %v10431_v62  ;;  %v3401_v14 = vpop.f32.mrb[79].mxu1  ;;  %7591 = vmatpush3.bf16.msra.mxu1 %v7588_v6 }
 0x3ee   :  { %v8421_v26 = vpop.eup %8420  ;;  %8440 = vpow2.f32 %v6179_v21  ;;  %v10539_v57 = vadd.f32 %v10431_v62, %v3401_v14  ;;  %7593 = vmatprep.subr.bf16.mxu1 %v7592_v49 }
 0x3ef   :  { %v8423_v33 = vpop.eup %8422  ;;  %8442 = vpow2.f32 %v6178_v58  ;;  %v6181_v45 = vmul.f32 -1.442695, %v10536_v18  ;;  %v4021_v36 = vmul.f32 %v8421_v26, %v10458_v35 }
 0x3f0   :  { %v8425_v28 = vpop.eup %8424  ;;  %v4020_v9 = vmul.f32 %v8423_v33, %v10461_v24  ;;  %v6180_v27 = vmul.f32 -1.442695, %v10539_v57  ;;  %v7232_v8 = vpop.f32.mrb[80].mxu1 }
 0x3f1   :  { %v8427_v41 = vpop.eup %8426  ;;  %v3835_v56 = vadd.f32 1.0, %v8425_v28  ;;  %8444 = vpow2.f32 %v6181_v45  ;;  %v10546_v55 = vadd.f32 %v7232_v8, %v10431_v62  ;;  %v3411_v5 = vpop.f32.mrb[81].mxu1  ;;  %7595 = vmatpush3.bf16.msra.mxu1 %v7592_v49 }
 0x3f2   :  { %v8429_v4 = vpop.eup %8428  ;;  %v3834_v40 = vadd.f32 1.0, %v8427_v41  ;;  %8446 = vpow2.f32 %v6180_v27  ;;  %v10549_v43 = vadd.f32 %v10431_v62, %v3411_v5  ;;  %7313 = vmatprep.mubr.msk.f32.mxu0 %vm2016_vm1, %v4020_v9 }
 0x3f3   :  { %v8431_v24 = vpop.eup %8430  ;;  %8448 = vrcp.f32 %v3835_v56  ;;  %v6183_v10 = vmul.f32 -1.442695, %v10546_v55  ;;  %7314 = vmatmul.mubr.msk.f32.gmra.mrb[138].mxu0 %vm2016_vm1, %v4021_v36  ;;  %v4023_v34 = vmul.f32 %v8429_v4, %v10466_v44 }
 0x3f4   :  { %v8433_v35 = vpop.eup %8432  ;;  %v4022_v32 = vmul.f32 %v8431_v24, %v10469_v30  ;;  %8450 = vrcp.f32 %v3834_v40  ;;  %v6182_v23 = vmul.f32 -1.442695, %v10549_v43  ;;  %v7235_v50 = vpop.f32.mrb[82].mxu1 }
 0x3f5   :  { %v8435_v12 = vpop.eup %8434  ;;  %v3837_v60 = vadd.f32 1.0, %v8433_v35  ;;  %8452 = vpow2.f32 %v6183_v10  ;;  %v10558_v61 = vadd.f32 %v7235_v50, %v10431_v62  ;;  %v3421_v20 = vpop.f32.mrb[83].mxu1 }
 0x3f6   :  { %v8437_v59 = vpop.eup %8436  ;;  %v3836_v42 = vadd.f32 1.0, %v8435_v12  ;;  %8454 = vpow2.f32 %v6182_v23  ;;  %v10561_v52 = vadd.f32 %v10431_v62, %v3421_v20  ;;  %7316 = vmatprep.mubr.msk.f32.mxu0 %vm2016_vm1, %v4022_v32 }
 0x3f7   :  { %v8439_v30 = vpop.eup %8438  ;;  %8456 = vrcp.f32 %v3837_v60  ;;  %v6185_v16 = vmul.f32 -1.442695, %v10558_v61  ;;  %7317 = vmatmul.mubr.msk.f32.gmra.mrb[140].mxu0 %vm2016_vm1, %v4023_v34  ;;  %v4025_v3 = vmul.f32 %v8437_v59, %v10474_v38 }
 0x3f8   :  { %v8441_v44 = vpop.eup %8440  ;;  %v4024_v17 = vmul.f32 %v8439_v30, %v10477_v39  ;;  %8458 = vrcp.f32 %v3836_v42  ;;  %v6184_v51 = vmul.f32 -1.442695, %v10561_v52 }
 0x3f9   :  { %v8443_v47 = vpop.eup %8442  ;;  %v3839_v63 = vadd.f32 1.0, %v8441_v44  ;;  %8460 = vpow2.f32 %v6185_v16 }
 0x3fa   :  { %v3838_v31 = vadd.f32 1.0, %v8443_v47  ;;  %8462 = vpow2.f32 %v6184_v51  ;;  %v7238_v53 = vpop.f32.mrb[84].mxu1  ;;  %7319 = vmatprep.mubr.msk.f32.mxu0 %vm2016_vm1, %v4024_v17 }
 0x3fb   :  { %v8445_v22 = vpop.eup %8444  ;;  %8464 = vrcp.f32 %v3839_v63  ;;  %v10571_v29 = vadd.f32 %v7238_v53, %v10431_v62  ;;  %v3431_v19 = vpop.f32.mrb[85].mxu1  ;;  %7320 = vmatmul.mubr.msk.f32.gmra.mrb[142].mxu0 %vm2016_vm1, %v4025_v3 }
 0x3fc   :  { %v8447_v39 = vpop.eup %8446  ;;  %8466 = vrcp.f32 %v3838_v31  ;;  %v3841_v37 = vadd.f32 1.0, %v8445_v22  ;;  %v10575_v38 = vadd.f32 %v10431_v62, %v3431_v19 }
 0x3fd   :  { %v8449_v21 = vpop.eup %8448  ;;  %v3840_v48 = vadd.f32 1.0, %v8447_v39  ;;  %v6187_v13 = vmul.f32 -1.442695, %v10571_v29 }
 0x3fe   :  { %v8451_v0 = vpop.eup %8450  ;;  %8468 = vrcp.f32 %v3841_v37  ;;  %v6186_v58 = vmul.f32 -1.442695, %v10575_v38  ;;  %v7241_v46 = vpop.f32.mrb[86].mxu1  ;;  %v4027_v33 = vmul.f32 %v8449_v21, %v10483_v54 }
 0x3ff   :  { %v8453_v6 = vpop.eup %8452  ;;  %v4026_v25 = vmul.f32 %v8451_v0, %v10487_v7  ;;  %8470 = vrcp.f32 %v3840_v48  ;;  %v10581_v14 = vadd.f32 %v7241_v46, %v10431_v62  ;;  %v3441_v49 = vpop.f32.mrb[87].mxu1 }
 0x400   :  { %v8455_v26 = vpop.eup %8454  ;;  %v3843_v45 = vadd.f32 1.0, %v8453_v6  ;;  %8472 = vpow2.f32 %v6187_v13  ;;  %v10585_v28 = vadd.f32 %v10431_v62, %v3441_v49 }
 0x401   :  { %v8457_v9 = vpop.eup %8456  ;;  %v3842_v27 = vadd.f32 1.0, %v8455_v26  ;;  %8474 = vpow2.f32 %v6186_v58  ;;  %v6189_v8 = vmul.f32 -1.442695, %v10581_v14  ;;  %7322 = vmatprep.mubr.msk.f32.mxu0 %vm2016_vm1, %v4026_v25 }
 0x402   :  { %v8459_v7 = vpop.eup %8458  ;;  %8476 = vrcp.f32 %v3843_v45  ;;  %v6188_v41 = vmul.f32 -1.442695, %v10585_v28  ;;  %v7244_v36 = vpop.f32.mrb[88].mxu1  ;;  %7323 = vmatmul.mubr.msk.f32.gmra.mrb[144].mxu0 %vm2016_vm1, %v4027_v33  ;;  %v4029_v24 = vmul.f32 %v8457_v9, %v10495_v11 }
 0x403   :  { %v8461_v54 = vpop.eup %8460  ;;  %v4028_v56 = vmul.f32 %v8459_v7, %v10499_v1  ;;  %8478 = vrcp.f32 %v3842_v27  ;;  %v10593_v5 = vadd.f32 %v7244_v36, %v10431_v62  ;;  %v3451_v4 = vpop.f32.mrb[89].mxu1 }
 0x404   :  { %v8463_v40 = vpop.eup %8462  ;;  %v3845_v10 = vadd.f32 1.0, %v8461_v54  ;;  %8480 = vpow2.f32 %v6189_v8  ;;  %v10597_v35 = vadd.f32 %v10431_v62, %v3451_v4 }
 0x405   :  { %v8465_v32 = vpop.eup %8464  ;;  %v3844_v23 = vadd.f32 1.0, %v8463_v40  ;;  %8482 = vpow2.f32 %v6188_v41  ;;  %v6191_v50 = vmul.f32 -1.442695, %v10593_v5  ;;  %7325 = vmatprep.mubr.msk.f32.mxu0 %vm2016_vm1, %v4028_v56 }
 0x406   :  { %v8467_v1 = vpop.eup %8466  ;;  %8484 = vrcp.f32 %v3845_v10  ;;  %v6190_v12 = vmul.f32 -1.442695, %v10597_v35  ;;  %v7247_v34 = vpop.f32.mrb[90].mxu1  ;;  %7326 = vmatmul.mubr.msk.f32.gmra.mrb[146].mxu0 %vm2016_vm1, %v4029_v24  ;;  %v4031_v42 = vmul.f32 %v8465_v32, %v10513_v2 }
 0x407   :  { %v4030_v11 = vmul.f32 %v8467_v1, %v10517_v15  ;;  %8486 = vrcp.f32 %v3844_v23  ;;  %v10605_v60 = vadd.f32 %v7247_v34, %v10431_v62  ;;  %v3461_v20 = vpop.f32.mrb[91].mxu1 }
 0x408   :  { %v8469_v59 = vpop.eup %8468  ;;  %8488 = vpow2.f32 %v6191_v50  ;;  %v10609_v30 = vadd.f32 %v10431_v62, %v3461_v20 }
 0x409   :  { %v8471_v16 = vpop.eup %8470  ;;  %8490 = vpow2.f32 %v6190_v12  ;;  %v6193_v44 = vmul.f32 -1.442695, %v10605_v60  ;;  %7328 = vmatprep.mubr.msk.f32.mxu0 %vm2016_vm1, %v4030_v11  ;;  %v4033_v22 = vmul.f32 %v8469_v59, %v10536_v18 }
 0x40a   :  { %v8473_v17 = vpop.eup %8472  ;;  %v4032_v15 = vmul.f32 %v8471_v16, %v10539_v57  ;;  %v6192_v51 = vmul.f32 -1.442695, %v10609_v30  ;;  %v7250_v47 = vpop.f32.mrb[92].mxu1  ;;  %7329 = vmatmul.mubr.msk.f32.gmra.mrb[148].mxu0 %vm2016_vm1, %v4031_v42 }
 0x40b   :  { %v8475_v3 = vpop.eup %8474  ;;  %v3847_v2 = vadd.f32 1.0, %v8473_v17  ;;  %8492 = vpow2.f32 %v6193_v44  ;;  %v10617_v63 = vadd.f32 %v7250_v47, %v10431_v62  ;;  %v3471_v31 = vpop.f32.mrb[93].mxu1 }
 0x40c   :  { %v8477_v53 = vpop.eup %8476  ;;  %v3846_v19 = vadd.f32 1.0, %v8475_v3  ;;  %8494 = vpow2.f32 %v6192_v51  ;;  %v10621_v39 = vadd.f32 %v10431_v62, %v3471_v31  ;;  %7331 = vmatprep.mubr.msk.f32.mxu0 %vm2016_vm1, %v4032_v15 }
 0x40d   :  { %v8479_v57 = vpop.eup %8478  ;;  %8496 = vrcp.f32 %v3847_v2  ;;  %v6195_v37 = vmul.f32 -1.442695, %v10617_v63  ;;  %v4035_v49 = vmul.f32 %v8477_v53, %v10546_v55 }
 0x40e   :  { %v8481_v21 = vpop.eup %8480  ;;  %v4034_v48 = vmul.f32 %v8479_v57, %v10549_v43  ;;  %8498 = vrcp.f32 %v3846_v19  ;;  %v6194_v13 = vmul.f32 -1.442695, %v10621_v39  ;;  %v7253_v0 = vpop.f32.mrb[94].mxu1  ;;  %7332 = vmatmul.mubr.msk.f32.gmra.mrb[150].mxu0 %vm2016_vm1, %v4033_v22 }
 0x40f   :  { %v8483_v18 = vpop.eup %8482  ;;  %v3849_v58 = vadd.f32 1.0, %v8481_v21  ;;  %8500 = vpow2.f32 %v6195_v37  ;;  %v10629_v46 = vadd.f32 %v7253_v0, %v10431_v62  ;;  %v3481_v6 = vpop.f32.mrb[95].mxu1 }
 0x410   :  { %v8485_v25 = vpop.eup %8484  ;;  %v3848_v26 = vadd.f32 1.0, %v8483_v18  ;;  %8502 = vpow2.f32 %v6194_v13  ;;  %v10633_v43 = vadd.f32 %v10431_v62, %v3481_v6  ;;  %7334 = vmatprep.mubr.msk.f32.mxu0 %vm2016_vm1, %v4034_v48 }
 0x411   :  { %v8487_v33 = vpop.eup %8486  ;;  %8504 = vrcp.f32 %v3849_v58  ;;  %v6197_v45 = vmul.f32 -1.442695, %v10629_v46  ;;  %v4037_v56 = vmul.f32 %v8485_v25, %v10558_v61 }
 0x412   :  { %v8489_v9 = vpop.eup %8488  ;;  %v4036_v27 = vmul.f32 %v8487_v33, %v10561_v52  ;;  %8506 = vrcp.f32 %v3848_v26  ;;  %v6196_v8 = vmul.f32 -1.442695, %v10633_v43  ;;  %v7256_v7 = vpop.f32.mrb[96].mxu1  ;;  %7335 = vmatmul.mubr.msk.f32.gmra.mrb[152].mxu0 %vm2016_vm1, %v4035_v49 }
 0x413   :  { %v8491_v55 = vpop.eup %8490  ;;  %v3851_v41 = vadd.f32 1.0, %v8489_v9  ;;  %8508 = vpow2.f32 %v6197_v45  ;;  %v10641_v36 = vadd.f32 %v7256_v7, %v10431_v62  ;;  %v3491_v54 = vpop.f32.mrb[97].mxu1 }
 0x414   :  { %v3850_v4 = vadd.f32 1.0, %v8491_v55  ;;  %8510 = vpow2.f32 %v6196_v8  ;;  %v10645_v40 = vadd.f32 %v10431_v62, %v3491_v54  ;;  %7337 = vmatprep.mubr.msk.f32.mxu0 %vm2016_vm1, %v4036_v27 }
 0x415   :  { %v8493_v52 = vpop.eup %8492  ;;  %8512 = vrcp.f32 %v3851_v41  ;;  %v6199_v24 = vmul.f32 -1.442695, %v10641_v36 }
 0x416   :  { %v8495_v10 = vpop.eup %8494  ;;  %8514 = vrcp.f32 %v3850_v4  ;;  %v3853_v32 = vadd.f32 1.0, %v8493_v52  ;;  %v6198_v23 = vmul.f32 -1.442695, %v10645_v40  ;;  %v7259_v50 = vpop.f32.mrb[98].mxu1  ;;  %7338 = vmatmul.mubr.msk.f32.gmra.mrb[154].mxu0 %vm2016_vm1, %v4037_v56 }
 0x417   :  { %v8497_v61 = vpop.eup %8496  ;;  %v3852_v1 = vadd.f32 1.0, %v8495_v10  ;;  %8516 = vpow2.f32 %v6199_v24  ;;  %v10652_v12 = vadd.f32 %v7259_v50, %v10431_v62  ;;  %v3501_v34 = vpop.f32.mrb[99].mxu1 }
 0x418   :  { %v8499_v11 = vpop.eup %8498  ;;  %8518 = vrcp.f32 %v3853_v32  ;;  %v10655_v20 = vadd.f32 %v10431_v62, %v3501_v34  ;;  %v4039_v17 = vmul.f32 %v8497_v61, %v10571_v29 }
 0x419   :  { %v8501_v59 = vpop.eup %8500  ;;  %v4038_v42 = vmul.f32 %v8499_v11, %v10575_v38  ;;  %8520 = vrcp.f32 %v3852_v1  ;;  %v6201_v16 = vmul.f32 -1.442695, %v10652_v12 }
 0x41a   :  { %v8503_v44 = vpop.eup %8502  ;;  %v3855_v15 = vadd.f32 1.0, %v8501_v59  ;;  %8522 = vpow2.f32 %v6198_v23  ;;  %v6200_v51 = vmul.f32 -1.442695, %v10655_v20  ;;  %v7262_v47 = vpop.f32.mrb[100].mxu1 }
 0x41b   :  { %v8505_v3 = vpop.eup %8504  ;;  %v3854_v2 = vadd.f32 1.0, %v8503_v44  ;;  %8524 = vpow2.f32 %v6201_v16  ;;  %v10662_v31 = vadd.f32 %v7262_v47, %v10431_v62  ;;  %7340 = vmatprep.mubr.msk.f32.mxu0 %vm2016_vm1, %v4038_v42  ;;  %v3511_v38 = vpop.f32.mrb[101].mxu1 }
 0x41c   :  { %v8507_v53 = vpop.eup %8506  ;;  %8526 = vrcp.f32 %v3855_v15  ;;  %v10666_v22 = vadd.f32 %v10431_v62, %v3511_v38  ;;  %7341 = vmatmul.mubr.msk.f32.gmra.mrb[156].mxu0 %vm2016_vm1, %v4039_v17  ;;  %v4041_v21 = vmul.f32 %v8505_v3, %v10581_v14 }
 0x41d   :  { %v8509_v29 = vpop.eup %8508  ;;  %v4040_v19 = vmul.f32 %v8507_v53, %v10585_v28  ;;  %8528 = vrcp.f32 %v3854_v2  ;;  %v6203_v57 = vmul.f32 -1.442695, %v10662_v31 }
 0x41e   :  { %v8511_v37 = vpop.eup %8510  ;;  %v3857_v48 = vadd.f32 1.0, %v8509_v29  ;;  %8530 = vpow2.f32 %v6200_v51  ;;  %v6202_v13 = vmul.f32 -1.442695, %v10666_v22 }
 0x41f   :  { %v8513_v0 = vpop.eup %8512  ;;  %v3856_v18 = vadd.f32 1.0, %v8511_v37  ;;  %8532 = vpow2.f32 %v6203_v57  ;;  %7343 = vmatprep.mubr.msk.f32.mxu0 %vm2016_vm1, %v4040_v19 }
 0x420   :  { %v8515_v58 = vpop.eup %8514  ;;  %8534 = vrcp.f32 %v3857_v48  ;;  %v7265_v6 = vpop.f32.mrb[102].mxu1  ;;  %7344 = vmatmul.mubr.msk.f32.gmra.mrb[158].mxu0 %vm2016_vm1, %v4041_v21  ;;  %v4043_v33 = vmul.f32 %v8513_v0, %v10593_v5 }
 0x421   :  { %v8517_v28 = vpop.eup %8516  ;;  %v4042_v25 = vmul.f32 %v8515_v58, %v10597_v35  ;;  %8536 = vrcp.f32 %v3856_v18  ;;  %v10677_v14 = vadd.f32 %v7265_v6, %v10431_v62  ;;  %v3521_v49 = vpop.f32.mrb[103].mxu1 }
 0x422   :  { %v8519_v26 = vpop.eup %8518  ;;  %v3859_v45 = vadd.f32 1.0, %v8517_v28  ;;  %8538 = vpow2.f32 %v6202_v13  ;;  %v10681_v9 = vadd.f32 %v10431_v62, %v3521_v49 }
 0x423   :  { %v8521_v27 = vpop.eup %8520  ;;  %v6205_v8 = vmul.f32 -1.442695, %v10677_v14  ;;  %7346 = vmatprep.mubr.msk.f32.mxu0 %vm2016_vm1, %v4042_v25  ;;  %v4045_v24 = vmul.f32 %v8519_v26, %v10605_v60 }
 0x424   :  { %v8523_v7 = vpop.eup %8522  ;;  %v4044_v35 = vmul.f32 %v8521_v27, %v10609_v30  ;;  %8540 = vrcp.f32 %v3859_v45  ;;  %v6204_v55 = vmul.f32 -1.442695, %v10681_v9  ;;  %v7268_v41 = vpop.f32.mrb[104].mxu1  ;;  %7347 = vmatmul.mubr.msk.f32.gmra.mrb[160].mxu0 %vm2016_vm1, %v4043_v33 }
 0x425   :  { %v8525_v5 = vpop.eup %8524  ;;  %v3858_v54 = vadd.f32 1.0, %v8523_v7  ;;  %8542 = vpow2.f32 %v6205_v8  ;;  %v10689_v56 = vadd.f32 %v7268_v41, %v10431_v62  ;;  %v3531_v4 = vpop.f32.mrb[105].mxu1 }
 0x426   :  { %v8527_v52 = vpop.eup %8526  ;;  %v3861_v10 = vadd.f32 1.0, %v8525_v5  ;;  %8544 = vpow2.f32 %v6204_v55  ;;  %v10693_v30 = vadd.f32 %v10431_v62, %v3531_v4  ;;  %7349 = vmatprep.mubr.msk.f32.mxu0 %vm2016_vm1, %v4044_v35 }
 0x427   :  { %v8529_v32 = vpop.eup %8528  ;;  %8546 = vrcp.f32 %v3858_v54  ;;  %v6207_v23 = vmul.f32 -1.442695, %v10689_v56  ;;  %v4047_v44 = vmul.f32 %v8527_v52, %v10617_v63 }
 0x428   :  { %v8531_v50 = vpop.eup %8530  ;;  %v4046_v61 = vmul.f32 %v8529_v32, %v10621_v39  ;;  %8548 = vrcp.f32 %v3861_v10  ;;  %v6206_v1 = vmul.f32 -1.442695, %v10693_v30  ;;  %v7271_v34 = vpop.f32.mrb[106].mxu1  ;;  %7350 = vmatmul.mubr.msk.f32.gmra.mrb[162].mxu0 %vm2016_vm1, %v4045_v24 }
 0x429   :  { %v8533_v60 = vpop.eup %8532  ;;  %v3860_v11 = vadd.f32 1.0, %v8531_v50  ;;  %8550 = vpow2.f32 %v6207_v23  ;;  %v10701_v59 = vadd.f32 %v7271_v34, %v10431_v62  ;;  %v3541_v42 = vpop.f32.mrb[107].mxu1 }
 0x42a   :  { %v8535_v16 = vpop.eup %8534  ;;  %v3863_v17 = vadd.f32 1.0, %v8533_v60  ;;  %8552 = vpow2.f32 %v6206_v1  ;;  %v10705_v39 = vadd.f32 %v10431_v62, %v3541_v42  ;;  %7352 = vmatprep.mubr.msk.f32.mxu0 %vm2016_vm1, %v4046_v61 }
 0x42b   :  { %v8537_v15 = vpop.eup %8536  ;;  %8554 = vrcp.f32 %v3860_v11  ;;  %v6209_v51 = vmul.f32 -1.442695, %v10701_v59  ;;  %v4049_v57 = vmul.f32 %v8535_v16, %v10629_v46 }
 0x42c   :  { %v8539_v47 = vpop.eup %8538  ;;  %v4048_v3 = vmul.f32 %v8537_v15, %v10633_v43  ;;  %8556 = vrcp.f32 %v3863_v17  ;;  %v6208_v2 = vmul.f32 -1.442695, %v10705_v39  ;;  %v7274_v38 = vpop.f32.mrb[108].mxu1  ;;  %7353 = vmatmul.mubr.msk.f32.gmra.mrb[164].mxu0 %vm2016_vm1, %v4047_v44 }
 0x42d   :  { %v3862_v63 = vadd.f32 1.0, %v8539_v47  ;;  %8558 = vpow2.f32 %v6209_v51  ;;  %v10713_v53 = vadd.f32 %v7274_v38, %v10431_v62  ;;  %v3551_v29 = vpop.f32.mrb[109].mxu1 }
 0x42e   :  { %v8541_v19 = vpop.eup %8540  ;;  %8560 = vpow2.f32 %v6208_v2  ;;  %v10717_v37 = vadd.f32 %v10431_v62, %v3551_v29  ;;  %7355 = vmatprep.mubr.msk.f32.mxu0 %vm2016_vm1, %v4048_v3 }
 0x42f   :  { %v8543_v43 = vpop.eup %8542  ;;  %8562 = vrcp.f32 %v3862_v63  ;;  %v6211_v21 = vmul.f32 -1.442695, %v10713_v53  ;;  %v4051_v45 = vmul.f32 %v8541_v19, %v10641_v36 }
 0x430   :  { %v8545_v48 = vpop.eup %8544  ;;  %v3865_v13 = vadd.f32 1.0, %v8543_v43  ;;  %v6210_v0 = vmul.f32 -1.442695, %v10717_v37  ;;  %v7277_v18 = vpop.f32.mrb[110].mxu1  ;;  %7356 = vmatmul.mubr.msk.f32.gmra.mrb[166].mxu0 %vm2016_vm1, %v4049_v57 }
 0x431   :  { %v8547_v58 = vpop.eup %8546  ;;  %v3864_v6 = vadd.f32 1.0, %v8545_v48  ;;  %8564 = vpow2.f32 %v6211_v21  ;;  %v10724_v46 = vadd.f32 %v7277_v18, %v10431_v62  ;;  %v3561_v28 = vpop.f32.mrb[111].mxu1 }
 0x432   :  { %v8549_v25 = vpop.eup %8548  ;;  %v4050_v49 = vmul.f32 %v8547_v58, %v10645_v40  ;;  %8566 = vrcp.f32 %v3865_v13  ;;  %v10728_v26 = vadd.f32 %v10431_v62, %v3561_v28 }
 0x433   :  { %v8551_v33 = vpop.eup %8550  ;;  %8568 = vrcp.f32 %v3864_v6  ;;  %v6213_v27 = vmul.f32 -1.442695, %v10724_v46  ;;  %v4053_v10 = vmul.f32 %v8549_v25, %v10652_v12 }
 0x434   :  { %v8553_v8 = vpop.eup %8552  ;;  %v3867_v7 = vadd.f32 1.0, %v8551_v33  ;;  %8570 = vpow2.f32 %v6210_v0  ;;  %v6212_v35 = vmul.f32 -1.442695, %v10728_v26  ;;  %v7280_v55 = vpop.f32.mrb[112].mxu1  ;;  %7358 = vmatprep.mubr.msk.f32.mxu0 %vm2016_vm1, %v4050_v49 }
 0x435   :  { %v8555_v41 = vpop.eup %8554  ;;  %v3866_v40 = vadd.f32 1.0, %v8553_v8  ;;  %8572 = vpow2.f32 %v6213_v27  ;;  %v10735_v5 = vadd.f32 %v7280_v55, %v10431_v62  ;;  %v3571_v54 = vpop.f32.mrb[113].mxu1  ;;  %7359 = vmatmul.mubr.msk.f32.gmra.mrb[168].mxu0 %vm2016_vm1, %v4051_v45 }
 0x436   :  { %v8557_v36 = vpop.eup %8556  ;;  %v4052_v4 = vmul.f32 %v8555_v41, %v10655_v20  ;;  %8574 = vrcp.f32 %v3867_v7  ;;  %v10740_v52 = vadd.f32 %v10431_v62, %v3571_v54 }
 0x437   :  { %v8559_v24 = vpop.eup %8558  ;;  %8576 = vrcp.f32 %v3866_v40  ;;  %v6215_v32 = vmul.f32 -1.442695, %v10735_v5  ;;  %v4055_v16 = vmul.f32 %v8557_v36, %v10662_v31 }
 0x438   :  { %v8561_v23 = vpop.eup %8560  ;;  %v3869_v50 = vadd.f32 1.0, %v8559_v24  ;;  %8578 = vpow2.f32 %v6212_v35  ;;  %v6214_v61 = vmul.f32 -1.442695, %v10740_v52  ;;  %7361 = vmatprep.mubr.msk.f32.mxu0 %vm2016_vm1, %v4052_v4 }
 0x439   :  { %v8563_v1 = vpop.eup %8562  ;;  %v3868_v34 = vadd.f32 1.0, %v8561_v23  ;;  %8580 = vpow2.f32 %v6215_v32  ;;  %v7283_v20 = vpop.f32.mrb[114].mxu1  ;;  %7362 = vmatmul.mubr.msk.f32.gmra.mrb[170].mxu0 %vm2016_vm1, %v4053_v10 }
 0x43a   :  { %v4054_v60 = vmul.f32 %v8563_v1, %v10666_v22  ;;  %8582 = vrcp.f32 %v3869_v50  ;;  %v10749_v12 = vadd.f32 %v7283_v20, %v10431_v62  ;;  %v3581_v11 = vpop.f32.mrb[115].mxu1 }
 0x43b   :  { %v8565_v42 = vpop.eup %8564  ;;  %8584 = vrcp.f32 %v3868_v34  ;;  %v10753_v44 = vadd.f32 %v10431_v62, %v3581_v11  ;;  %v10763_v62 = vld [vmem:[%s11566_s8] ss:$0 sm:$0xff] }
 0x43c   :  { %v8567_v17 = vpop.eup %8566  ;;  %v3871_v15 = vadd.f32 1.0, %v8565_v42  ;;  %8586 = vpow2.f32 %v6214_v61  ;;  %v6217_v51 = vmul.f32 -1.442695, %v10749_v12  ;;  %7364 = vmatprep.mubr.msk.f32.mxu0 %vm2016_vm1, %v4054_v60 }
 0x43d   :  { %v8569_v22 = vpop.eup %8568  ;;  %v6216_v47 = vmul.f32 -1.442695, %v10753_v44  ;;  %v7286_v3 = vpop.f32.mrb[116].mxu1  ;;  %7365 = vmatmul.mubr.msk.f32.gmra.mrb[172].mxu0 %vm2016_vm1, %v4055_v16  ;;  %v4057_v19 = vmul.f32 %v8567_v17, %v10677_v14 }
 0x43e   :  { %v8571_v2 = vpop.eup %8570  ;;  %v4056_v31 = vmul.f32 %v8569_v22, %v10681_v9  ;;  %8588 = vrcp.f32 %v3871_v15  ;;  %v10766_v38 = vadd.f32 %v10763_v62, %v7286_v3  ;;  %v3591_v63 = vpop.f32.mrb[117].mxu1 }
 0x43f   :  { %v8573_v29 = vpop.eup %8572  ;;  %v3870_v57 = vadd.f32 1.0, %v8571_v2  ;;  %8590 = vpow2.f32 %v6217_v51  ;;  %v10770_v43 = vadd.f32 %v10763_v62, %v3591_v63 }
 0x440   :  { %v8575_v21 = vpop.eup %8574  ;;  %v3873_v9 = vadd.f32 1.0, %v8573_v29  ;;  %8592 = vpow2.f32 %v6216_v47  ;;  %v6219_v48 = vmul.f32 -1.442695, %v10766_v38  ;;  %7367 = vmatprep.mubr.msk.f32.mxu0 %vm2016_vm1, %v4056_v31 }
 0x441   :  { %v8577_v13 = vpop.eup %8576  ;;  %8594 = vrcp.f32 %v3870_v57  ;;  %v6218_v0 = vmul.f32 -1.442695, %v10770_v43  ;;  %v7289_v18 = vpop.f32.mrb[118].mxu1  ;;  %7368 = vmatmul.mubr.msk.f32.gmra.mrb[174].mxu0 %vm2016_vm1, %v4057_v19  ;;  %v4059_v49 = vmul.f32 %v8575_v21, %v10689_v56 }
 0x442   :  { %v8579_v14 = vpop.eup %8578  ;;  %v4058_v58 = vmul.f32 %v8577_v13, %v10693_v30  ;;  %8596 = vrcp.f32 %v3873_v9  ;;  %v10778_v6 = vadd.f32 %v10763_v62, %v7289_v18  ;;  %v3601_v28 = vpop.f32.mrb[119].mxu1 }
 0x443   :  { %v8581_v25 = vpop.eup %8580  ;;  %v3872_v33 = vadd.f32 1.0, %v8579_v14  ;;  %8598 = vpow2.f32 %v6219_v48  ;;  %v10782_v45 = vadd.f32 %v10763_v62, %v3601_v28 }
 0x444   :  { %v8583_v27 = vpop.eup %8582  ;;  %v3875_v8 = vadd.f32 1.0, %v8581_v25  ;;  %8600 = vpow2.f32 %v6218_v0  ;;  %v6221_v7 = vmul.f32 -1.442695, %v10778_v6  ;;  %7370 = vmatprep.mubr.msk.f32.mxu0 %vm2016_vm1, %v4058_v58 }
 0x445   :  { %v8585_v30 = vpop.eup %8584  ;;  %8602 = vrcp.f32 %v3872_v33  ;;  %v6220_v35 = vmul.f32 -1.442695, %v10782_v45  ;;  %v7292_v55 = vpop.f32.mrb[120].mxu1  ;;  %7371 = vmatmul.mubr.msk.f32.gmra.mrb[176].mxu0 %vm2016_vm1, %v4059_v49  ;;  %v4061_v36 = vmul.f32 %v8583_v27, %v10701_v59 }
 0x446   :  { %v8587_v56 = vpop.eup %8586  ;;  %v4060_v41 = vmul.f32 %v8585_v30, %v10705_v39  ;;  %8604 = vrcp.f32 %v3875_v8  ;;  %v10790_v40 = vadd.f32 %v10763_v62, %v7292_v55  ;;  %v3611_v54 = vpop.f32.mrb[121].mxu1 }
 0x447   :  { %v3874_v4 = vadd.f32 1.0, %v8587_v56  ;;  %8606 = vpow2.f32 %v6221_v7  ;;  %v10794_v24 = vadd.f32 %v10763_v62, %v3611_v54 }
 0x448   :  { %v8589_v10 = vpop.eup %8588  ;;  %8608 = vpow2.f32 %v6220_v35  ;;  %v6223_v32 = vmul.f32 -1.442695, %v10790_v40  ;;  %7373 = vmatprep.mubr.msk.f32.mxu0 %vm2016_vm1, %v4060_v41 }
 0x449   :  { %v8591_v23 = vpop.eup %8590  ;;  %8610 = vrcp.f32 %v3874_v4  ;;  %v6222_v39 = vmul.f32 -1.442695, %v10794_v24  ;;  %v7295_v50 = vpop.f32.mrb[122].mxu1  ;;  %7374 = vmatmul.mubr.msk.f32.gmra.mrb[178].mxu0 %vm2016_vm1, %v4061_v36  ;;  %v4063_v51 = vmul.f32 %v8589_v10, %v10713_v53 }
 0x44a   :  { %v8593_v61 = vpop.eup %8592  ;;  %v3877_v59 = vadd.f32 1.0, %v8591_v23  ;;  %8612 = vpow2.f32 %v6223_v32  ;;  %v10801_v1 = vadd.f32 %v10763_v62, %v7295_v50  ;;  %v3621_v34 = vpop.f32.mrb[123].mxu1 }
 0x44b   :  { %v8595_v20 = vpop.eup %8594  ;;  %v3876_v60 = vadd.f32 1.0, %v8593_v61  ;;  %8614 = vpow2.f32 %v6222_v39  ;;  %v10804_v11 = vadd.f32 %v10763_v62, %v3621_v34 }
 0x44c   :  { %v8597_v42 = vpop.eup %8596  ;;  %v4062_v16 = vmul.f32 %v8595_v20, %v10717_v37  ;;  %8616 = vrcp.f32 %v3877_v59  ;;  %v6225_v17 = vmul.f32 -1.442695, %v10801_v1 }
 0x44d   :  { %v8599_v15 = vpop.eup %8598  ;;  %8618 = vrcp.f32 %v3876_v60  ;;  %v6224_v22 = vmul.f32 -1.442695, %v10804_v11  ;;  %v4065_v53 = vmul.f32 %v8597_v42, %v10724_v46  ;;  %v5121_v46 = vld [vmem:[%s11567_s11 + $0x38] sm:$0xff] }
 0x44e   :  { %v8601_v47 = vpop.eup %8600  ;;  %v3879_v3 = vadd.f32 1.0, %v8599_v15  ;;  %8620 = vpow2.f32 %v6225_v17  ;;  %7376 = vmatprep.mubr.msk.f32.mxu0 %vm2016_vm1, %v4062_v16 }
 0x44f   :  { %v8603_v2 = vpop.eup %8602  ;;  %v3878_v31 = vadd.f32 1.0, %v8601_v47  ;;  %8622 = vpow2.f32 %v6224_v22  ;;  %7377 = vmatmul.mubr.msk.f32.gmra.mrb[180].mxu0 %vm2016_vm1, %v4063_v51 }
 0x450   :  { %v8605_v37 = vpop.eup %8604  ;;  %v4064_v62 = vmul.f32 %v8603_v2, %v10728_v26  ;;  %8624 = vrcp.f32 %v3879_v3  ;;  %v5120_v26 = vld [vmem:[%s11567_s11 + $0x30] sm:$0xff] }
 0x451   :  { %v8607_v63 = vpop.eup %8606  ;;  %8626 = vrcp.f32 %v3878_v31  ;;  %v4067_v0 = vmul.f32 %v8605_v37, %v10735_v5  ;;  %v7596_v14 = vpack.c.bf16 %v5121_v46, %v5120_v26 }
 0x452   :  { %v8609_v29 = vpop.eup %8608  ;;  %v3881_v19 = vadd.f32 1.0, %v8607_v63  ;;  %7379 = vmatprep.mubr.msk.f32.mxu0 %vm2016_vm1, %v4064_v62 }
 0x453   :  { %v8611_v57 = vpop.eup %8610  ;;  %v3880_v21 = vadd.f32 1.0, %v8609_v29  ;;  %7380 = vmatmul.mubr.msk.f32.gmra.mrb[182].mxu0 %vm2016_vm1, %v4065_v53  ;;  %7597 = vmatprep.subr.bf16.mxu1 %v7596_v14 }
 0x454   :  { %v8613_v9 = vpop.eup %8612  ;;  %v4066_v48 = vmul.f32 %v8611_v57, %v10740_v52  ;;  %8628 = vrcp.f32 %v3881_v19  ;;  %7599 = vmatpush3.bf16.msra.mxu1 %v7596_v14 }
 0x455   :  { %v8615_v13 = vpop.eup %8614  ;;  %8630 = vrcp.f32 %v3880_v21  ;;  %v3883_v18 = vadd.f32 1.0, %v8613_v9 }
 0x456   :  { %v8617_v58 = vpop.eup %8616  ;;  %v3882_v28 = vadd.f32 1.0, %v8615_v13  ;;  %7382 = vmatprep.mubr.msk.f32.mxu0 %vm2016_vm1, %v4066_v48 }
 0x457   :  { %v8619_v52 = vpop.eup %8618  ;;  %8632 = vrcp.f32 %v3883_v18  ;;  %7383 = vmatmul.mubr.msk.f32.gmra.mrb[184].mxu0 %vm2016_vm1, %v4067_v0  ;;  %v4069_v5 = vmul.f32 %v8617_v58, %v10749_v12 }
 0x458   :  { %v8621_v25 = vpop.eup %8620  ;;  %v4068_v49 = vmul.f32 %v8619_v52, %v10753_v44  ;;  %8634 = vrcp.f32 %v3882_v28 }
 0x459   :  { %v8623_v33 = vpop.eup %8622  ;;  %v3885_v27 = vadd.f32 1.0, %v8621_v25 }
 0x45a   :  { %v8625_v8 = vpop.eup %8624  ;;  %v3884_v7 = vadd.f32 1.0, %v8623_v33  ;;  %7385 = vmatprep.mubr.msk.f32.mxu0 %vm2016_vm1, %v4068_v49 }
 0x45b   :  { %v8627_v30 = vpop.eup %8626  ;;  %8636 = vrcp.f32 %v3885_v27  ;;  %7386 = vmatmul.mubr.msk.f32.gmra.mrb[186].mxu0 %vm2016_vm1, %v4069_v5  ;;  %v4071_v55 = vmul.f32 %v8625_v8, %v10766_v38 }
 0x45c   :  { %v4070_v35 = vmul.f32 %v8627_v30, %v10770_v43  ;;  %8638 = vrcp.f32 %v3884_v7 }
 0x45e   :  { %v8629_v44 = vpop.eup %8628  ;;  %7388 = vmatprep.mubr.msk.f32.mxu0 %vm2016_vm1, %v4070_v35 }
 0x45f   :  { %v8631_v56 = vpop.eup %8630  ;;  %7389 = vmatmul.mubr.msk.f32.gmra.mrb[188].mxu0 %vm2016_vm1, %v4071_v55  ;;  %v4073_v54 = vmul.f32 %v8629_v44, %v10778_v6  ;;  %v10849_v6 = vld [vmem:[%s11568_s10] ss:$0 sm:$0xff] }
 0x460   :  { %v4072_v12 = vmul.f32 %v8631_v56, %v10782_v45 }
 0x461   :  { %v8633_v41 = vpop.eup %8632 }
 0x462   :  { %v8635_v36 = vpop.eup %8634  ;;  %7391 = vmatprep.mubr.msk.f32.mxu0 %vm2016_vm1, %v4072_v12  ;;  %v4075_v38 = vmul.f32 %v8633_v41, %v10790_v40 }
 0x463   :  { %v4074_v4 = vmul.f32 %v8635_v36, %v10794_v24  ;;  %7392 = vmatmul.mubr.msk.f32.gmra.mrb[190].mxu0 %vm2016_vm1, %v4073_v54 }
 0x465   :  { %v8637_v43 = vpop.eup %8636  ;;  %7394 = vmatprep.mubr.msk.f32.mxu0 %vm2016_vm1, %v4074_v4 }
 0x466   :  { %v8639_v10 = vpop.eup %8638  ;;  %v4077_v45 = vmul.f32 %v8637_v43, %v10801_v1 }
 0x467   :  { %v4076_v32 = vmul.f32 %v8639_v10, %v10804_v11  ;;  %7395 = vmatmul.mubr.msk.f32.gmra.mrb[192].mxu0 %vm2016_vm1, %v4075_v38 }
 0x469   :  { %7397 = vmatprep.mubr.msk.f32.mxu0 %vm2016_vm1, %v4076_v32 }
 0x46b   :  { %7398 = vmatmul.mubr.msk.f32.gmra.mrb[194].mxu0 %vm2016_vm1, %v4077_v45 }
 0x4b7   :  { %v7306_v24 = vpop.f32.mrb[132].mxu0 }
 0x4b8   :  { %v10852_v40 = vadd.f32 %v7306_v24, %v10849_v6  ;;  %v4347_v23 = vpop.f32.mrb[133].mxu0 }
 0x4b9   :  { %v10855_v39 = vadd.f32 %v10849_v6, %v4347_v23 }
 0x4ba   :  { %v6292_v50 = vmul.f32 -1.442695, %v10852_v40 }
 0x4bb   :  { %v6291_v61 = vmul.f32 -1.442695, %v10855_v39  ;;  %v7309_v59 = vpop.f32.mrb[134].mxu0 }
 0x4bc   :  { %8640 = vpow2.f32 %v6292_v50  ;;  %v10860_v1 = vadd.f32 %v7309_v59, %v10849_v6  ;;  %v4357_v34 = vpop.f32.mrb[135].mxu0 }
 0x4bd   :  { %8642 = vpow2.f32 %v6291_v61  ;;  %v10863_v20 = vadd.f32 %v10849_v6, %v4357_v34 }
 0x4be   :  { %v6294_v60 = vmul.f32 -1.442695, %v10860_v1 }
 0x4bf   :  { %v6293_v11 = vmul.f32 -1.442695, %v10863_v20  ;;  %v7312_v42 = vpop.f32.mrb[136].mxu0 }
 0x4c0   :  { %8644 = vpow2.f32 %v6294_v60  ;;  %v10868_v16 = vadd.f32 %v7312_v42, %v10849_v6  ;;  %v4367_v17 = vpop.f32.mrb[137].mxu0 }
 0x4c1   :  { %8646 = vpow2.f32 %v6293_v11  ;;  %v10871_v15 = vadd.f32 %v10849_v6, %v4367_v17 }
 0x4c2   :  { %v6296_v51 = vmul.f32 -1.442695, %v10868_v16 }
 0x4c3   :  { %v6295_v22 = vmul.f32 -1.442695, %v10871_v15 }
 0x4c4   :  { %8648 = vpow2.f32 %v6296_v51 }
 0x4c5   :  { %8650 = vpow2.f32 %v6295_v22 }
 0x4c6   :  { %v8641_v47 = vpop.eup %8640  ;;  %v7315_v3 = vpop.f32.mrb[138].mxu0 }
 0x4c7   :  { %v8643_v2 = vpop.eup %8642  ;;  %v4859_v31 = vadd.f32 1.0, %v8641_v47  ;;  %v10876_v37 = vadd.f32 %v7315_v3, %v10849_v6  ;;  %v4377_v62 = vpop.f32.mrb[139].mxu0 }
 0x4c8   :  { %v4858_v63 = vadd.f32 1.0, %v8643_v2  ;;  %v10879_v53 = vadd.f32 %v10849_v6, %v4377_v62 }
 0x4c9   :  { %8652 = vrcp.f32 %v4859_v31  ;;  %v6298_v29 = vmul.f32 -1.442695, %v10876_v37 }
 0x4ca   :  { %v8645_v19 = vpop.eup %8644  ;;  %8654 = vrcp.f32 %v4858_v63  ;;  %v6297_v57 = vmul.f32 -1.442695, %v10879_v53  ;;  %v7318_v21 = vpop.f32.mrb[140].mxu0 }
 0x4cb   :  { %v8647_v9 = vpop.eup %8646  ;;  %v4861_v48 = vadd.f32 1.0, %v8645_v19  ;;  %8656 = vpow2.f32 %v6298_v29  ;;  %v10884_v26 = vadd.f32 %v7318_v21, %v10849_v6  ;;  %v4387_v46 = vpop.f32.mrb[141].mxu0 }
 0x4cc   :  { %v4860_v13 = vadd.f32 1.0, %v8647_v9  ;;  %8658 = vpow2.f32 %v6297_v57  ;;  %v10887_v0 = vadd.f32 %v10849_v6, %v4387_v46 }
 0x4cd   :  { %8660 = vrcp.f32 %v4861_v48  ;;  %v6300_v18 = vmul.f32 -1.442695, %v10884_v26 }
 0x4ce   :  { %v8649_v14 = vpop.eup %8648  ;;  %8662 = vrcp.f32 %v4860_v13  ;;  %v6299_v58 = vmul.f32 -1.442695, %v10887_v0  ;;  %v7321_v28 = vpop.f32.mrb[142].mxu0 }
 0x4cf   :  { %v8651_v52 = vpop.eup %8650  ;;  %v4863_v25 = vadd.f32 1.0, %v8649_v14  ;;  %8664 = vpow2.f32 %v6300_v18  ;;  %v10892_v49 = vadd.f32 %v7321_v28, %v10849_v6  ;;  %v4397_v33 = vpop.f32.mrb[143].mxu0 }
 0x4d0   :  { %v4862_v5 = vadd.f32 1.0, %v8651_v52  ;;  %8666 = vpow2.f32 %v6299_v58  ;;  %v10895_v27 = vadd.f32 %v10849_v6, %v4397_v33 }
 0x4d1   :  { %8668 = vrcp.f32 %v4863_v25  ;;  %v6302_v8 = vmul.f32 -1.442695, %v10892_v49 }
 0x4d2   :  { %8670 = vrcp.f32 %v4862_v5  ;;  %v6301_v7 = vmul.f32 -1.442695, %v10895_v27 }
 0x4d3   :  { %v8653_v30 = vpop.eup %8652  ;;  %8672 = vpow2.f32 %v6302_v8 }
 0x4d4   :  { %v8655_v35 = vpop.eup %8654  ;;  %8674 = vpow2.f32 %v6301_v7  ;;  %v5051_v41 = vmul.f32 %v8653_v30, %v10852_v40 }
 0x4d5   :  { %v8657_v55 = vpop.eup %8656  ;;  %v5050_v44 = vmul.f32 %v8655_v35, %v10855_v39  ;;  %v7324_v56 = vpop.f32.mrb[144].mxu0 }
 0x4d6   :  { %v8659_v12 = vpop.eup %8658  ;;  %v4865_v54 = vadd.f32 1.0, %v8657_v55  ;;  %v10902_v36 = vadd.f32 %v7324_v56, %v10849_v6  ;;  %v4407_v4 = vpop.f32.mrb[145].mxu0 }
 0x4d7   :  { %v8661_v43 = vpop.eup %8660  ;;  %v4864_v38 = vadd.f32 1.0, %v8659_v12  ;;  %v10905_v10 = vadd.f32 %v10849_v6, %v4407_v4  ;;  %7416 = vmatprep.mubr.msk.f32.mxu1 %vm123_vm0, %v5050_v44 }
 0x4d8   :  { %v8663_v32 = vpop.eup %8662  ;;  %8676 = vrcp.f32 %v4865_v54  ;;  %v6304_v45 = vmul.f32 -1.442695, %v10902_v36  ;;  %7417 = vmatmul.mubr.msk.f32.vlgmr.msra.gmra.mrb[124].mxu1 %vm123_vm0, %v5051_v41  ;;  %v5053_v61 = vmul.f32 %v8661_v43, %v10860_v1 }
 0x4d9   :  { %v8665_v24 = vpop.eup %8664  ;;  %v5052_v40 = vmul.f32 %v8663_v32, %v10863_v20  ;;  %8678 = vrcp.f32 %v4864_v38  ;;  %v6303_v23 = vmul.f32 -1.442695, %v10905_v10  ;;  %v7327_v39 = vpop.f32.mrb[146].mxu0 }
 0x4da   :  { %v8667_v50 = vpop.eup %8666  ;;  %v4867_v59 = vadd.f32 1.0, %v8665_v24  ;;  %8680 = vpow2.f32 %v6304_v45  ;;  %v10914_v34 = vadd.f32 %v7327_v39, %v10849_v6  ;;  %v4417_v60 = vpop.f32.mrb[147].mxu0 }
 0x4db   :  { %v8669_v11 = vpop.eup %8668  ;;  %v4866_v42 = vadd.f32 1.0, %v8667_v50  ;;  %8682 = vpow2.f32 %v6303_v23  ;;  %v10917_v17 = vadd.f32 %v10849_v6, %v4417_v60  ;;  %7419 = vmatprep.mubr.msk.f32.mxu1 %vm123_vm0, %v5052_v40 }
 0x4dc   :  { %v8671_v20 = vpop.eup %8670  ;;  %8684 = vrcp.f32 %v4867_v59  ;;  %v6306_v51 = vmul.f32 -1.442695, %v10914_v34  ;;  %7420 = vmatmul.mubr.msk.f32.gmra.mrb[126].mxu1 %vm123_vm0, %v5053_v61  ;;  %v5055_v31 = vmul.f32 %v8669_v11, %v10868_v16 }
 0x4dd   :  { %v8673_v1 = vpop.eup %8672  ;;  %v5054_v22 = vmul.f32 %v8671_v20, %v10871_v15  ;;  %8686 = vrcp.f32 %v4866_v42  ;;  %v6305_v47 = vmul.f32 -1.442695, %v10917_v17  ;;  %v7330_v3 = vpop.f32.mrb[148].mxu0 }
 0x4de   :  { %v8675_v2 = vpop.eup %8674  ;;  %v4869_v62 = vadd.f32 1.0, %v8673_v1  ;;  %8688 = vpow2.f32 %v6306_v51  ;;  %v10926_v63 = vadd.f32 %v7330_v3, %v10849_v6  ;;  %v4427_v29 = vpop.f32.mrb[149].mxu0 }
 0x4df   :  { %v4868_v19 = vadd.f32 1.0, %v8675_v2  ;;  %8690 = vpow2.f32 %v6305_v47  ;;  %v10929_v57 = vadd.f32 %v10849_v6, %v4427_v29  ;;  %7422 = vmatprep.mubr.msk.f32.mxu1 %vm123_vm0, %v5054_v22 }
 0x4e0   :  { %8692 = vrcp.f32 %v4869_v62  ;;  %v6308_v15 = vmul.f32 -1.442695, %v10926_v63  ;;  %7423 = vmatmul.mubr.msk.f32.gmra.mrb[128].mxu1 %vm123_vm0, %v5055_v31 }
 0x4e1   :  { %8694 = vrcp.f32 %v4868_v19  ;;  %v6307_v16 = vmul.f32 -1.442695, %v10929_v57  ;;  %v7333_v21 = vpop.f32.mrb[150].mxu0 }
 0x4e2   :  { %v8677_v9 = vpop.eup %8676  ;;  %8696 = vpow2.f32 %v6308_v15  ;;  %v10936_v48 = vadd.f32 %v7333_v21, %v10849_v6  ;;  %v4437_v46 = vpop.f32.mrb[151].mxu0 }
 0x4e3   :  { %v8679_v13 = vpop.eup %8678  ;;  %8698 = vpow2.f32 %v6307_v16  ;;  %v10939_v18 = vadd.f32 %v10849_v6, %v4437_v46  ;;  %v5057_v25 = vmul.f32 %v8677_v9, %v10876_v37 }
 0x4e4   :  { %v8681_v14 = vpop.eup %8680  ;;  %v5056_v58 = vmul.f32 %v8679_v13, %v10879_v53  ;;  %v6310_v28 = vmul.f32 -1.442695, %v10936_v48 }
 0x4e5   :  { %v8683_v52 = vpop.eup %8682  ;;  %v4871_v33 = vadd.f32 1.0, %v8681_v14  ;;  %v6309_v5 = vmul.f32 -1.442695, %v10939_v18  ;;  %v7336_v8 = vpop.f32.mrb[152].mxu0 }
 0x4e6   :  { %v8685_v7 = vpop.eup %8684  ;;  %v4870_v30 = vadd.f32 1.0, %v8683_v52  ;;  %8700 = vpow2.f32 %v6310_v28  ;;  %v10946_v35 = vadd.f32 %v7336_v8, %v10849_v6  ;;  %v4447_v55 = vpop.f32.mrb[153].mxu0  ;;  %7425 = vmatprep.mubr.msk.f32.mxu1 %vm123_vm0, %v5056_v58 }
 0x4e7   :  { %v8687_v44 = vpop.eup %8686  ;;  %8702 = vrcp.f32 %v4871_v33  ;;  %v10950_v53 = vadd.f32 %v10849_v6, %v4447_v55  ;;  %7426 = vmatmul.mubr.msk.f32.gmra.mrb[130].mxu1 %vm123_vm0, %v5057_v25  ;;  %v5059_v54 = vmul.f32 %v8685_v7, %v10884_v26 }
 0x4e8   :  { %v8689_v37 = vpop.eup %8688  ;;  %v5058_v56 = vmul.f32 %v8687_v44, %v10887_v0  ;;  %8704 = vrcp.f32 %v4870_v30  ;;  %v6312_v12 = vmul.f32 -1.442695, %v10946_v35 }
 0x4e9   :  { %v8691_v41 = vpop.eup %8690  ;;  %v4873_v4 = vadd.f32 1.0, %v8689_v37  ;;  %8706 = vpow2.f32 %v6309_v5  ;;  %v6311_v43 = vmul.f32 -1.442695, %v10950_v53  ;;  %v7339_v38 = vpop.f32.mrb[154].mxu0 }
 0x4ea   :  { %v8693_v32 = vpop.eup %8692  ;;  %v4872_v45 = vadd.f32 1.0, %v8691_v41  ;;  %8708 = vpow2.f32 %v6312_v12  ;;  %v10958_v24 = vadd.f32 %v7339_v38, %v10849_v6  ;;  %v4457_v40 = vpop.f32.mrb[155].mxu0  ;;  %7428 = vmatprep.mubr.msk.f32.mxu1 %vm123_vm0, %v5058_v56 }
 0x4eb   :  { %v8695_v0 = vpop.eup %8694  ;;  %8710 = vrcp.f32 %v4873_v4  ;;  %v10962_v23 = vadd.f32 %v10849_v6, %v4457_v40  ;;  %7429 = vmatmul.mubr.msk.f32.gmra.mrb[132].mxu1 %vm123_vm0, %v5059_v54  ;;  %v5061_v59 = vmul.f32 %v8693_v32, %v10892_v49 }
 0x4ec   :  { %v8697_v26 = vpop.eup %8696  ;;  %v5060_v39 = vmul.f32 %v8695_v0, %v10895_v27  ;;  %8712 = vrcp.f32 %v4872_v45  ;;  %v6314_v50 = vmul.f32 -1.442695, %v10958_v24 }
 0x4ed   :  { %v8699_v61 = vpop.eup %8698  ;;  %v4875_v60 = vadd.f32 1.0, %v8697_v26  ;;  %8714 = vpow2.f32 %v6311_v43  ;;  %v6313_v11 = vmul.f32 -1.442695, %v10962_v23 }
 0x4ee   :  { %v4874_v42 = vadd.f32 1.0, %v8699_v61  ;;  %8716 = vpow2.f32 %v6314_v50  ;;  %7431 = vmatprep.mubr.msk.f32.mxu1 %vm123_vm0, %v5060_v39 }
 0x4ef   :  { %8718 = vrcp.f32 %v4875_v60  ;;  %v7342_v20 = vpop.f32.mrb[156].mxu0  ;;  %7432 = vmatmul.mubr.msk.f32.gmra.mrb[134].mxu1 %vm123_vm0, %v5061_v59 }
 0x4f0   :  { %v8701_v51 = vpop.eup %8700  ;;  %8720 = vrcp.f32 %v4874_v42  ;;  %v10972_v27 = vadd.f32 %v7342_v20, %v10849_v6  ;;  %v4467_v1 = vpop.f32.mrb[157].mxu0 }
 0x4f1   :  { %v8703_v22 = vpop.eup %8702  ;;  %v4877_v49 = vadd.f32 1.0, %v8701_v51  ;;  %8722 = vpow2.f32 %v6313_v11  ;;  %v10975_v47 = vadd.f32 %v10849_v6, %v4467_v1 }
 0x4f2   :  { %v8705_v3 = vpop.eup %8704  ;;  %v6316_v2 = vmul.f32 -1.442695, %v10972_v27  ;;  %v5063_v16 = vmul.f32 %v8703_v22, %v10902_v36 }
 0x4f3   :  { %v8707_v31 = vpop.eup %8706  ;;  %v5062_v62 = vmul.f32 %v8705_v3, %v10905_v10  ;;  %8724 = vrcp.f32 %v4877_v49  ;;  %v6315_v29 = vmul.f32 -1.442695, %v10975_v47  ;;  %v7345_v19 = vpop.f32.mrb[158].mxu0 }
 0x4f4   :  { %v8709_v15 = vpop.eup %8708  ;;  %v4876_v21 = vadd.f32 1.0, %v8707_v31  ;;  %8726 = vpow2.f32 %v6316_v2  ;;  %v10982_v9 = vadd.f32 %v7345_v19, %v10849_v6  ;;  %v4477_v46 = vpop.f32.mrb[159].mxu0 }
 0x4f5   :  { %v8711_v13 = vpop.eup %8710  ;;  %v4879_v14 = vadd.f32 1.0, %v8709_v15  ;;  %8728 = vpow2.f32 %v6315_v29  ;;  %v10985_v58 = vadd.f32 %v10849_v6, %v4477_v46  ;;  %7434 = vmatprep.mubr.msk.f32.mxu1 %vm123_vm0, %v5062_v62 }
 0x4f6   :  { %v8713_v10 = vpop.eup %8712  ;;  %8730 = vrcp.f32 %v4876_v21  ;;  %v6318_v28 = vmul.f32 -1.442695, %v10982_v9  ;;  %7435 = vmatmul.mubr.msk.f32.gmra.mrb[136].mxu1 %vm123_vm0, %v5063_v16  ;;  %v5065_v8 = vmul.f32 %v8711_v13, %v10914_v34 }
 0x4f7   :  { %v8715_v36 = vpop.eup %8714  ;;  %v5064_v52 = vmul.f32 %v8713_v10, %v10917_v17  ;;  %8732 = vrcp.f32 %v4879_v14  ;;  %v6317_v25 = vmul.f32 -1.442695, %v10985_v58  ;;  %v7348_v33 = vpop.f32.mrb[160].mxu0 }
 0x4f8   :  { %v8717_v5 = vpop.eup %8716  ;;  %v4878_v7 = vadd.f32 1.0, %v8715_v36  ;;  %8734 = vpow2.f32 %v6318_v28  ;;  %v10994_v30 = vadd.f32 %v7348_v33, %v10849_v6  ;;  %v4487_v55 = vpop.f32.mrb[161].mxu0 }
 0x4f9   :  { %v8719_v44 = vpop.eup %8718  ;;  %v4881_v37 = vadd.f32 1.0, %v8717_v5  ;;  %8736 = vpow2.f32 %v6317_v25  ;;  %v10997_v56 = vadd.f32 %v10849_v6, %v4487_v55  ;;  %7437 = vmatprep.mubr.msk.f32.mxu1 %vm123_vm0, %v5064_v52 }
 0x4fa   :  { %v8721_v17 = vpop.eup %8720  ;;  %8738 = vrcp.f32 %v4878_v7  ;;  %v6320_v12 = vmul.f32 -1.442695, %v10994_v30  ;;  %7438 = vmatmul.mubr.msk.f32.gmra.mrb[138].mxu1 %vm123_vm0, %v5065_v8  ;;  %v5067_v43 = vmul.f32 %v8719_v44, %v10926_v63 }
 0x4fb   :  { %v8723_v34 = vpop.eup %8722  ;;  %v5066_v41 = vmul.f32 %v8721_v17, %v10929_v57  ;;  %8740 = vrcp.f32 %v4881_v37  ;;  %v6319_v54 = vmul.f32 -1.442695, %v10997_v56  ;;  %v7351_v4 = vpop.f32.mrb[162].mxu0 }
 0x4fc   :  { %v4880_v38 = vadd.f32 1.0, %v8723_v34  ;;  %8742 = vpow2.f32 %v6320_v12  ;;  %v11006_v32 = vadd.f32 %v7351_v4, %v10849_v6  ;;  %v4497_v45 = vpop.f32.mrb[163].mxu0 }
 0x4fd   :  { %v8725_v40 = vpop.eup %8724  ;;  %8744 = vpow2.f32 %v6319_v54  ;;  %v11009_v0 = vadd.f32 %v10849_v6, %v4497_v45  ;;  %7440 = vmatprep.mubr.msk.f32.mxu1 %vm123_vm0, %v5066_v41 }
 0x4fe   :  { %v8727_v57 = vpop.eup %8726  ;;  %8746 = vrcp.f32 %v4880_v38  ;;  %v6322_v26 = vmul.f32 -1.442695, %v11006_v32  ;;  %7441 = vmatmul.mubr.msk.f32.gmra.mrb[140].mxu1 %vm123_vm0, %v5067_v43  ;;  %v5069_v49 = vmul.f32 %v8725_v40, %v10936_v48 }
 0x4ff   :  { %v8729_v63 = vpop.eup %8728  ;;  %v4883_v39 = vadd.f32 1.0, %v8727_v57  ;;  %v6321_v50 = vmul.f32 -1.442695, %v11009_v0  ;;  %v7354_v61 = vpop.f32.mrb[164].mxu0 }
 0x500   :  { %v8731_v59 = vpop.eup %8730  ;;  %v4882_v60 = vadd.f32 1.0, %v8729_v63  ;;  %8748 = vpow2.f32 %v6322_v26  ;;  %v11016_v11 = vadd.f32 %v7354_v61, %v10849_v6  ;;  %v4507_v42 = vpop.f32.mrb[165].mxu0 }
 0x501   :  { %v8733_v20 = vpop.eup %8732  ;;  %v5068_v51 = vmul.f32 %v8731_v59, %v10939_v18  ;;  %8750 = vrcp.f32 %v4883_v39  ;;  %v11020_v1 = vadd.f32 %v10849_v6, %v4507_v42 }
 0x502   :  { %v8735_v22 = vpop.eup %8734  ;;  %8752 = vrcp.f32 %v4882_v60  ;;  %v6324_v3 = vmul.f32 -1.442695, %v11016_v11  ;;  %v5071_v14 = vmul.f32 %v8733_v20, %v10946_v35 }
 0x503   :  { %v8737_v2 = vpop.eup %8736  ;;  %v4885_v31 = vadd.f32 1.0, %v8735_v22  ;;  %8754 = vpow2.f32 %v6321_v50  ;;  %v6323_v62 = vmul.f32 -1.442695, %v11020_v1  ;;  %v7357_v29 = vpop.f32.mrb[166].mxu0  ;;  %7443 = vmatprep.mubr.msk.f32.mxu1 %vm123_vm0, %v5068_v51 }
 0x504   :  { %v8739_v19 = vpop.eup %8738  ;;  %v4884_v18 = vadd.f32 1.0, %v8737_v2  ;;  %8756 = vpow2.f32 %v6324_v3  ;;  %v11027_v15 = vadd.f32 %v7357_v29, %v10849_v6  ;;  %v4517_v16 = vpop.f32.mrb[167].mxu0  ;;  %7444 = vmatmul.mubr.msk.f32.gmra.mrb[142].mxu1 %vm123_vm0, %v5069_v49 }
 0x505   :  { %v8741_v48 = vpop.eup %8740  ;;  %v5070_v21 = vmul.f32 %v8739_v19, %v10950_v53  ;;  %8758 = vrcp.f32 %v4885_v31  ;;  %v11032_v46 = vadd.f32 %v10849_v6, %v4517_v16 }
 0x506   :  { %v8743_v13 = vpop.eup %8742  ;;  %8760 = vrcp.f32 %v4884_v18  ;;  %v6326_v10 = vmul.f32 -1.442695, %v11027_v15  ;;  %v5073_v55 = vmul.f32 %v8741_v48, %v10958_v24 }
 0x507   :  { %v8745_v28 = vpop.eup %8744  ;;  %v4887_v36 = vadd.f32 1.0, %v8743_v13  ;;  %8762 = vpow2.f32 %v6323_v62  ;;  %v6325_v52 = vmul.f32 -1.442695, %v11032_v46  ;;  %7446 = vmatprep.mubr.msk.f32.mxu1 %vm123_vm0, %v5070_v21 }
 0x508   :  { %v8747_v25 = vpop.eup %8746  ;;  %v4886_v33 = vadd.f32 1.0, %v8745_v28  ;;  %8764 = vpow2.f32 %v6326_v10  ;;  %v7360_v53 = vpop.f32.mrb[168].mxu0  ;;  %7447 = vmatmul.mubr.msk.f32.gmra.mrb[144].mxu1 %vm123_vm0, %v5071_v14 }
 0x509   :  { %v5072_v5 = vmul.f32 %v8747_v25, %v10962_v23  ;;  %8766 = vrcp.f32 %v4887_v36  ;;  %v11041_v35 = vadd.f32 %v7360_v53, %v10849_v6  ;;  %v4527_v8 = vpop.f32.mrb[169].mxu0 }
 0x50a   :  { %v8749_v7 = vpop.eup %8748  ;;  %8768 = vrcp.f32 %v4886_v33  ;;  %v11045_v44 = vadd.f32 %v10849_v6, %v4527_v8 }
 0x50b   :  { %v8751_v37 = vpop.eup %8750  ;;  %v4889_v17 = vadd.f32 1.0, %v8749_v7  ;;  %8770 = vpow2.f32 %v6325_v52  ;;  %v6328_v12 = vmul.f32 -1.442695, %v11041_v35  ;;  %7449 = vmatprep.mubr.msk.f32.mxu1 %vm123_vm0, %v5072_v5 }
 0x50c   :  { %v8753_v23 = vpop.eup %8752  ;;  %v6327_v34 = vmul.f32 -1.442695, %v11045_v44  ;;  %v7363_v41 = vpop.f32.mrb[170].mxu0  ;;  %7450 = vmatmul.mubr.msk.f32.gmra.mrb[146].mxu1 %vm123_vm0, %v5073_v55  ;;  %v5075_v45 = vmul.f32 %v8751_v37, %v10972_v27 }
 0x50d   :  { %v8755_v54 = vpop.eup %8754  ;;  %v5074_v24 = vmul.f32 %v8753_v23, %v10975_v47  ;;  %8772 = vrcp.f32 %v4889_v17  ;;  %v11053_v4 = vadd.f32 %v7363_v41, %v10849_v6  ;;  %v4537_v43 = vpop.f32.mrb[171].mxu0 }
 0x50e   :  { %v8757_v38 = vpop.eup %8756  ;;  %v4888_v40 = vadd.f32 1.0, %v8755_v54  ;;  %8774 = vpow2.f32 %v6328_v12  ;;  %v11057_v57 = vadd.f32 %v10849_v6, %v4537_v43 }
 0x50f   :  { %v8759_v26 = vpop.eup %8758  ;;  %v4891_v63 = vadd.f32 1.0, %v8757_v38  ;;  %8776 = vpow2.f32 %v6327_v34  ;;  %v6330_v39 = vmul.f32 -1.442695, %v11053_v4  ;;  %7452 = vmatprep.mubr.msk.f32.mxu1 %vm123_vm0, %v5074_v24 }
 0x510   :  { %v8761_v47 = vpop.eup %8760  ;;  %8778 = vrcp.f32 %v4888_v40  ;;  %v6329_v50 = vmul.f32 -1.442695, %v11057_v57  ;;  %v7366_v61 = vpop.f32.mrb[172].mxu0  ;;  %7453 = vmatmul.mubr.msk.f32.gmra.mrb[148].mxu1 %vm123_vm0, %v5075_v45  ;;  %v5077_v51 = vmul.f32 %v8759_v26, %v10982_v9 }
 0x511   :  { %v8763_v27 = vpop.eup %8762  ;;  %v5076_v59 = vmul.f32 %v8761_v47, %v10985_v58  ;;  %8780 = vrcp.f32 %v4891_v63  ;;  %v11065_v60 = vadd.f32 %v7366_v61, %v10849_v6  ;;  %v4547_v42 = vpop.f32.mrb[173].mxu0 }
 0x512   :  { %v8765_v20 = vpop.eup %8764  ;;  %v4890_v22 = vadd.f32 1.0, %v8763_v27  ;;  %8782 = vpow2.f32 %v6330_v39  ;;  %v11069_v49 = vadd.f32 %v10849_v6, %v4547_v42 }
 0x513   :  { %v8767_v3 = vpop.eup %8766  ;;  %v4893_v2 = vadd.f32 1.0, %v8765_v20  ;;  %8784 = vpow2.f32 %v6329_v50  ;;  %v6332_v31 = vmul.f32 -1.442695, %v11065_v60  ;;  %7455 = vmatprep.mubr.msk.f32.mxu1 %vm123_vm0, %v5076_v59 }
 0x514   :  { %v8769_v58 = vpop.eup %8768  ;;  %8786 = vrcp.f32 %v4890_v22  ;;  %v6331_v62 = vmul.f32 -1.442695, %v11069_v49  ;;  %v7369_v29 = vpop.f32.mrb[174].mxu0  ;;  %7456 = vmatmul.mubr.msk.f32.gmra.mrb[150].mxu1 %vm123_vm0, %v5077_v51  ;;  %v5079_v48 = vmul.f32 %v8767_v3, %v10994_v30 }
 0x515   :  { %v8771_v9 = vpop.eup %8770  ;;  %v5078_v19 = vmul.f32 %v8769_v58, %v10997_v56  ;;  %8788 = vrcp.f32 %v4893_v2  ;;  %v11077_v18 = vadd.f32 %v7369_v29, %v10849_v6  ;;  %v4557_v16 = vpop.f32.mrb[175].mxu0 }
 0x516   :  { %v4892_v21 = vadd.f32 1.0, %v8771_v9  ;;  %8790 = vpow2.f32 %v6332_v31  ;;  %v11081_v13 = vadd.f32 %v10849_v6, %v4557_v16 }
 0x517   :  { %v8773_v14 = vpop.eup %8772  ;;  %8792 = vpow2.f32 %v6331_v62  ;;  %v6334_v10 = vmul.f32 -1.442695, %v11077_v18  ;;  %7458 = vmatprep.mubr.msk.f32.mxu1 %vm123_vm0, %v5078_v19 }
 0x518   :  { %v8775_v28 = vpop.eup %8774  ;;  %8794 = vrcp.f32 %v4892_v21  ;;  %v6333_v56 = vmul.f32 -1.442695, %v11081_v13  ;;  %v7372_v36 = vpop.f32.mrb[176].mxu0  ;;  %7459 = vmatmul.mubr.msk.f32.gmra.mrb[152].mxu1 %vm123_vm0, %v5079_v48  ;;  %v5081_v12 = vmul.f32 %v8773_v14, %v11006_v32 }
 0x519   :  { %v8777_v52 = vpop.eup %8776  ;;  %v4895_v30 = vadd.f32 1.0, %v8775_v28  ;;  %8796 = vpow2.f32 %v6334_v10  ;;  %v11088_v25 = vadd.f32 %v7372_v36, %v10849_v6  ;;  %v4567_v33 = vpop.f32.mrb[177].mxu0 }
 0x51a   :  { %v8779_v53 = vpop.eup %8778  ;;  %v4894_v5 = vadd.f32 1.0, %v8777_v52  ;;  %8798 = vpow2.f32 %v6333_v56  ;;  %v11091_v8 = vadd.f32 %v10849_v6, %v4567_v33 }
 0x51b   :  { %v8781_v7 = vpop.eup %8780  ;;  %v5080_v55 = vmul.f32 %v8779_v53, %v11009_v0  ;;  %8800 = vrcp.f32 %v4895_v30  ;;  %v6336_v37 = vmul.f32 -1.442695, %v11088_v25 }
 0x51c   :  { %v8783_v17 = vpop.eup %8782  ;;  %8802 = vrcp.f32 %v4894_v5  ;;  %v6335_v23 = vmul.f32 -1.442695, %v11091_v8  ;;  %v7375_v34 = vpop.f32.mrb[178].mxu0  ;;  %v5083_v39 = vmul.f32 %v8781_v7, %v11016_v11 }
 0x51d   :  { %v8785_v41 = vpop.eup %8784  ;;  %v4897_v54 = vadd.f32 1.0, %v8783_v17  ;;  %8804 = vpow2.f32 %v6336_v37  ;;  %v11098_v24 = vadd.f32 %v7375_v34, %v10849_v6  ;;  %7461 = vmatprep.mubr.msk.f32.mxu1 %vm123_vm0, %v5080_v55  ;;  %v4577_v43 = vpop.f32.mrb[179].mxu0 }
 0x51e   :  { %v8787_v0 = vpop.eup %8786  ;;  %v4896_v38 = vadd.f32 1.0, %v8785_v41  ;;  %8806 = vpow2.f32 %v6335_v23  ;;  %v11102_v45 = vadd.f32 %v10849_v6, %v4577_v43  ;;  %7462 = vmatmul.mubr.msk.f32.gmra.mrb[154].mxu1 %vm123_vm0, %v5081_v12 }
 0x51f   :  { %v8789_v32 = vpop.eup %8788  ;;  %v5082_v40 = vmul.f32 %v8787_v0, %v11020_v1  ;;  %8808 = vrcp.f32 %v4897_v54  ;;  %v6338_v26 = vmul.f32 -1.442695, %v11098_v24 }
 0x520   :  { %v8791_v63 = vpop.eup %8790  ;;  %8810 = vrcp.f32 %v4896_v38  ;;  %v6337_v47 = vmul.f32 -1.442695, %v11102_v45  ;;  %v5085_v3 = vmul.f32 %v8789_v32, %v11027_v15 }
 0x521   :  { %v8793_v50 = vpop.eup %8792  ;;  %v4899_v61 = vadd.f32 1.0, %v8791_v63  ;;  %8812 = vpow2.f32 %v6338_v26  ;;  %7464 = vmatprep.mubr.msk.f32.mxu1 %vm123_vm0, %v5082_v40 }
 0x522   :  { %v8795_v27 = vpop.eup %8794  ;;  %v4898_v59 = vadd.f32 1.0, %v8793_v50  ;;  %8814 = vpow2.f32 %v6337_v47  ;;  %v7378_v42 = vpop.f32.mrb[180].mxu0  ;;  %7465 = vmatmul.mubr.msk.f32.gmra.mrb[156].mxu1 %vm123_vm0, %v5083_v39 }
 0x523   :  { %v8797_v1 = vpop.eup %8796  ;;  %v5084_v20 = vmul.f32 %v8795_v27, %v11032_v46  ;;  %8816 = vrcp.f32 %v4899_v61  ;;  %v11113_v11 = vadd.f32 %v7378_v42, %v10849_v6  ;;  %v4587_v51 = vpop.f32.mrb[181].mxu0 }
 0x524   :  { %v8799_v22 = vpop.eup %8798  ;;  %8818 = vrcp.f32 %v4898_v59  ;;  %v4901_v2 = vadd.f32 1.0, %v8797_v1  ;;  %v11117_v31 = vadd.f32 %v10849_v6, %v4587_v51 }
 0x525   :  { %v8801_v58 = vpop.eup %8800  ;;  %v4900_v62 = vadd.f32 1.0, %v8799_v22  ;;  %v6340_v29 = vmul.f32 -1.442695, %v11113_v11  ;;  %7467 = vmatprep.mubr.msk.f32.mxu1 %vm123_vm0, %v5084_v20 }
 0x526   :  { %v8803_v46 = vpop.eup %8802  ;;  %8820 = vrcp.f32 %v4901_v2  ;;  %v6339_v9 = vmul.f32 -1.442695, %v11117_v31  ;;  %v7381_v19 = vpop.f32.mrb[182].mxu0  ;;  %7468 = vmatmul.mubr.msk.f32.gmra.mrb[158].mxu1 %vm123_vm0, %v5085_v3  ;;  %v5087_v10 = vmul.f32 %v8801_v58, %v11041_v35 }
 0x527   :  { %v8805_v16 = vpop.eup %8804  ;;  %v5086_v15 = vmul.f32 %v8803_v46, %v11045_v44  ;;  %8822 = vrcp.f32 %v4900_v62  ;;  %v11125_v48 = vadd.f32 %v7381_v19, %v10849_v6  ;;  %v4597_v21 = vpop.f32.mrb[183].mxu0 }
 0x528   :  { %v8807_v14 = vpop.eup %8806  ;;  %v4903_v28 = vadd.f32 1.0, %v8805_v16  ;;  %8824 = vpow2.f32 %v6340_v29  ;;  %v11129_v56 = vadd.f32 %v10849_v6, %v4597_v21 }
 0x529   :  { %v8809_v36 = vpop.eup %8808  ;;  %v4902_v52 = vadd.f32 1.0, %v8807_v14  ;;  %8826 = vpow2.f32 %v6339_v9  ;;  %v6342_v30 = vmul.f32 -1.442695, %v11125_v48  ;;  %7470 = vmatprep.mubr.msk.f32.mxu1 %vm123_vm0, %v5086_v15 }
 0x52a   :  { %v8811_v44 = vpop.eup %8810  ;;  %8828 = vrcp.f32 %v4903_v28  ;;  %v6341_v33 = vmul.f32 -1.442695, %v11129_v56  ;;  %v7384_v53 = vpop.f32.mrb[184].mxu0  ;;  %7471 = vmatmul.mubr.msk.f32.gmra.mrb[160].mxu1 %vm123_vm0, %v5087_v10  ;;  %v5089_v17 = vmul.f32 %v8809_v36, %v11053_v4 }
 0x52b   :  { %v8813_v35 = vpop.eup %8812  ;;  %v5088_v5 = vmul.f32 %v8811_v44, %v11057_v57  ;;  %8830 = vrcp.f32 %v4902_v52  ;;  %v11137_v7 = vadd.f32 %v7384_v53, %v10849_v6  ;;  %v4607_v55 = vpop.f32.mrb[185].mxu0 }
 0x52c   :  { %v8815_v37 = vpop.eup %8814  ;;  %v4905_v12 = vadd.f32 1.0, %v8813_v35  ;;  %8832 = vpow2.f32 %v6342_v30  ;;  %v11141_v23 = vadd.f32 %v10849_v6, %v4607_v55 }
 0x52d   :  { %v8817_v34 = vpop.eup %8816  ;;  %v4904_v41 = vadd.f32 1.0, %v8815_v37  ;;  %8834 = vpow2.f32 %v6341_v33  ;;  %v6344_v54 = vmul.f32 -1.442695, %v11137_v7  ;;  %7473 = vmatprep.mubr.msk.f32.mxu1 %vm123_vm0, %v5088_v5 }
 0x52e   :  { %v8819_v57 = vpop.eup %8818  ;;  %8836 = vrcp.f32 %v4905_v12  ;;  %v6343_v43 = vmul.f32 -1.442695, %v11141_v23  ;;  %v7387_v0 = vpop.f32.mrb[186].mxu0  ;;  %7474 = vmatmul.mubr.msk.f32.gmra.mrb[162].mxu1 %vm123_vm0, %v5089_v17  ;;  %v5091_v26 = vmul.f32 %v8817_v34, %v11065_v60 }
 0x52f   :  { %v5090_v4 = vmul.f32 %v8819_v57, %v11069_v49  ;;  %8838 = vrcp.f32 %v4904_v41  ;;  %v11149_v38 = vadd.f32 %v7387_v0, %v10849_v6  ;;  %v4617_v32 = vpop.f32.mrb[187].mxu0 }
 0x530   :  { %v8821_v40 = vpop.eup %8820  ;;  %8840 = vpow2.f32 %v6344_v54  ;;  %v11153_v63 = vadd.f32 %v10849_v6, %v4617_v32 }
 0x531   :  { %v8823_v39 = vpop.eup %8822  ;;  %8842 = vpow2.f32 %v6343_v43  ;;  %v6346_v47 = vmul.f32 -1.442695, %v11149_v38  ;;  %7476 = vmatprep.mubr.msk.f32.mxu1 %vm123_vm0, %v5090_v4  ;;  %v5093_v51 = vmul.f32 %v8821_v40, %v11077_v18 }
 0x532   :  { %v8825_v50 = vpop.eup %8824  ;;  %v5092_v49 = vmul.f32 %v8823_v39, %v11081_v13  ;;  %v6345_v61 = vmul.f32 -1.442695, %v11153_v63  ;;  %v7390_v27 = vpop.f32.mrb[188].mxu0  ;;  %7477 = vmatmul.mubr.msk.f32.gmra.mrb[164].mxu1 %vm123_vm0, %v5091_v26 }
 0x533   :  { %v8827_v59 = vpop.eup %8826  ;;  %v4907_v60 = vadd.f32 1.0, %v8825_v50  ;;  %8844 = vpow2.f32 %v6346_v47  ;;  %v11161_v42 = vadd.f32 %v7390_v27, %v10849_v6  ;;  %v4627_v1 = vpop.f32.mrb[189].mxu0 }
 0x534   :  { %v8829_v20 = vpop.eup %8828  ;;  %v4906_v22 = vadd.f32 1.0, %v8827_v59  ;;  %8846 = vpow2.f32 %v6345_v61  ;;  %v11165_v3 = vadd.f32 %v10849_v6, %v4627_v1  ;;  %7479 = vmatprep.mubr.msk.f32.mxu1 %vm123_vm0, %v5092_v49  ;;  %v8900_v6 = vld [vmem:[%s11568_s10] ss:$0 sm:$0xff] }
 0x535   :  { %v8831_v13 = vpop.eup %8830  ;;  %8848 = vrcp.f32 %v4907_v60  ;;  %v6348_v2 = vmul.f32 -1.442695, %v11161_v42  ;;  %v5095_v21 = vmul.f32 %v8829_v20, %v11088_v25 }
 0x536   :  { %v8833_v58 = vpop.eup %8832  ;;  %v5094_v62 = vmul.f32 %v8831_v13, %v11091_v8  ;;  %8850 = vrcp.f32 %v4906_v22  ;;  %v6347_v29 = vmul.f32 -1.442695, %v11165_v3  ;;  %v7393_v46 = vpop.f32.mrb[190].mxu0  ;;  %7480 = vmatmul.mubr.msk.f32.gmra.mrb[166].mxu1 %vm123_vm0, %v5093_v51 }
 0x537   :  { %v8835_v18 = vpop.eup %8834  ;;  %v4909_v9 = vadd.f32 1.0, %v8833_v58  ;;  %8852 = vpow2.f32 %v6348_v2  ;;  %v11175_v19 = vadd.f32 %v8900_v6, %v7393_v46  ;;  %v4637_v16 = vpop.f32.mrb[191].mxu0 }
 0x538   :  { %v8837_v15 = vpop.eup %8836  ;;  %v4908_v8 = vadd.f32 1.0, %v8835_v18  ;;  %8854 = vpow2.f32 %v6347_v29  ;;  %v11178_v14 = vadd.f32 %v8900_v6, %v4637_v16  ;;  %7482 = vmatprep.mubr.msk.f32.mxu1 %vm123_vm0, %v5094_v62 }
 0x539   :  { %v8839_v10 = vpop.eup %8838  ;;  %8856 = vrcp.f32 %v4909_v9  ;;  %v6350_v28 = vmul.f32 -1.442695, %v11175_v19  ;;  %v5097_v5 = vmul.f32 %v8837_v15, %v11098_v24 }
 0x53a   :  { %v8841_v36 = vpop.eup %8840  ;;  %v5096_v52 = vmul.f32 %v8839_v10, %v11102_v45  ;;  %8858 = vrcp.f32 %v4908_v8  ;;  %v6349_v30 = vmul.f32 -1.442695, %v11178_v14  ;;  %v7396_v44 = vpop.f32.mrb[192].mxu0  ;;  %7483 = vmatmul.mubr.msk.f32.gmra.mrb[168].mxu1 %vm123_vm0, %v5095_v21 }
 0x53b   :  { %v8843_v25 = vpop.eup %8842  ;;  %v4911_v33 = vadd.f32 1.0, %v8841_v36  ;;  %8860 = vpow2.f32 %v6350_v28  ;;  %v11185_v53 = vadd.f32 %v8900_v6, %v7396_v44  ;;  %v4647_v35 = vpop.f32.mrb[193].mxu0 }
 0x53c   :  { %v4910_v55 = vadd.f32 1.0, %v8843_v25  ;;  %8862 = vpow2.f32 %v6349_v30  ;;  %v11188_v37 = vadd.f32 %v8900_v6, %v4647_v35  ;;  %7485 = vmatprep.mubr.msk.f32.mxu1 %vm123_vm0, %v5096_v52 }
 0x53d   :  { %v8845_v45 = vpop.eup %8844  ;;  %8864 = vrcp.f32 %v4911_v33  ;;  %v6352_v17 = vmul.f32 -1.442695, %v11185_v53 }
 0x53e   :  { %v8847_v12 = vpop.eup %8846  ;;  %8866 = vrcp.f32 %v4910_v55  ;;  %v4913_v34 = vadd.f32 1.0, %v8845_v45  ;;  %v6351_v41 = vmul.f32 -1.442695, %v11188_v37  ;;  %v7399_v54 = vpop.f32.mrb[194].mxu0  ;;  %7486 = vmatmul.mubr.msk.f32.gmra.mrb[170].mxu1 %vm123_vm0, %v5097_v5  ;;  %v11235_v5 = vld [vmem:[%s11569_s12] ss:$0 sm:$0xff] }
 0x53f   :  { %v8849_v57 = vpop.eup %8848  ;;  %v4912_v24 = vadd.f32 1.0, %v8847_v12  ;;  %8868 = vpow2.f32 %v6352_v17  ;;  %v11194_v43 = vadd.f32 %v8900_v6, %v7399_v54  ;;  %v4657_v0 = vpop.f32.mrb[195].mxu0 }
 0x540   :  { %v8851_v4 = vpop.eup %8850  ;;  %8870 = vrcp.f32 %v4913_v34  ;;  %v11196_v32 = vadd.f32 %v8900_v6, %v4657_v0  ;;  %v5099_v50 = vmul.f32 %v8849_v57, %v11113_v11 }
 0x541   :  { %v8853_v40 = vpop.eup %8852  ;;  %v5098_v26 = vmul.f32 %v8851_v4, %v11117_v31  ;;  %8872 = vrcp.f32 %v4912_v24  ;;  %v6354_v39 = vmul.f32 -1.442695, %v11194_v43 }
 0x542   :  { %v8855_v47 = vpop.eup %8854  ;;  %v4915_v49 = vadd.f32 1.0, %v8853_v40  ;;  %8874 = vpow2.f32 %v6351_v41  ;;  %v6353_v61 = vmul.f32 -1.442695, %v11196_v32 }
 0x543   :  { %v8857_v27 = vpop.eup %8856  ;;  %v4914_v59 = vadd.f32 1.0, %v8855_v47  ;;  %8876 = vpow2.f32 %v6354_v39  ;;  %7488 = vmatprep.mubr.msk.f32.mxu1 %vm123_vm0, %v5098_v26 }
 0x544   :  { %v8859_v60 = vpop.eup %8858  ;;  %8878 = vrcp.f32 %v4915_v49  ;;  %7489 = vmatmul.mubr.msk.f32.gmra.mrb[172].mxu1 %vm123_vm0, %v5099_v50  ;;  %v5101_v11 = vmul.f32 %v8857_v27, %v11125_v48 }
 0x545   :  { %v8861_v31 = vpop.eup %8860  ;;  %v5100_v1 = vmul.f32 %v8859_v60, %v11129_v56  ;;  %8880 = vrcp.f32 %v4914_v59 }
 0x546   :  { %v8863_v20 = vpop.eup %8862  ;;  %v4917_v51 = vadd.f32 1.0, %v8861_v31  ;;  %8882 = vpow2.f32 %v6353_v61 }
 0x547   :  { %v8865_v22 = vpop.eup %8864  ;;  %v4916_v13 = vadd.f32 1.0, %v8863_v20  ;;  %7491 = vmatprep.mubr.msk.f32.mxu1 %vm123_vm0, %v5100_v1 }
 0x548   :  { %v8867_v2 = vpop.eup %8866  ;;  %8884 = vrcp.f32 %v4917_v51  ;;  %7492 = vmatmul.mubr.msk.f32.gmra.mrb[174].mxu1 %vm123_vm0, %v5101_v11  ;;  %v5103_v56 = vmul.f32 %v8865_v22, %v11137_v7 }
 0x549   :  { %v8869_v58 = vpop.eup %8868  ;;  %v5102_v62 = vmul.f32 %v8867_v2, %v11141_v23  ;;  %8886 = vrcp.f32 %v4916_v13 }
 0x54a   :  { %v8871_v29 = vpop.eup %8870  ;;  %v4919_v46 = vadd.f32 1.0, %v8869_v58 }
 0x54b   :  { %v8873_v18 = vpop.eup %8872  ;;  %7494 = vmatprep.mubr.msk.f32.mxu1 %vm123_vm0, %v5102_v62  ;;  %v5105_v21 = vmul.f32 %v8871_v29, %v11149_v38 }
 0x54c   :  { %v8875_v48 = vpop.eup %8874  ;;  %v5104_v9 = vmul.f32 %v8873_v18, %v11153_v63  ;;  %7495 = vmatmul.mubr.msk.f32.gmra.mrb[176].mxu1 %vm123_vm0, %v5103_v56  ;;  %8888 = vrcp.f32 %v4919_v46 }
 0x54d   :  { %v8877_v6 = vpop.eup %8876  ;;  %v4918_v16 = vadd.f32 1.0, %v8875_v48 }
 0x54e   :  { %v8879_v15 = vpop.eup %8878  ;;  %v4921_v23 = vadd.f32 1.0, %v8877_v6  ;;  %7497 = vmatprep.mubr.msk.f32.mxu1 %vm123_vm0, %v5104_v9 }
 0x54f   :  { %v8881_v8 = vpop.eup %8880  ;;  %8890 = vrcp.f32 %v4918_v16  ;;  %v5107_v36 = vmul.f32 %v8879_v15, %v11161_v42 }
 0x550   :  { %v8883_v7 = vpop.eup %8882  ;;  %v5106_v10 = vmul.f32 %v8881_v8, %v11165_v3  ;;  %7498 = vmatmul.mubr.msk.f32.gmra.mrb[178].mxu1 %vm123_vm0, %v5105_v21  ;;  %8892 = vrcp.f32 %v4921_v23 }
 0x551   :  { %v4920_v28 = vadd.f32 1.0, %v8883_v7 }
 0x552   :  { %v8885_v63 = vpop.eup %8884  ;;  %7500 = vmatprep.mubr.msk.f32.mxu1 %vm123_vm0, %v5106_v10 }
 0x553   :  { %v8887_v52 = vpop.eup %8886  ;;  %8894 = vrcp.f32 %v4920_v28  ;;  %v5109_v30 = vmul.f32 %v8885_v63, %v11175_v19 }
 0x554   :  { %v5108_v38 = vmul.f32 %v8887_v52, %v11178_v14  ;;  %7501 = vmatmul.mubr.msk.f32.gmra.mrb[180].mxu1 %vm123_vm0, %v5107_v36 }
 0x556   :  { %7503 = vmatprep.mubr.msk.f32.mxu1 %vm123_vm0, %v5108_v38  ;;  %v8889_v3 = vpop.eup %8888 }
 0x557   :  { %v5111_v42 = vmul.f32 %v8889_v3, %v11185_v53 }
 0x558   :  { %7504 = vmatmul.mubr.msk.f32.gmra.mrb[182].mxu1 %vm123_vm0, %v5109_v30 }
 0x559   :  { %v8891_v44 = vpop.eup %8890 }
 0x55a   :  { %v5110_v25 = vmul.f32 %v8891_v44, %v11188_v37  ;;  %v8893_v33 = vpop.eup %8892 }
 0x55b   :  { %v5113_v19 = vmul.f32 %v8893_v33, %v11194_v43 }
 0x55c   :  { %7506 = vmatprep.mubr.msk.f32.mxu1 %vm123_vm0, %v5110_v25 }
 0x55d   :  { %v8895_v35 = vpop.eup %8894  ;;  %7507 = vmatmul.mubr.msk.f32.gmra.mrb[184].mxu1 %vm123_vm0, %v5111_v42 }
 0x55e   :  { %v5112_v14 = vmul.f32 %v8895_v35, %v11196_v32 }
 0x560   :  { %7509 = vmatprep.mubr.msk.f32.mxu1 %vm123_vm0, %v5112_v14 }
 0x561   :  { %7510 = vmatmul.mubr.msk.f32.gmra.mrb[186].mxu1 %vm123_vm0, %v5113_v19 }
 0x5ab   :  { %v7418_v53 = vpop.f32.mrb[124].mxu1 }
 0x5ac   :  { %v5393_v55 = vadd.f32 %v7418_v53, %v11235_v5  ;;  %v5387_v37 = vpop.f32.mrb[125].mxu1 }
 0x5ad   :  { %v5388_v45 = vadd.f32 %v11235_v5, %v5387_v37 }
 0x5ae   :  { %5707 = vst.msk [vmem:[%s11570_s13 + $0x8] sm:$0xff] %vm123_vm0, %v5393_v55 }
 0x5af   :  { %5706 = vst.msk [vmem:[%s11570_s13] sm:$0xff] %vm123_vm0, %v5388_v45  ;;  %v7421_v17 = vpop.f32.mrb[126].mxu1 }
 0x5b0   :  { %v5403_v12 = vadd.f32 %v7421_v17, %v11235_v5  ;;  %v5397_v34 = vpop.f32.mrb[127].mxu1 }
 0x5b1   :  { %v5398_v41 = vadd.f32 %v11235_v5, %v5397_v34 }
 0x5b2   :  { %5709 = vst.msk [vmem:[%s11570_s13 + $0x18] sm:$0xff] %vm123_vm0, %v5403_v12 }
 0x5b3   :  { %5708 = vst.msk [vmem:[%s11570_s13 + $0x10] sm:$0xff] %vm123_vm0, %v5398_v41  ;;  %v7424_v54 = vpop.f32.mrb[128].mxu1 }
 0x5b4   :  { %v5413_v57 = vadd.f32 %v7424_v54, %v11235_v5  ;;  %v5407_v24 = vpop.f32.mrb[129].mxu1 }
 0x5b5   :  { %v5408_v43 = vadd.f32 %v11235_v5, %v5407_v24 }
 0x5b6   :  { %5711 = vst.msk [vmem:[%s11570_s13 + $0x28] sm:$0xff] %vm123_vm0, %v5413_v57 }
 0x5b7   :  { %5710 = vst.msk [vmem:[%s11570_s13 + $0x20] sm:$0xff] %vm123_vm0, %v5408_v43 }
 0x5ba   :  { %v7427_v0 = vpop.f32.mrb[130].mxu1 }
 0x5bb   :  { %v5423_v4 = vadd.f32 %v7427_v0, %v11235_v5  ;;  %v5417_v32 = vpop.f32.mrb[131].mxu1 }
 0x5bc   :  { %v5418_v40 = vadd.f32 %v11235_v5, %v5417_v32 }
 0x5bd   :  { %5713 = vst.msk [vmem:[%s11570_s13 + $0x38] sm:$0xff] %vm123_vm0, %v5423_v4 }
 0x5be   :  { %5712 = vst.msk [vmem:[%s11570_s13 + $0x30] sm:$0xff] %vm123_vm0, %v5418_v40  ;;  %v7430_v26 = vpop.f32.mrb[132].mxu1 }
 0x5bf   :  { %v5433_v39 = vadd.f32 %v7430_v26, %v11235_v5  ;;  %v5427_v47 = vpop.f32.mrb[133].mxu1 }
 0x5c0   :  { %v5428_v50 = vadd.f32 %v11235_v5, %v5427_v47 }
 0x5c1   :  { %5715 = vst.msk [vmem:[%s11570_s13 + $0x48] sm:$0xff] %vm123_vm0, %v5433_v39 }
 0x5c2   :  { %5714 = vst.msk [vmem:[%s11570_s13 + $0x40] sm:$0xff] %vm123_vm0, %v5428_v50  ;;  %v7433_v49 = vpop.f32.mrb[134].mxu1 }
 0x5c3   :  { %v5443_v61 = vadd.f32 %v7433_v49, %v11235_v5  ;;  %v5437_v27 = vpop.f32.mrb[135].mxu1 }
 0x5c4   :  { %v5438_v59 = vadd.f32 %v11235_v5, %v5437_v27 }
 0x5c5   :  { %5717 = vst.msk [vmem:[%s11570_s13 + $0x58] sm:$0xff] %vm123_vm0, %v5443_v61 }
 0x5c6   :  { %5716 = vst.msk [vmem:[%s11570_s13 + $0x50] sm:$0xff] %vm123_vm0, %v5438_v59 }
 0x5c9   :  { %v7436_v60 = vpop.f32.mrb[136].mxu1 }
 0x5ca   :  { %v5453_v31 = vadd.f32 %v7436_v60, %v11235_v5  ;;  %v5447_v1 = vpop.f32.mrb[137].mxu1 }
 0x5cb   :  { %v5448_v20 = vadd.f32 %v11235_v5, %v5447_v1 }
 0x5cc   :  { %5719 = vst.msk [vmem:[%s11570_s13 + $0x68] sm:$0xff] %vm123_vm0, %v5453_v31 }
 0x5cd   :  { %5718 = vst.msk [vmem:[%s11570_s13 + $0x60] sm:$0xff] %vm123_vm0, %v5448_v20  ;;  %v7439_v11 = vpop.f32.mrb[138].mxu1 }
 0x5ce   :  { %v5463_v51 = vadd.f32 %v7439_v11, %v11235_v5  ;;  %v5457_v22 = vpop.f32.mrb[139].mxu1 }
 0x5cf   :  { %v5458_v13 = vadd.f32 %v11235_v5, %v5457_v22 }
 0x5d0   :  { %5721 = vst.msk [vmem:[%s11570_s13 + $0x78] sm:$0xff] %vm123_vm0, %v5463_v51 }
 0x5d1   :  { %5720 = vst.msk [vmem:[%s11570_s13 + $0x70] sm:$0xff] %vm123_vm0, %v5458_v13  ;;  %v7442_v2 = vpop.f32.mrb[140].mxu1 }
 0x5d2   :  { %v5473_v58 = vadd.f32 %v7442_v2, %v11235_v5  ;;  %v5467_v62 = vpop.f32.mrb[141].mxu1 }
 0x5d3   :  { %v5468_v29 = vadd.f32 %v11235_v5, %v5467_v62 }
 0x5d4   :  { %5723 = vst.msk [vmem:[%s11570_s13 + $0x88] sm:$0xff] %vm123_vm0, %v5473_v58 }
 0x5d5   :  { %5722 = vst.msk [vmem:[%s11570_s13 + $0x80] sm:$0xff] %vm123_vm0, %v5468_v29 }
 0x5d7   :  { %v7445_v56 = vpop.f32.mrb[142].mxu1 }
 0x5d8   :  { %v5483_v46 = vadd.f32 %v7445_v56, %v11235_v5  ;;  %v5477_v18 = vpop.f32.mrb[143].mxu1 }
 0x5d9   :  { %v5478_v48 = vadd.f32 %v11235_v5, %v5477_v18 }
 0x5da   :  { %5725 = vst.msk [vmem:[%s11570_s13 + $0x98] sm:$0xff] %vm123_vm0, %v5483_v46 }
 0x5db   :  { %5724 = vst.msk [vmem:[%s11570_s13 + $0x90] sm:$0xff] %vm123_vm0, %v5478_v48  ;;  %v7448_v9 = vpop.f32.mrb[144].mxu1 }
 0x5dc   :  { %v5493_v6 = vadd.f32 %v7448_v9, %v11235_v5  ;;  %v5487_v16 = vpop.f32.mrb[145].mxu1 }
 0x5dd   :  { %v5488_v15 = vadd.f32 %v11235_v5, %v5487_v16 }
 0x5de   :  { %5727 = vst.msk [vmem:[%s11570_s13 + $0xa8] sm:$0xff] %vm123_vm0, %v5493_v6 }
 0x5df   :  { %5726 = vst.msk [vmem:[%s11570_s13 + $0xa0] sm:$0xff] %vm123_vm0, %v5488_v15  ;;  %v7451_v21 = vpop.f32.mrb[146].mxu1 }
 0x5e0   :  { %v5503_v23 = vadd.f32 %v7451_v21, %v11235_v5  ;;  %v5497_v8 = vpop.f32.mrb[147].mxu1 }
 0x5e1   :  { %v5498_v7 = vadd.f32 %v11235_v5, %v5497_v8 }
 0x5e2   :  { %5729 = vst.msk [vmem:[%s11570_s13 + $0xb8] sm:$0xff] %vm123_vm0, %v5503_v23 }
 0x5e3   :  { %5728 = vst.msk [vmem:[%s11570_s13 + $0xb0] sm:$0xff] %vm123_vm0, %v5498_v7  ;;  %v7454_v10 = vpop.f32.mrb[148].mxu1 }
 0x5e4   :  { %v5513_v28 = vadd.f32 %v7454_v10, %v11235_v5  ;;  %v5507_v63 = vpop.f32.mrb[149].mxu1 }
 0x5e5   :  { %v5508_v36 = vadd.f32 %v11235_v5, %v5507_v63 }
 0x5e6   :  { %5731 = vst.msk [vmem:[%s11570_s13 + $0xc8] sm:$0xff] %vm123_vm0, %v5513_v28 }
 0x5e7   :  { %5730 = vst.msk [vmem:[%s11570_s13 + $0xc0] sm:$0xff] %vm123_vm0, %v5508_v36  ;;  %v7457_v52 = vpop.f32.mrb[150].mxu1 }
 0x5e8   :  { %v5523_v38 = vadd.f32 %v7457_v52, %v11235_v5  ;;  %v5517_v30 = vpop.f32.mrb[151].mxu1 }
 0x5e9   :  { %v5518_v3 = vadd.f32 %v11235_v5, %v5517_v30 }
 0x5ea   :  { %5733 = vst.msk [vmem:[%s11570_s13 + $0xd8] sm:$0xff] %vm123_vm0, %v5523_v38 }
 0x5eb   :  { %5732 = vst.msk [vmem:[%s11570_s13 + $0xd0] sm:$0xff] %vm123_vm0, %v5518_v3  ;;  %v7460_v44 = vpop.f32.mrb[152].mxu1 }
 0x5ec   :  { %v5533_v25 = vadd.f32 %v7460_v44, %v11235_v5  ;;  %v5527_v42 = vpop.f32.mrb[153].mxu1 }
 0x5ed   :  { %v5528_v33 = vadd.f32 %v11235_v5, %v5527_v42 }
 0x5ee   :  { %5735 = vst.msk [vmem:[%s11570_s13 + $0xe8] sm:$0xff] %vm123_vm0, %v5533_v25 }
 0x5ef   :  { %5734 = vst.msk [vmem:[%s11570_s13 + $0xe0] sm:$0xff] %vm123_vm0, %v5528_v33 }
 0x5f1   :  { %v7463_v35 = vpop.f32.mrb[154].mxu1 }
 0x5f2   :  { %v5543_v14 = vadd.f32 %v7463_v35, %v11235_v5  ;;  %v5537_v19 = vpop.f32.mrb[155].mxu1 }
 0x5f3   :  { %v5538_v53 = vadd.f32 %v11235_v5, %v5537_v19 }
 0x5f4   :  { %5737 = vst.msk [vmem:[%s11570_s13 + $0xf8] sm:$0xff] %vm123_vm0, %v5543_v14 }
 0x5f5   :  { %5736 = vst.msk [vmem:[%s11570_s13 + $0xf0] sm:$0xff] %vm123_vm0, %v5538_v53  ;;  %v7466_v55 = vpop.f32.mrb[156].mxu1 }
 0x5f6   :  { %v5553_v37 = vadd.f32 %v7466_v55, %v11235_v5  ;;  %v5547_v45 = vpop.f32.mrb[157].mxu1 }
 0x5f7   :  { %v5548_v17 = vadd.f32 %v11235_v5, %v5547_v45 }
 0x5f8   :  { %5739 = vst.msk [vmem:[%s11570_s13 + $0x108] sm:$0xff] %vm123_vm0, %v5553_v37 }
 0x5f9   :  { %5738 = vst.msk [vmem:[%s11570_s13 + $0x100] sm:$0xff] %vm123_vm0, %v5548_v17  ;;  %v7469_v12 = vpop.f32.mrb[158].mxu1 }
 0x5fa   :  { %v5563_v34 = vadd.f32 %v7469_v12, %v11235_v5  ;;  %v5557_v41 = vpop.f32.mrb[159].mxu1 }
 0x5fb   :  { %v5558_v54 = vadd.f32 %v11235_v5, %v5557_v41 }
 0x5fc   :  { %5741 = vst.msk [vmem:[%s11570_s13 + $0x118] sm:$0xff] %vm123_vm0, %v5563_v34 }
 0x5fd   :  { %5740 = vst.msk [vmem:[%s11570_s13 + $0x110] sm:$0xff] %vm123_vm0, %v5558_v54  ;;  %v7472_v57 = vpop.f32.mrb[160].mxu1 }
 0x5fe   :  { %v5573_v24 = vadd.f32 %v7472_v57, %v11235_v5  ;;  %v5567_v43 = vpop.f32.mrb[161].mxu1 }
 0x5ff   :  { %v5568_v0 = vadd.f32 %v11235_v5, %v5567_v43 }
 0x600   :  { %5743 = vst.msk [vmem:[%s11570_s13 + $0x128] sm:$0xff] %vm123_vm0, %v5573_v24 }
 0x601   :  { %5742 = vst.msk [vmem:[%s11570_s13 + $0x120] sm:$0xff] %vm123_vm0, %v5568_v0  ;;  %v7475_v4 = vpop.f32.mrb[162].mxu1 }
 0x602   :  { %v5583_v32 = vadd.f32 %v7475_v4, %v11235_v5  ;;  %v5577_v40 = vpop.f32.mrb[163].mxu1 }
 0x603   :  { %v5578_v26 = vadd.f32 %v11235_v5, %v5577_v40 }
 0x604   :  { %5745 = vst.msk [vmem:[%s11570_s13 + $0x138] sm:$0xff] %vm123_vm0, %v5583_v32 }
 0x605   :  { %5744 = vst.msk [vmem:[%s11570_s13 + $0x130] sm:$0xff] %vm123_vm0, %v5578_v26  ;;  %v7478_v39 = vpop.f32.mrb[164].mxu1 }
 0x606   :  { %v5593_v47 = vadd.f32 %v7478_v39, %v11235_v5  ;;  %v5587_v50 = vpop.f32.mrb[165].mxu1 }
 0x607   :  { %v5588_v49 = vadd.f32 %v11235_v5, %v5587_v50 }
 0x608   :  { %5747 = vst.msk [vmem:[%s11570_s13 + $0x148] sm:$0xff] %vm123_vm0, %v5593_v47 }
 0x609   :  { %5746 = vst.msk [vmem:[%s11570_s13 + $0x140] sm:$0xff] %vm123_vm0, %v5588_v49  ;;  %v7481_v61 = vpop.f32.mrb[166].mxu1 }
 0x60a   :  { %v5603_v27 = vadd.f32 %v7481_v61, %v11235_v5  ;;  %v5597_v59 = vpop.f32.mrb[167].mxu1 }
 0x60b   :  { %v5598_v60 = vadd.f32 %v11235_v5, %v5597_v59 }
 0x60c   :  { %5749 = vst.msk [vmem:[%s11570_s13 + $0x158] sm:$0xff] %vm123_vm0, %v5603_v27 }
 0x60d   :  { %5748 = vst.msk [vmem:[%s11570_s13 + $0x150] sm:$0xff] %vm123_vm0, %v5598_v60  ;;  %v7484_v31 = vpop.f32.mrb[168].mxu1 }
 0x60e   :  { %v5613_v1 = vadd.f32 %v7484_v31, %v11235_v5  ;;  %v5607_v20 = vpop.f32.mrb[169].mxu1 }
 0x60f   :  { %v5608_v11 = vadd.f32 %v11235_v5, %v5607_v20 }
 0x610   :  { %5751 = vst.msk [vmem:[%s11570_s13 + $0x168] sm:$0xff] %vm123_vm0, %v5613_v1 }
 0x611   :  { %5750 = vst.msk [vmem:[%s11570_s13 + $0x160] sm:$0xff] %vm123_vm0, %v5608_v11  ;;  %v7487_v51 = vpop.f32.mrb[170].mxu1 }
 0x612   :  { %v5623_v22 = vadd.f32 %v7487_v51, %v11235_v5  ;;  %v5617_v13 = vpop.f32.mrb[171].mxu1 }
 0x613   :  { %v5618_v2 = vadd.f32 %v11235_v5, %v5617_v13 }
 0x614   :  { %5753 = vst.msk [vmem:[%s11570_s13 + $0x178] sm:$0xff] %vm123_vm0, %v5623_v22 }
 0x615   :  { %5752 = vst.msk [vmem:[%s11570_s13 + $0x170] sm:$0xff] %vm123_vm0, %v5618_v2 }
 0x617   :  { %v7490_v58 = vpop.f32.mrb[172].mxu1 }
 0x618   :  { %v5633_v62 = vadd.f32 %v7490_v58, %v11235_v5  ;;  %v5627_v29 = vpop.f32.mrb[173].mxu1 }
 0x619   :  { %v5628_v56 = vadd.f32 %v11235_v5, %v5627_v29 }
 0x61a   :  { %5755 = vst.msk [vmem:[%s11570_s13 + $0x188] sm:$0xff] %vm123_vm0, %v5633_v62 }
 0x61b   :  { %5754 = vst.msk [vmem:[%s11570_s13 + $0x180] sm:$0xff] %vm123_vm0, %v5628_v56  ;;  %v7493_v46 = vpop.f32.mrb[174].mxu1 }
 0x61c   :  { %v5643_v18 = vadd.f32 %v7493_v46, %v11235_v5  ;;  %v5637_v48 = vpop.f32.mrb[175].mxu1 }
 0x61d   :  { %v5638_v9 = vadd.f32 %v11235_v5, %v5637_v48 }
 0x61e   :  { %5757 = vst.msk [vmem:[%s11570_s13 + $0x198] sm:$0xff] %vm123_vm0, %v5643_v18 }
 0x61f   :  { %5756 = vst.msk [vmem:[%s11570_s13 + $0x190] sm:$0xff] %vm123_vm0, %v5638_v9  ;;  %v7496_v6 = vpop.f32.mrb[176].mxu1 }
 0x620   :  { %v5653_v16 = vadd.f32 %v7496_v6, %v11235_v5  ;;  %v5647_v15 = vpop.f32.mrb[177].mxu1 }
 0x621   :  { %v5648_v21 = vadd.f32 %v11235_v5, %v5647_v15 }
 0x622   :  { %5759 = vst.msk [vmem:[%s11570_s13 + $0x1a8] sm:$0xff] %vm123_vm0, %v5653_v16 }
 0x623   :  { %5758 = vst.msk [vmem:[%s11570_s13 + $0x1a0] sm:$0xff] %vm123_vm0, %v5648_v21  ;;  %v7499_v23 = vpop.f32.mrb[178].mxu1 }
 0x624   :  { %v5663_v8 = vadd.f32 %v7499_v23, %v11235_v5  ;;  %v5657_v7 = vpop.f32.mrb[179].mxu1 }
 0x625   :  { %v5658_v10 = vadd.f32 %v11235_v5, %v5657_v7 }
 0x626   :  { %5761 = vst.msk [vmem:[%s11570_s13 + $0x1b8] sm:$0xff] %vm123_vm0, %v5663_v8 }
 0x627   :  { %5760 = vst.msk [vmem:[%s11570_s13 + $0x1b0] sm:$0xff] %vm123_vm0, %v5658_v10  ;;  %v7502_v28 = vpop.f32.mrb[180].mxu1 }
 0x628   :  { %v5673_v63 = vadd.f32 %v7502_v28, %v11235_v5  ;;  %v5667_v36 = vpop.f32.mrb[181].mxu1 }
 0x629   :  { %v5668_v52 = vadd.f32 %v11235_v5, %v5667_v36 }
 0x62a   :  { %5763 = vst.msk [vmem:[%s11570_s13 + $0x1c8] sm:$0xff] %vm123_vm0, %v5673_v63 }
 0x62b   :  { %5762 = vst.msk [vmem:[%s11570_s13 + $0x1c0] sm:$0xff] %vm123_vm0, %v5668_v52  ;;  %v7505_v38 = vpop.f32.mrb[182].mxu1 }
 0x62c   :  { %v5683_v30 = vadd.f32 %v7505_v38, %v11235_v5  ;;  %v5677_v3 = vpop.f32.mrb[183].mxu1 }
 0x62d   :  { %v5678_v44 = vadd.f32 %v11235_v5, %v5677_v3 }
 0x62e   :  { %5765 = vst.msk [vmem:[%s11570_s13 + $0x1d8] sm:$0xff] %vm123_vm0, %v5683_v30 }
 0x62f   :  { %5764 = vst.msk [vmem:[%s11570_s13 + $0x1d0] sm:$0xff] %vm123_vm0, %v5678_v44 }
 0x630   :  { %v7508_v25 = vpop.f32.mrb[184].mxu1 }
 0x631   :  { %v5693_v42 = vadd.f32 %v7508_v25, %v11235_v5  ;;  %v5687_v33 = vpop.f32.mrb[185].mxu1 }
 0x632   :  { %v5688_v35 = vadd.f32 %v11235_v5, %v5687_v33 }
 0x633   :  { %5767 = vst.msk [vmem:[%s11570_s13 + $0x1e8] sm:$0xff] %vm123_vm0, %v5693_v42 }
 0x634   :  { %5766 = vst.msk [vmem:[%s11570_s13 + $0x1e0] sm:$0xff] %vm123_vm0, %v5688_v35  ;;  %v7511_v14 = vpop.f32.mrb[186].mxu1 }
 0x635   :  { %v5703_v19 = vadd.f32 %v7511_v14, %v11235_v5  ;;  %v5697_v53 = vpop.f32.mrb[187].mxu1 }
 0x636   :  { %v5698_v55 = vadd.f32 %v11235_v5, %v5697_v53 }
 0x637   :  { %5769 = vst.msk [vmem:[%s11570_s13 + $0x1f8] sm:$0xff] %vm123_vm0, %v5703_v19 }
 0x638   :  { %5768 = vst.msk [vmem:[%s11570_s13 + $0x1f0] sm:$0xff] %vm123_vm0, %v5698_v55 }

</bundles_post_ra>
